<compile_context>
chip_gen: v6e
topology: v6e:2x2x1
jax: 0.10.0
libtpu: 0.0.40
codegen_flags: <defaults>
</compile_context>

<pallas_src>
import math
from functools import partial

import jax
import jax.numpy as jnp
from jax.experimental import pallas as pl
from jax.experimental.pallas import tpu as pltpu

EPS = 1e-5
MATMUL_DTYPE = jnp.bfloat16     # MXU operand dtype (f32 accumulation everywhere)
BLOCK_M = 512                   # row tile for GEMM kernels
LN_BLOCK_M = 2048               # row tile for the narrow-D LayerNorm kernels


def _pick_vmem_limit():
    """Generation-aware scoped-VMEM limit (~75% of physical, capped at 96 MiB)."""
    try:
        info = pltpu.get_tpu_info()
        cap = int(getattr(info, "vmem_capacity_bytes", 128 * 1024 * 1024))
    except Exception:
        cap = 64 * 1024 * 1024
    return int(min(cap * 3 // 4, 96 * 1024 * 1024))


VMEM_LIMIT = _pick_vmem_limit()


def _round_up_lanes(n, lanes=128):
    return max(lanes, ((n + lanes - 1) // lanes) * lanes)


# ----------------------------------------------------------------------------
# Tiled matmul (+ optional bias):  [M, K] @ [K, N] (+ b[N]) -> [M, N]
# ----------------------------------------------------------------------------
def _matmul_kernel(a_ref, b_ref, o_ref):
    o_ref[...] = jnp.dot(a_ref[...], b_ref[...],
                         preferred_element_type=jnp.float32).astype(o_ref.dtype)


def _matmul_bias_kernel(a_ref, b_ref, bias_ref, o_ref):
    acc = jnp.dot(a_ref[...], b_ref[...], preferred_element_type=jnp.float32)
    o_ref[...] = (acc + bias_ref[...]).astype(o_ref.dtype)


def pallas_matmul(a, b, bias=None, out_dtype=jnp.float32, block_m=BLOCK_M):
    M, K = a.shape
    N = b.shape[1]
    a = a.astype(MATMUL_DTYPE)
    b = b.astype(MATMUL_DTYPE)
    bm = M if M <= block_m else block_m
    grid = (pl.cdiv(M, bm),)
    cp = pltpu.CompilerParams(
        dimension_semantics=("parallel",), vmem_limit_bytes=VMEM_LIMIT)
    if bias is None:
        return pl.pallas_call(
            _matmul_kernel,
            out_shape=jax.ShapeDtypeStruct((M, N), out_dtype),
            grid=grid,
            in_specs=[pl.BlockSpec((bm, K), lambda i: (i, 0)),
                      pl.BlockSpec((K, N), lambda i: (0, 0))],
            out_specs=pl.BlockSpec((bm, N), lambda i: (i, 0)),
            compiler_params=cp,
        )(a, b)
    bias2 = bias.reshape(1, N).astype(jnp.float32)
    return pl.pallas_call(
        _matmul_bias_kernel,
        out_shape=jax.ShapeDtypeStruct((M, N), out_dtype),
        grid=grid,
        in_specs=[pl.BlockSpec((bm, K), lambda i: (i, 0)),
                  pl.BlockSpec((K, N), lambda i: (0, 0)),
                  pl.BlockSpec((1, N), lambda i: (0, 0))],
        out_specs=pl.BlockSpec((bm, N), lambda i: (i, 0)),
        compiler_params=cp,
    )(a, b, bias2)


# ----------------------------------------------------------------------------
# Two-direction matmul: A[M,K] @ W[K, 2N] + b -> out[2, M, N]
# (used for the fused fwd/bwd LSTM gate projection; writes the direction-major
#  layout directly so no stack / transpose pass is needed afterwards)
# ----------------------------------------------------------------------------
def _matmul_bias_2dir_kernel(a_ref, b_ref, bias_ref, o_ref):
    acc = jnp.dot(a_ref[...], b_ref[...], preferred_element_type=jnp.float32)
    o_ref[...] = (acc + bias_ref[...]).astype(o_ref.dtype)


def pallas_matmul_2dir(a, b, bias2, out_dtype=jnp.float32, block_m=BLOCK_M):
    M, K = a.shape
    N = b.shape[1] // 2
    a = a.astype(MATMUL_DTYPE)
    b = b.astype(MATMUL_DTYPE)
    bm = M if M <= block_m else block_m
    return pl.pallas_call(
        _matmul_bias_2dir_kernel,
        out_shape=jax.ShapeDtypeStruct((2, M, N), out_dtype),
        grid=(2, pl.cdiv(M, bm)),
        in_specs=[pl.BlockSpec((bm, K), lambda d, m: (m, 0)),
                  pl.BlockSpec((K, N), lambda d, m: (0, d)),
                  pl.BlockSpec((None, 1, N), lambda d, m: (d, 0, 0))],
        out_specs=pl.BlockSpec((None, bm, N), lambda d, m: (d, m, 0)),
        compiler_params=pltpu.CompilerParams(
            dimension_semantics=("parallel", "parallel"),
            vmem_limit_bytes=VMEM_LIMIT),
    )(a, b, bias2.astype(jnp.float32))


# ----------------------------------------------------------------------------
# Tiled LayerNorm over the last dim:  x[M, D], gamma/beta[D]
# ----------------------------------------------------------------------------
def _ln_kernel(x_ref, g_ref, b_ref, o_ref, *, eps):
    x = x_ref[...].astype(jnp.float32)
    mu = jnp.mean(x, axis=-1, keepdims=True)
    var = jnp.mean((x - mu) ** 2, axis=-1, keepdims=True)
    y = (x - mu) * jax.lax.rsqrt(var + eps) * g_ref[...] + b_ref[...]
    o_ref[...] = y.astype(o_ref.dtype)


def pallas_ln_lastdim(x2d, g, b, eps, out_dtype=jnp.float32, block_m=LN_BLOCK_M):
    M, D = x2d.shape
    bm = M if M <= block_m else block_m
    return pl.pallas_call(
        partial(_ln_kernel, eps=eps),
        out_shape=jax.ShapeDtypeStruct((M, D), out_dtype),
        grid=(pl.cdiv(M, bm),),
        in_specs=[pl.BlockSpec((bm, D), lambda i: (i, 0)),
                  pl.BlockSpec((1, D), lambda i: (0, 0)),
                  pl.BlockSpec((1, D), lambda i: (0, 0))],
        out_specs=pl.BlockSpec((bm, D), lambda i: (i, 0)),
        compiler_params=pltpu.CompilerParams(
            dimension_semantics=("parallel",), vmem_limit_bytes=VMEM_LIMIT),
    )(x2d, g.reshape(1, D).astype(jnp.float32), b.reshape(1, D).astype(jnp.float32))


# ----------------------------------------------------------------------------
# Grouped PReLU + LayerNorm over the last dim (one group per attention head),
# with optional static scale (for folding 1/sqrt(Dq) into Q) and optional
# fused residual add (for the final projection epilogue).
#   x[G, M, D], gamma/beta[G, 1, D], alpha[G] (SMEM scalar per group)
# ----------------------------------------------------------------------------
def _prelu_ln_group_kernel(alpha_ref, x_ref, g_ref, b_ref, o_ref, *, eps, scale):
    a = alpha_ref[pl.program_id(0)]
    x = x_ref[...].astype(jnp.float32)
    x = jnp.where(x >= 0.0, x, a * x)
    mu = jnp.mean(x, axis=-1, keepdims=True)
    var = jnp.mean((x - mu) ** 2, axis=-1, keepdims=True)
    y = (x - mu) * jax.lax.rsqrt(var + eps) * g_ref[...] + b_ref[...]
    if scale != 1.0:
        y = y * scale
    o_ref[...] = y.astype(o_ref.dtype)


def _prelu_ln_res_group_kernel(alpha_ref, x_ref, r_ref, g_ref, b_ref, o_ref, *, eps):
    a = alpha_ref[pl.program_id(0)]
    x = x_ref[...].astype(jnp.float32)
    x = jnp.where(x >= 0.0, x, a * x)
    mu = jnp.mean(x, axis=-1, keepdims=True)
    var = jnp.mean((x - mu) ** 2, axis=-1, keepdims=True)
    y = (x - mu) * jax.lax.rsqrt(var + eps) * g_ref[...] + b_ref[...]
    o_ref[...] = (y + r_ref[...].astype(jnp.float32)).astype(o_ref.dtype)


def pallas_prelu_ln_group(x3d, alphas, gammas, betas, eps, *, scale=1.0,
                          residual=None, out_dtype=jnp.float32,
                          block_m=LN_BLOCK_M):
    G, M, D = x3d.shape
    bm = M if M <= block_m else block_m
    grid = (G, pl.cdiv(M, bm))
    cp = pltpu.CompilerParams(
        dimension_semantics=("parallel", "parallel"), vmem_limit_bytes=VMEM_LIMIT)
    alph = alphas.astype(jnp.float32)
    gam = gammas.astype(jnp.float32)
    bet = betas.astype(jnp.float32)
    if residual is None:
        return pl.pallas_call(
            partial(_prelu_ln_group_kernel, eps=eps, scale=float(scale)),
            out_shape=jax.ShapeDtypeStruct((G, M, D), out_dtype),
            grid=grid,
            in_specs=[
                pl.BlockSpec(memory_space=pltpu.MemorySpace.SMEM),
                pl.BlockSpec((None, bm, D), lambda h, m: (h, m, 0)),
                pl.BlockSpec((None, 1, D), lambda h, m: (h, 0, 0)),
                pl.BlockSpec((None, 1, D), lambda h, m: (h, 0, 0)),
            ],
            out_specs=pl.BlockSpec((None, bm, D), lambda h, m: (h, m, 0)),
            compiler_params=cp,
        )(alph, x3d, gam, bet)
    return pl.pallas_call(
        partial(_prelu_ln_res_group_kernel, eps=eps),
        out_shape=jax.ShapeDtypeStruct((G, M, D), out_dtype),
        grid=grid,
        in_specs=[
            pl.BlockSpec(memory_space=pltpu.MemorySpace.SMEM),
            pl.BlockSpec((None, bm, D), lambda h, m: (h, m, 0)),
            pl.BlockSpec((None, bm, D), lambda h, m: (h, m, 0)),
            pl.BlockSpec((None, 1, D), lambda h, m: (h, 0, 0)),
            pl.BlockSpec((None, 1, D), lambda h, m: (h, 0, 0)),
        ],
        out_specs=pl.BlockSpec((None, bm, D), lambda h, m: (h, m, 0)),
        compiler_params=cp,
    )(alph, x3d, residual, gam, bet)


# ----------------------------------------------------------------------------
# Bidirectional LSTM recurrence.  The input projection (x @ Wih + b) is hoisted
# out into one fused GEMM (pallas_matmul_2dir) that produces gx=[2, L, N, 4Hp];
# here each grid step (= one direction, "parallel" -> one TC per direction on
# v7x) only does the per-step h @ Whh.  Gate slices are lane-aligned because
# Hp is a multiple of 128.  The backward direction reads / writes position
# L-1-t directly, so no HBM reversal passes are needed.
# ----------------------------------------------------------------------------
def _bilstm_rec_kernel(gx_ref, whh_ref, o_ref, h_sc, c_sc, *, hidden_p, seq_len):
    Hp = hidden_p
    d = pl.program_id(0)
    h_sc[...] = jnp.zeros_like(h_sc)
    c_sc[...] = jnp.zeros_like(c_sc)

    def step(t, carry):
        idx = jnp.where(d == 0, t, seq_len - 1 - t)
        gates = gx_ref[idx] + jnp.dot(
            h_sc[...].astype(whh_ref.dtype), whh_ref[...],
            preferred_element_type=jnp.float32)
        i = jax.nn.sigmoid(gates[:, 0 * Hp:1 * Hp])
        f = jax.nn.sigmoid(gates[:, 1 * Hp:2 * Hp])
        g = jnp.tanh(gates[:, 2 * Hp:3 * Hp])
        o = jax.nn.sigmoid(gates[:, 3 * Hp:4 * Hp])
        c_new = f * c_sc[...] + i * g
        h_new = o * jnp.tanh(c_new)
        c_sc[...] = c_new
        h_sc[...] = h_new
        o_ref[idx] = h_new
        return carry

    jax.lax.fori_loop(0, seq_len, step, 0)


def pallas_bilstm_rec(gx, whh, Hp, L, N):
    """gx: [2, L, N, 4Hp] precomputed gate inputs; whh: [2, Hp, 4Hp] (bf16).

    Returns hidden states [2, L, N, Hp] (backward direction already written at
    its original sequence positions).
    """
    G4 = 4 * Hp
    # TODO(synk): stream gx in L-chunks (emit_pipeline) for long sequences so
    # the per-direction block stays within ~half of physical VMEM on v7x.
    return pl.pallas_call(
        partial(_bilstm_rec_kernel, hidden_p=Hp, seq_len=L),
        out_shape=jax.ShapeDtypeStruct((2, L, N, Hp), jnp.float32),
        grid=(2,),
        in_specs=[
            pl.BlockSpec((None, L, N, G4), lambda d: (d, 0, 0, 0)),
            pl.BlockSpec((None, Hp, G4), lambda d: (d, 0, 0)),
        ],
        out_specs=pl.BlockSpec((None, L, N, Hp), lambda d: (d, 0, 0, 0)),
        scratch_shapes=[pltpu.VMEM((N, Hp), jnp.float32),
                        pltpu.VMEM((N, Hp), jnp.float32)],
        compiler_params=pltpu.CompilerParams(
            dimension_semantics=("parallel",), vmem_limit_bytes=VMEM_LIMIT),
    )(gx, whh)


def _pad_gate_cols(wt, H, Hp):
    """[rows, 4H] -> [rows, 4Hp] with per-gate zero padding (lane alignment)."""
    rows = wt.shape[0]
    wt = wt.reshape(rows, 4, H)
    wt = jnp.pad(wt, ((0, 0), (0, 0), (0, Hp - H)))
    return wt.reshape(rows, 4 * Hp)


def _pack_bilstm(lp, H, Hp):
    wih = jnp.concatenate(
        [_pad_gate_cols(lp["Wih"].T, H, Hp),
         _pad_gate_cols(lp["Wih_rev"].T, H, Hp)], axis=1)            # [In, 8Hp]
    bias = jnp.stack(
        [_pad_gate_cols((lp["bih"] + lp["bhh"]).reshape(1, -1), H, Hp),
         _pad_gate_cols((lp["bih_rev"] + lp["bhh_rev"]).reshape(1, -1), H, Hp)],
        axis=0)                                                       # [2, 1, 4Hp]

    def pack_whh(w):
        wt = _pad_gate_cols(w.T, H, Hp)                               # [H, 4Hp]
        return jnp.pad(wt, ((0, Hp - H), (0, 0)))                     # [Hp, 4Hp]

    whh = jnp.stack([pack_whh(lp["Whh"]), pack_whh(lp["Whh_rev"])], axis=0)
    return wih, bias, whh.astype(MATMUL_DTYPE)


# ----------------------------------------------------------------------------
# Batched full-sequence attention: q/k [NB, T, Dq], v [NB, T, Dv], bf16 MXU
# operands, f32 softmax stats, 1/sum applied after the PV matmul on the EUP.
# ----------------------------------------------------------------------------
def _attn_kernel(q_ref, k_ref, v_ref, o_ref):
    s = jnp.einsum("gqd,gkd->gqk", q_ref[...], k_ref[...],
                   preferred_element_type=jnp.float32)
    s = s - jnp.max(s, axis=-1, keepdims=True)
    p = jnp.exp(s)
    l = jnp.sum(p, axis=-1, keepdims=True)
    acc = jnp.einsum("gqk,gkd->gqd", p.astype(v_ref.dtype), v_ref[...],
                     preferred_element_type=jnp.float32)
    o_ref[...] = (acc * pl.reciprocal(l, approx=True)).astype(o_ref.dtype)


def pallas_attention(q, k, v, out_dtype=jnp.bfloat16):
    NB, T, Dq = q.shape
    Dv = v.shape[-1]
    q = q.astype(MATMUL_DTYPE)
    k = k.astype(MATMUL_DTYPE)
    v = v.astype(MATMUL_DTYPE)
    # size the group tile from the VMEM budget (full-T scores are the big term)
    per_group = (T * T * 4 + T * T * 2                      # f32 scores + bf16 probs
                 + 2 * 2 * T * (2 * Dq + Dv)                # double-buffered q/k/v
                 + 2 * 2 * T * Dv)                          # double-buffered out
    g = max(1, (VMEM_LIMIT // 2) // max(per_group, 1))
    g = int(min(g, NB, 16))
    return pl.pallas_call(
        _attn_kernel,
        out_shape=jax.ShapeDtypeStruct((NB, T, Dv), out_dtype),
        grid=(pl.cdiv(NB, g),),
        in_specs=[pl.BlockSpec((g, T, Dq), lambda i: (i, 0, 0)),
                  pl.BlockSpec((g, T, Dq), lambda i: (i, 0, 0)),
                  pl.BlockSpec((g, T, Dv), lambda i: (i, 0, 0))],
        out_specs=pl.BlockSpec((g, T, Dv), lambda i: (i, 0, 0)),
        compiler_params=pltpu.CompilerParams(
            dimension_semantics=("parallel",), vmem_limit_bytes=VMEM_LIMIT),
    )(q, k, v)


# ----------------------------------------------------------------------------
# RNN branch (intra: sequence over Q ; inter: sequence over T), channel-last.
# ----------------------------------------------------------------------------
def rnn_branch(xcl, gamma, beta, lp, lin_w, lin_b, ks, hs, hidden, eps, seq_axis):
    B, T, Q, C = xcl.shape
    # LayerNormalization4D over C; bf16 output (only feeds the unfold/GEMM path)
    xn = pallas_ln_lastdim(xcl.reshape(-1, C), gamma, beta, eps,
                           out_dtype=jnp.bfloat16).reshape(B, T, Q, C)

    if seq_axis == 2:                 # intra: batch over (B, T), sequence over Q
        S_keep, S_seq = T, Q
        xseq = xn
    else:                             # inter: batch over (B, Q), sequence over T
        S_keep, S_seq = Q, T
        xseq = xn.transpose(0, 2, 1, 3)

    N = B * S_keep
    L = (S_seq - ks) // hs + 1

    # unfold along the sequence axis (torch F.unfold order: c outer, k inner),
    # rows ordered (l, n) so the gate GEMM writes gx in the kernel's layout.
    # TODO(synk): replace with an in-kernel strided pl.ds gather to avoid
    # materializing the ks-expanded input.
    xt = xseq.reshape(N, S_seq, C).transpose(1, 0, 2)                 # [S_seq, N, C]
    taps = [xt[k:k + (L - 1) * hs + 1:hs] for k in range(ks)]         # ks x [L, N, C]
    u2d = jnp.stack(taps, axis=-1).reshape(L * N, C * ks)             # [L*N, C*ks]

    # fused fwd/bwd input projection (one GEMM) + bidirectional recurrence
    Hp = _round_up_lanes(hidden)
    wih, bias2, whh = _pack_bilstm(lp, hidden, Hp)
    gx = pallas_matmul_2dir(u2d, wih, bias2)                          # [2, L*N, 4Hp]
    gx = gx.reshape(2, L, N, 4 * Hp)
    h = pallas_bilstm_rec(gx, whh, Hp, L, N)                          # [2, L, N, Hp]
    h2 = h.transpose(2, 1, 0, 3).reshape(N * L, 2 * Hp)               # rows (n, l)

    # ConvTranspose1d: all ks taps in one GEMM, then one overlap-add
    lw = lin_w.reshape(2, hidden, C * ks)
    lw = jnp.pad(lw, ((0, 0), (0, Hp - hidden), (0, 0))).reshape(2 * Hp, C * ks)
    y = pallas_matmul(h2, lw)                                         # [N*L, C*ks]
    y = y.reshape(N, L, C, ks)
    out = jnp.zeros((N, S_seq, C), jnp.float32)
    # TODO(synk): fold the ks overlap-add passes into one Pallas scatter kernel.
    for k in range(ks):
        out = out.at[:, k:k + (L - 1) * hs + 1:hs, :].add(y[:, :, :, k])
    out = out + lin_b.reshape(1, 1, C)
    out = out.reshape(B, S_keep, S_seq, C)
    if seq_axis != 2:
        out = out.transpose(0, 2, 1, 3)
    return out + xcl


# ----------------------------------------------------------------------------
# GridNetBlock forward
# ----------------------------------------------------------------------------
def gridnet_block_forward(x, p, *, emb_ks, emb_hs, n_head, hidden, eps=EPS):
    B, C, old_T, old_Q = x.shape
    T = math.ceil((old_T - emb_ks) / emb_hs) * emb_hs + emb_ks
    Q = math.ceil((old_Q - emb_ks) / emb_hs) * emb_hs + emb_ks
    x = jnp.pad(x, ((0, 0), (0, 0), (0, T - old_T), (0, Q - old_Q)))
    xcl = x.transpose(0, 2, 3, 1)                    # channel-last [B, T, Q, C]

    intra = rnn_branch(xcl, p["intra_norm_g"], p["intra_norm_b"], p["intra_rnn"],
                       p["intra_lin_w"], p["intra_lin_b"], emb_ks, emb_hs,
                       hidden, eps, seq_axis=2)
    inter = rnn_branch(intra, p["inter_norm_g"], p["inter_norm_b"], p["inter_rnn"],
                       p["inter_lin_w"], p["inter_lin_b"], emb_ks, emb_hs,
                       hidden, eps, seq_axis=1)
    inter = inter[:, :old_T, :old_Q, :]              # crop, [B, oT, oQ, C]

    # -------------------- full-band attention --------------------
    oT, oQ = old_T, old_Q
    Dq = p["q_gamma"].shape[-1]
    Dv = p["v_gamma"].shape[-1]
    E = Dq // oQ
    Cv = Dv // oQ
    nE = n_head * E

    xf = inter.reshape(B * oT * oQ, C)
    # fused Q|K|V head projections; bf16 intermediate (feeds PReLU+LN kernels)
    y = pallas_matmul(xf, p["qkv_w"], p["qkv_b"], out_dtype=jnp.bfloat16)
    q_all = y[:, :nE]
    k_all = y[:, nE:2 * nE]
    v_all = y[:, 2 * nE:]

    def to_heads(z, d):
        # [B*oT*oQ, n_head*d] -> [n_head, B*oT, oQ*d]  (lane order = (freq, chan))
        z = z.reshape(B, oT, oQ, n_head, d).transpose(3, 0, 1, 2, 4)
        return z.reshape(n_head, B * oT, oQ * d)

    scale = 1.0 / math.sqrt(float(Dq))               # folded into Q's PReLU+LN
    qn = pallas_prelu_ln_group(to_heads(q_all, E), p["q_alpha"], p["q_gamma"],
                               p["q_beta"], eps, scale=scale,
                               out_dtype=jnp.bfloat16)
    kn = pallas_prelu_ln_group(to_heads(k_all, E), p["k_alpha"], p["k_gamma"],
                               p["k_beta"], eps, out_dtype=jnp.bfloat16)
    vn = pallas_prelu_ln_group(to_heads(v_all, Cv), p["v_alpha"], p["v_gamma"],
                               p["v_beta"], eps, out_dtype=jnp.bfloat16)

    qa = qn.reshape(n_head * B, oT, Dq)
    ka = kn.reshape(n_head * B, oT, Dq)
    va = vn.reshape(n_head * B, oT, Dv)

    av = pallas_attention(qa, ka, va)                # bf16 [n_head*B, oT, oQ*Cv]
    av = av.reshape(n_head, B, oT, oQ, Cv).transpose(1, 2, 3, 0, 4)
    av = av.reshape(B * oT * oQ, n_head * Cv)        # channels (head, Cv)

    proj = pallas_matmul(av, p["proj_w"], p["proj_b"], out_dtype=jnp.bfloat16)
    projg = proj.reshape(1, B * oT, oQ * C)          # lane order (q, c)
    resg = inter.reshape(1, B * oT, oQ * C)
    outg = pallas_prelu_ln_group(projg, p["proj_alpha"], p["proj_gamma"],
                                 p["proj_beta"], eps, residual=resg,
                                 out_dtype=jnp.float32)
    out_cl = outg.reshape(B, oT, oQ, C)
    return out_cl.transpose(0, 3, 1, 2)              # back to [B, C, oT, oQ]


# ----------------------------------------------------------------------------
# Deterministic parameter init (shapes per GridNetBlock.__init__)
# ----------------------------------------------------------------------------
def _flatten_cf(g):
    # LayerNormalization4DCF param [cout, n_freqs] -> flat [1, n_freqs*cout]
    # in (freq, chan) lane order (matches the channel-last flattening above)
    return g.T.reshape(1, -1)


def init_params(key, emb_dim, emb_ks, emb_hs, n_freqs, hidden, n_head, approx_qk_dim):
    C = emb_dim
    in_ch = emb_dim * emb_ks
    E = math.floor(approx_qk_dim * 1.0 / n_freqs)
    Cv = C // n_head
    H = hidden
    keys = iter(jax.random.split(key, 512))

    def u(shape, s=0.1):
        return jax.random.uniform(next(keys), shape, jnp.float32, -s, s)

    def lstm_params():
        d = {}
        for suf in ("", "_rev"):
            d["Wih" + suf] = u((4 * H, in_ch))
            d["Whh" + suf] = u((4 * H, H))
            d["bih" + suf] = u((4 * H,))
            d["bhh" + suf] = u((4 * H,))
        return d

    def cf_gamma_beta(cout):
        g = jnp.ones((cout, n_freqs), jnp.float32)
        b = jnp.zeros((cout, n_freqs), jnp.float32)
        return _flatten_cf(g), _flatten_cf(b)

    # per-head 1x1 conv weights (torch Conv2d layout [cout, cin]) then fused
    q_w = [u((E, C)) for _ in range(n_head)]
    q_b = [u((E,)) for _ in range(n_head)]
    k_w = [u((E, C)) for _ in range(n_head)]
    k_b = [u((E,)) for _ in range(n_head)]
    v_w = [u((Cv, C)) for _ in range(n_head)]
    v_b = [u((Cv,)) for _ in range(n_head)]

    p = {
        "intra_norm_g": jnp.ones((C,), jnp.float32),
        "intra_norm_b": jnp.zeros((C,), jnp.float32),
        "intra_rnn": lstm_params(),
        "intra_lin_w": u((2 * H, C, emb_ks)),   # ConvTranspose1d weight [in, out, ks]
        "intra_lin_b": u((C,)),
        "inter_norm_g": jnp.ones((C,), jnp.float32),
        "inter_norm_b": jnp.zeros((C,), jnp.float32),
        "inter_rnn": lstm_params(),
        "inter_lin_w": u((2 * H, C, emb_ks)),
        "inter_lin_b": u((C,)),
        # fused QKV projection: columns = [Q heads | K heads | V heads]
        "qkv_w": jnp.concatenate([w.T for w in (q_w + k_w + v_w)], axis=1),
        "qkv_b": jnp.concatenate(q_b + k_b + v_b, axis=0),
        "q_alpha": jnp.full((n_head,), 0.25, jnp.float32),   # nn.PReLU() default
        "k_alpha": jnp.full((n_head,), 0.25, jnp.float32),
        "v_alpha": jnp.full((n_head,), 0.25, jnp.float32),
        "q_gamma": jnp.stack([cf_gamma_beta(E)[0] for _ in range(n_head)], 0),
        "q_beta": jnp.stack([cf_gamma_beta(E)[1] for _ in range(n_head)], 0),
        "k_gamma": jnp.stack([cf_gamma_beta(E)[0] for _ in range(n_head)], 0),
        "k_beta": jnp.stack([cf_gamma_beta(E)[1] for _ in range(n_head)], 0),
        "v_gamma": jnp.stack([cf_gamma_beta(Cv)[0] for _ in range(n_head)], 0),
        "v_beta": jnp.stack([cf_gamma_beta(Cv)[1] for _ in range(n_head)], 0),
        "proj_w": u((C, C)).T,
        "proj_b": u((C,)),
        "proj_alpha": jnp.full((1,), 0.25, jnp.float32),
        "proj_gamma": cf_gamma_beta(C)[0][None],   # [1, 1, n_freqs*C]
        "proj_beta": cf_gamma_beta(C)[1][None],
    }
    return p


# ----------------------------------------------------------------------------
if __name__ == "__main__":
    # small config consistent with the module's constraints
    B, emb_dim, old_T, old_Q = 2, 8, 9, 8
    emb_ks, emb_hs = 3, 2
    n_freqs = old_Q               # LN4DCF requires n_freqs == cropped Q
    hidden = 16
    n_head = 4
    approx_qk_dim = 64            # -> E = 8

    key = jax.random.PRNGKey(0)
    pkey, xkey = jax.random.split(key)
    params = init_params(pkey, emb_dim, emb_ks, emb_hs, n_freqs, hidden,
                         n_head, approx_qk_dim)
    x = jax.random.normal(xkey, (B, emb_dim, old_T, old_Q), jnp.float32)

    fwd = jax.jit(partial(gridnet_block_forward, emb_ks=emb_ks, emb_hs=emb_hs,
                          n_head=n_head, hidden=hidden))
    out = fwd(x, params)
    out = jax.block_until_ready(out)

    assert out.shape == (B, emb_dim, old_T, old_Q), out.shape
    assert bool(jnp.all(jnp.isfinite(out)))
    print("KERNEL_OK")
</pallas_src>

<mosaic_0001>
module attributes {stable_mosaic.version = 11 : i64} {
  func.func @_ln_kernel(%arg0: i32, %arg1: memref<162x8xf32, #tpu.memory_space<vmem>>, %arg2: memref<1x8xf32, #tpu.memory_space<vmem>>, %arg3: memref<1x8xf32, #tpu.memory_space<vmem>>, %arg4: memref<162x8xbf16, #tpu.memory_space<vmem>>) attributes {dimension_semantics = [#tpu.dimension_semantics<parallel>], iteration_bounds = array<i64: 1>, scalar_prefetch = 0 : i64, scratch_operands = 0 : i64, tpu.core_type = #tpu.core_type<tc>, window_params = [{transform_indices = @transform_0, window_bounds = array<i64: 162, 8>}, {pipeline_mode = #tpu.pipeline_mode<synchronous>, transform_indices = @transform_1, window_bounds = array<i64: 1, 8>}, {pipeline_mode = #tpu.pipeline_mode<synchronous>, transform_indices = @transform_2, window_bounds = array<i64: 1, 8>}, {transform_indices = @transform_3, window_bounds = array<i64: 162, 8>}]} {
    %c0 = arith.constant 0 : index
    %c0_0 = arith.constant 0 : index
    %0 = vector.load %arg1[%c0, %c0_0] : memref<162x8xf32, #tpu.memory_space<vmem>>, vector<162x8xf32>
    %cst = arith.constant dense<0.000000e+00> : vector<162xf32>
    %1 = vector.multi_reduction <add>, %0, %cst [1] : vector<162x8xf32> to vector<162xf32>
    %2 = vector.shape_cast %1 : vector<162xf32> to vector<162x1xf32>
    %cst_1 = arith.constant 8.000000e+00 : f32
    %3 = vector.broadcast %cst_1 : f32 to vector<162x1xf32>
    %4 = arith.divf %2, %3 : vector<162x1xf32>
    %5 = vector.broadcast %4 : vector<162x1xf32> to vector<162x8xf32>
    %6 = arith.subf %0, %5 : vector<162x8xf32>
    %7 = arith.mulf %6, %6 : vector<162x8xf32>
    %cst_2 = arith.constant dense<0.000000e+00> : vector<162xf32>
    %8 = vector.multi_reduction <add>, %7, %cst_2 [1] : vector<162x8xf32> to vector<162xf32>
    %9 = vector.shape_cast %8 : vector<162xf32> to vector<162x1xf32>
    %cst_3 = arith.constant 8.000000e+00 : f32
    %10 = vector.broadcast %cst_3 : f32 to vector<162x1xf32>
    %11 = arith.divf %9, %10 : vector<162x1xf32>
    %12 = vector.broadcast %4 : vector<162x1xf32> to vector<162x8xf32>
    %13 = arith.subf %0, %12 : vector<162x8xf32>
    %cst_4 = arith.constant 9.99999974E-6 : f32
    %14 = vector.broadcast %cst_4 : f32 to vector<162x1xf32>
    %15 = arith.addf %11, %14 : vector<162x1xf32>
    %16 = math.rsqrt %15 : vector<162x1xf32>
    %17 = vector.broadcast %16 : vector<162x1xf32> to vector<162x8xf32>
    %18 = arith.mulf %13, %17 : vector<162x8xf32>
    %c0_5 = arith.constant 0 : index
    %c0_6 = arith.constant 0 : index
    %19 = vector.load %arg2[%c0_5, %c0_6] : memref<1x8xf32, #tpu.memory_space<vmem>>, vector<1x8xf32>
    %20 = vector.broadcast %19 : vector<1x8xf32> to vector<162x8xf32>
    %21 = arith.mulf %18, %20 : vector<162x8xf32>
    %c0_7 = arith.constant 0 : index
    %c0_8 = arith.constant 0 : index
    %22 = vector.load %arg3[%c0_7, %c0_8] : memref<1x8xf32, #tpu.memory_space<vmem>>, vector<1x8xf32>
    %23 = vector.broadcast %22 : vector<1x8xf32> to vector<162x8xf32>
    %24 = arith.addf %21, %23 : vector<162x8xf32>
    %25 = arith.truncf %24 : vector<162x8xf32> to vector<162x8xbf16>
    %c0_9 = arith.constant 0 : index
    %c0_10 = arith.constant 0 : index
    %26 = vector.load %arg4[%c0_9, %c0_10] : memref<162x8xbf16, #tpu.memory_space<vmem>>, vector<162x8xbf16>
    tpu.vector_store %arg4[%c0_9, %c0_10], %25 {strides = array<i32>} : memref<162x8xbf16, #tpu.memory_space<vmem>>, vector<162x8xbf16>,
    return
  }
  func.func @transform_0(%arg0: i32) -> (i32, i32) {
    %c0_i32 = arith.constant 0 : i32
    %c0_i32_0 = arith.constant 0 : i32
    return %arg0, %c0_i32 : i32, i32
  }
  func.func @transform_1(%arg0: i32) -> (i32, i32) {
    %c0_i32 = arith.constant 0 : i32
    %c0_i32_0 = arith.constant 0 : i32
    %c0_i32_1 = arith.constant 0 : i32
    return %c0_i32, %c0_i32_0 : i32, i32
  }
  func.func @transform_2(%arg0: i32) -> (i32, i32) {
    %c0_i32 = arith.constant 0 : i32
    %c0_i32_0 = arith.constant 0 : i32
    %c0_i32_1 = arith.constant 0 : i32
    return %c0_i32, %c0_i32_0 : i32, i32
  }
  func.func @transform_3(%arg0: i32) -> (i32, i32) {
    %c0_i32 = arith.constant 0 : i32
    %c0_i32_0 = arith.constant 0 : i32
    return %arg0, %c0_i32 : i32, i32
  }
}

module attributes {stable_mosaic.version = 11 : i64} {
  func.func @_matmul_bias_2dir_kernel(%arg0: i32, %arg1: i32, %arg2: memref<72x24xbf16, #tpu.memory_space<vmem>>, %arg3: memref<24x512xbf16, #tpu.memory_space<vmem>>, %arg4: memref<1x1x512xf32, #tpu.memory_space<vmem>>, %arg5: memref<1x72x512xf32, #tpu.memory_space<vmem>>) attributes {dimension_semantics = [#tpu.dimension_semantics<parallel>, #tpu.dimension_semantics<parallel>], iteration_bounds = array<i64: 2, 1>, scalar_prefetch = 0 : i64, scratch_operands = 0 : i64, tpu.core_type = #tpu.core_type<tc>, window_params = [{transform_indices = @transform_0, window_bounds = array<i64: 72, 24>}, {transform_indices = @transform_1, window_bounds = array<i64: 24, 512>}, {transform_indices = @transform_2, window_bounds = array<i64: 1, 1, 512>}, {transform_indices = @transform_3, window_bounds = array<i64: 1, 72, 512>}]} {
    %c0 = arith.constant 0 : index
    %c0_0 = arith.constant 0 : index
    %0 = vector.load %arg2[%c0, %c0_0] : memref<72x24xbf16, #tpu.memory_space<vmem>>, vector<72x24xbf16>
    %c0_1 = arith.constant 0 : index
    %c0_2 = arith.constant 0 : index
    %1 = vector.load %arg3[%c0_1, %c0_2] : memref<24x512xbf16, #tpu.memory_space<vmem>>, vector<24x512xbf16>
    %cst = arith.constant dense<0.000000e+00> : vector<72x512xf32>
    %2 = tpu.matmul %0, %1, %cst {dimension_numbers = #tpu.dot_dimension_numbers<[1], [0], [0], [1], [0, 0, 1, 1], [], []>} : vector<72x24xbf16>, vector<24x512xbf16>, vector<72x512xf32> -> vector<72x512xf32>
    %c0_3 = arith.constant 0 : index
    %c0_4 = arith.constant 0 : index
    %c0_5 = arith.constant 0 : index
    %3 = vector.load %arg4[%c0_3, %c0_4, %c0_5] : memref<1x1x512xf32, #tpu.memory_space<vmem>>, vector<1x1x512xf32>
    %4 = vector.shape_cast %3 : vector<1x1x512xf32> to vector<1x512xf32>
    %5 = vector.broadcast %4 : vector<1x512xf32> to vector<72x512xf32>
    %6 = arith.addf %2, %5 : vector<72x512xf32>
    %c0_6 = arith.constant 0 : index
    %c0_7 = arith.constant 0 : index
    %c0_8 = arith.constant 0 : index
    %7 = vector.load %arg5[%c0_6, %c0_7, %c0_8] : memref<1x72x512xf32, #tpu.memory_space<vmem>>, vector<1x72x512xf32>
    %8 = vector.shape_cast %7 : vector<1x72x512xf32> to vector<72x512xf32>
    %9 = vector.shape_cast %6 : vector<72x512xf32> to vector<1x72x512xf32>
    tpu.vector_store %arg5[%c0_6, %c0_7, %c0_8], %9 {strides = array<i32>} : memref<1x72x512xf32, #tpu.memory_space<vmem>>, vector<1x72x512xf32>,
    return
  }
  func.func @transform_0(%arg0: i32, %arg1: i32) -> (i32, i32) {
    %c0_i32 = arith.constant 0 : i32
    %c0_i32_0 = arith.constant 0 : i32
    return %arg1, %c0_i32 : i32, i32
  }
  func.func @transform_1(%arg0: i32, %arg1: i32) -> (i32, i32) {
    %c0_i32 = arith.constant 0 : i32
    %c0_i32_0 = arith.constant 0 : i32
    return %c0_i32, %arg0 : i32, i32
  }
  func.func @transform_2(%arg0: i32, %arg1: i32) -> (i32, i32, i32) {
    %c0_i32 = arith.constant 0 : i32
    %c0_i32_0 = arith.constant 0 : i32
    %c0_i32_1 = arith.constant 0 : i32
    return %arg0, %c0_i32, %c0_i32_0 : i32, i32, i32
  }
  func.func @transform_3(%arg0: i32, %arg1: i32) -> (i32, i32, i32) {
    %c0_i32 = arith.constant 0 : i32
    %c0_i32_0 = arith.constant 0 : i32
    return %arg0, %arg1, %c0_i32 : i32, i32, i32
  }
}

module attributes {stable_mosaic.version = 11 : i64} {
  func.func @_bilstm_rec_kernel(%arg0: i32, %arg1: memref<1x4x18x512xf32, #tpu.memory_space<vmem>>, %arg2: memref<1x128x512xbf16, #tpu.memory_space<vmem>>, %arg3: memref<1x4x18x128xf32, #tpu.memory_space<vmem>>, %arg4: memref<18x128xf32, #tpu.memory_space<vmem>>, %arg5: memref<18x128xf32, #tpu.memory_space<vmem>>) attributes {dimension_semantics = [#tpu.dimension_semantics<parallel>], iteration_bounds = array<i64: 2>, scalar_prefetch = 0 : i64, scratch_operands = 2 : i64, tpu.core_type = #tpu.core_type<tc>, window_params = [{transform_indices = @transform_0, window_bounds = array<i64: 1, 4, 18, 512>}, {transform_indices = @transform_1, window_bounds = array<i64: 1, 128, 512>}, {transform_indices = @transform_2, window_bounds = array<i64: 1, 4, 18, 128>}]} {
    %cst = arith.constant 0.000000e+00 : f32
    %0 = vector.broadcast %cst : f32 to vector<18x128xf32>
    %c0 = arith.constant 0 : index
    %c0_0 = arith.constant 0 : index
    %1 = vector.load %arg4[%c0, %c0_0] : memref<18x128xf32, #tpu.memory_space<vmem>>, vector<18x128xf32>
    tpu.vector_store %arg4[%c0, %c0_0], %0 {strides = array<i32>} : memref<18x128xf32, #tpu.memory_space<vmem>>, vector<18x128xf32>,
    %cst_1 = arith.constant 0.000000e+00 : f32
    %2 = vector.broadcast %cst_1 : f32 to vector<18x128xf32>
    %c0_2 = arith.constant 0 : index
    %c0_3 = arith.constant 0 : index
    %3 = vector.load %arg5[%c0_2, %c0_3] : memref<18x128xf32, #tpu.memory_space<vmem>>, vector<18x128xf32>
    tpu.vector_store %arg5[%c0_2, %c0_3], %2 {strides = array<i32>} : memref<18x128xf32, #tpu.memory_space<vmem>>, vector<18x128xf32>,
    %c0_i32 = arith.constant 0 : i32
    %c4_i32 = arith.constant 4 : i32
    %4 = arith.addi %c0_i32, %c4_i32 : i32
    %c1_i32 = arith.constant 1 : i32
    scf.for %arg6 = %c0_i32 to %4 step %c1_i32  : i32 {
      %c0_i32_5 = arith.constant 0 : i32
      %5 = arith.cmpi eq, %arg0, %c0_i32_5 : i32
      %c3_i32 = arith.constant 3 : i32
      %6 = arith.subi %c3_i32, %arg6 : i32
      %7 = arith.select %5, %arg6, %6 : i32
      %c0_6 = arith.constant 0 : index
      %8 = arith.index_cast %7 : i32 to index
      %c0_7 = arith.constant 0 : index
      %c0_8 = arith.constant 0 : index
      %9 = vector.load %arg1[%c0_6, %8, %c0_7, %c0_8] : memref<1x4x18x512xf32, #tpu.memory_space<vmem>>, vector<1x1x18x512xf32>
      %10 = vector.shape_cast %9 : vector<1x1x18x512xf32> to vector<18x512xf32>
      %c0_9 = arith.constant 0 : index
      %c0_10 = arith.constant 0 : index
      %11 = vector.load %arg4[%c0_9, %c0_10] : memref<18x128xf32, #tpu.memory_space<vmem>>, vector<18x128xf32>
      %12 = arith.truncf %11 : vector<18x128xf32> to vector<18x128xbf16>
      %c0_11 = arith.constant 0 : index
      %c0_12 = arith.constant 0 : index
      %c0_13 = arith.constant 0 : index
      %13 = vector.load %arg2[%c0_11, %c0_12, %c0_13] : memref<1x128x512xbf16, #tpu.memory_space<vmem>>, vector<1x128x512xbf16>
      %14 = vector.shape_cast %13 : vector<1x128x512xbf16> to vector<128x512xbf16>
      %cst_14 = arith.constant dense<0.000000e+00> : vector<18x512xf32>
      %15 = tpu.matmul %12, %14, %cst_14 {dimension_numbers = #tpu.dot_dimension_numbers<[1], [0], [0], [1], [0, 0, 1, 1], [], []>} : vector<18x128xbf16>, vector<128x512xbf16>, vector<18x512xf32> -> vector<18x512xf32>
      %16 = arith.addf %10, %15 : vector<18x512xf32>
      %17 = vector.extract_strided_slice %16 {offsets = [0, 0], sizes = [18, 128], strides = [1, 1]} : vector<18x512xf32> to vector<18x128xf32>
      %18 = arith.negf %17 : vector<18x128xf32>
      %19 = math.exp %18 : vector<18x128xf32>
      %cst_15 = arith.constant 1.000000e+00 : f32
      %20 = vector.broadcast %cst_15 : f32 to vector<18x128xf32>
      %21 = arith.addf %20, %19 : vector<18x128xf32>
      %22 = arith.divf %20, %21 : vector<18x128xf32>
      %23 = vector.extract_strided_slice %16 {offsets = [0, 128], sizes = [18, 128], strides = [1, 1]} : vector<18x512xf32> to vector<18x128xf32>
      %24 = arith.negf %23 : vector<18x128xf32>
      %25 = math.exp %24 : vector<18x128xf32>
      %cst_16 = arith.constant 1.000000e+00 : f32
      %26 = vector.broadcast %cst_16 : f32 to vector<18x128xf32>
      %27 = arith.addf %26, %25 : vector<18x128xf32>
      %28 = arith.divf %26, %27 : vector<18x128xf32>
      %29 = vector.extract_strided_slice %16 {offsets = [0, 256], sizes = [18, 128], strides = [1, 1]} : vector<18x512xf32> to vector<18x128xf32>
      %30 = math.tanh %29 : vector<18x128xf32>
      %31 = vector.extract_strided_slice %16 {offsets = [0, 384], sizes = [18, 128], strides = [1, 1]} : vector<18x512xf32> to vector<18x128xf32>
      %32 = arith.negf %31 : vector<18x128xf32>
      %33 = math.exp %32 : vector<18x128xf32>
      %cst_17 = arith.constant 1.000000e+00 : f32
      %34 = vector.broadcast %cst_17 : f32 to vector<18x128xf32>
      %35 = arith.addf %34, %33 : vector<18x128xf32>
      %36 = arith.divf %34, %35 : vector<18x128xf32>
      %c0_18 = arith.constant 0 : index
      %c0_19 = arith.constant 0 : index
      %37 = vector.load %arg5[%c0_18, %c0_19] : memref<18x128xf32, #tpu.memory_space<vmem>>, vector<18x128xf32>
      %38 = arith.mulf %28, %37 : vector<18x128xf32>
      %39 = arith.mulf %22, %30 : vector<18x128xf32>
      %40 = arith.addf %38, %39 : vector<18x128xf32>
      %41 = math.tanh %40 : vector<18x128xf32>
      %42 = arith.mulf %36, %41 : vector<18x128xf32>
      %c0_20 = arith.constant 0 : index
      %c0_21 = arith.constant 0 : index
      %43 = vector.load %arg5[%c0_20, %c0_21] : memref<18x128xf32, #tpu.memory_space<vmem>>, vector<18x128xf32>
      tpu.vector_store %arg5[%c0_20, %c0_21], %40 {strides = array<i32>} : memref<18x128xf32, #tpu.memory_space<vmem>>, vector<18x128xf32>,
      %c0_22 = arith.constant 0 : index
      %c0_23 = arith.constant 0 : index
      %44 = vector.load %arg4[%c0_22, %c0_23] : memref<18x128xf32, #tpu.memory_space<vmem>>, vector<18x128xf32>
      tpu.vector_store %arg4[%c0_22, %c0_23], %42 {strides = array<i32>} : memref<18x128xf32, #tpu.memory_space<vmem>>, vector<18x128xf32>,
      %c0_24 = arith.constant 0 : index
      %45 = arith.index_cast %7 : i32 to index
      %c0_25 = arith.constant 0 : index
      %c0_26 = arith.constant 0 : index
      %46 = vector.load %arg3[%c0_24, %45, %c0_25, %c0_26] : memref<1x4x18x128xf32, #tpu.memory_space<vmem>>, vector<1x1x18x128xf32>
      %47 = vector.shape_cast %46 : vector<1x1x18x128xf32> to vector<18x128xf32>
      %48 = vector.shape_cast %42 : vector<18x128xf32> to vector<1x1x18x128xf32>
      tpu.vector_store %arg3[%c0_24, %45, %c0_25, %c0_26], %48 {strides = array<i32>} : memref<1x4x18x128xf32, #tpu.memory_space<vmem>>, vector<1x1x18x128xf32>,
    }
    %c4_i32_4 = arith.constant 4 : i32
    return
  }
  func.func @transform_0(%arg0: i32) -> (i32, i32, i32, i32) {
    %c0_i32 = arith.constant 0 : i32
    %c0_i32_0 = arith.constant 0 : i32
    %c0_i32_1 = arith.constant 0 : i32
    %c0_i32_2 = arith.constant 0 : i32
    return %arg0, %c0_i32, %c0_i32_0, %c0_i32_1 : i32, i32, i32, i32
  }
  func.func @transform_1(%arg0: i32) -> (i32, i32, i32) {
    %c0_i32 = arith.constant 0 : i32
    %c0_i32_0 = arith.constant 0 : i32
    %c0_i32_1 = arith.constant 0 : i32
    return %arg0, %c0_i32, %c0_i32_0 : i32, i32, i32
  }
  func.func @transform_2(%arg0: i32) -> (i32, i32, i32, i32) {
    %c0_i32 = arith.constant 0 : i32
    %c0_i32_0 = arith.constant 0 : i32
    %c0_i32_1 = arith.constant 0 : i32
    %c0_i32_2 = arith.constant 0 : i32
    return %arg0, %c0_i32, %c0_i32_0, %c0_i32_1 : i32, i32, i32, i32
  }
}

module attributes {stable_mosaic.version = 11 : i64} {
  func.func @_matmul_kernel(%arg0: i32, %arg1: memref<72x256xbf16, #tpu.memory_space<vmem>>, %arg2: memref<256x24xbf16, #tpu.memory_space<vmem>>, %arg3: memref<72x24xf32, #tpu.memory_space<vmem>>) attributes {dimension_semantics = [#tpu.dimension_semantics<parallel>], iteration_bounds = array<i64: 1>, scalar_prefetch = 0 : i64, scratch_operands = 0 : i64, tpu.core_type = #tpu.core_type<tc>, window_params = [{transform_indices = @transform_0, window_bounds = array<i64: 72, 256>}, {pipeline_mode = #tpu.pipeline_mode<synchronous>, transform_indices = @transform_1, window_bounds = array<i64: 256, 24>}, {transform_indices = @transform_2, window_bounds = array<i64: 72, 24>}]} {
    %c0 = arith.constant 0 : index
    %c0_0 = arith.constant 0 : index
    %0 = vector.load %arg1[%c0, %c0_0] : memref<72x256xbf16, #tpu.memory_space<vmem>>, vector<72x256xbf16>
    %c0_1 = arith.constant 0 : index
    %c0_2 = arith.constant 0 : index
    %1 = vector.load %arg2[%c0_1, %c0_2] : memref<256x24xbf16, #tpu.memory_space<vmem>>, vector<256x24xbf16>
    %cst = arith.constant dense<0.000000e+00> : vector<72x24xf32>
    %2 = tpu.matmul %0, %1, %cst {dimension_numbers = #tpu.dot_dimension_numbers<[1], [0], [0], [1], [0, 0, 1, 1], [], []>} : vector<72x256xbf16>, vector<256x24xbf16>, vector<72x24xf32> -> vector<72x24xf32>
    %c0_3 = arith.constant 0 : index
    %c0_4 = arith.constant 0 : index
    %3 = vector.load %arg3[%c0_3, %c0_4] : memref<72x24xf32, #tpu.memory_space<vmem>>, vector<72x24xf32>
    tpu.vector_store %arg3[%c0_3, %c0_4], %2 {strides = array<i32>} : memref<72x24xf32, #tpu.memory_space<vmem>>, vector<72x24xf32>,
    return
  }
  func.func @transform_0(%arg0: i32) -> (i32, i32) {
    %c0_i32 = arith.constant 0 : i32
    %c0_i32_0 = arith.constant 0 : i32
    return %arg0, %c0_i32 : i32, i32
  }
  func.func @transform_1(%arg0: i32) -> (i32, i32) {
    %c0_i32 = arith.constant 0 : i32
    %c0_i32_0 = arith.constant 0 : i32
    %c0_i32_1 = arith.constant 0 : i32
    return %c0_i32, %c0_i32_0 : i32, i32
  }
  func.func @transform_2(%arg0: i32) -> (i32, i32) {
    %c0_i32 = arith.constant 0 : i32
    %c0_i32_0 = arith.constant 0 : i32
    return %arg0, %c0_i32 : i32, i32
  }
}

module attributes {stable_mosaic.version = 11 : i64} {
  func.func @_matmul_bias_kernel(%arg0: i32, %arg1: memref<144x8xbf16, #tpu.memory_space<vmem>>, %arg2: memref<8x72xbf16, #tpu.memory_space<vmem>>, %arg3: memref<1x72xf32, #tpu.memory_space<vmem>>, %arg4: memref<144x72xbf16, #tpu.memory_space<vmem>>) attributes {dimension_semantics = [#tpu.dimension_semantics<parallel>], iteration_bounds = array<i64: 1>, scalar_prefetch = 0 : i64, scratch_operands = 0 : i64, tpu.core_type = #tpu.core_type<tc>, window_params = [{transform_indices = @transform_0, window_bounds = array<i64: 144, 8>}, {pipeline_mode = #tpu.pipeline_mode<synchronous>, transform_indices = @transform_1, window_bounds = array<i64: 8, 72>}, {pipeline_mode = #tpu.pipeline_mode<synchronous>, transform_indices = @transform_2, window_bounds = array<i64: 1, 72>}, {transform_indices = @transform_3, window_bounds = array<i64: 144, 72>}]} {
    %c0 = arith.constant 0 : index
    %c0_0 = arith.constant 0 : index
    %0 = vector.load %arg1[%c0, %c0_0] : memref<144x8xbf16, #tpu.memory_space<vmem>>, vector<144x8xbf16>
    %c0_1 = arith.constant 0 : index
    %c0_2 = arith.constant 0 : index
    %1 = vector.load %arg2[%c0_1, %c0_2] : memref<8x72xbf16, #tpu.memory_space<vmem>>, vector<8x72xbf16>
    %cst = arith.constant dense<0.000000e+00> : vector<144x72xf32>
    %2 = tpu.matmul %0, %1, %cst {dimension_numbers = #tpu.dot_dimension_numbers<[1], [0], [0], [1], [0, 0, 1, 1], [], []>} : vector<144x8xbf16>, vector<8x72xbf16>, vector<144x72xf32> -> vector<144x72xf32>
    %c0_3 = arith.constant 0 : index
    %c0_4 = arith.constant 0 : index
    %3 = vector.load %arg3[%c0_3, %c0_4] : memref<1x72xf32, #tpu.memory_space<vmem>>, vector<1x72xf32>
    %4 = vector.broadcast %3 : vector<1x72xf32> to vector<144x72xf32>
    %5 = arith.addf %2, %4 : vector<144x72xf32>
    %6 = arith.truncf %5 : vector<144x72xf32> to vector<144x72xbf16>
    %c0_5 = arith.constant 0 : index
    %c0_6 = arith.constant 0 : index
    %7 = vector.load %arg4[%c0_5, %c0_6] : memref<144x72xbf16, #tpu.memory_space<vmem>>, vector<144x72xbf16>
    tpu.vector_store %arg4[%c0_5, %c0_6], %6 {strides = array<i32>} : memref<144x72xbf16, #tpu.memory_space<vmem>>, vector<144x72xbf16>,
    return
  }
  func.func @transform_0(%arg0: i32) -> (i32, i32) {
    %c0_i32 = arith.constant 0 : i32
    %c0_i32_0 = arith.constant 0 : i32
    return %arg0, %c0_i32 : i32, i32
  }
  func.func @transform_1(%arg0: i32) -> (i32, i32) {
    %c0_i32 = arith.constant 0 : i32
    %c0_i32_0 = arith.constant 0 : i32
    %c0_i32_1 = arith.constant 0 : i32
    return %c0_i32, %c0_i32_0 : i32, i32
  }
  func.func @transform_2(%arg0: i32) -> (i32, i32) {
    %c0_i32 = arith.constant 0 : i32
    %c0_i32_0 = arith.constant 0 : i32
    %c0_i32_1 = arith.constant 0 : i32
    return %c0_i32, %c0_i32_0 : i32, i32
  }
  func.func @transform_3(%arg0: i32) -> (i32, i32) {
    %c0_i32 = arith.constant 0 : i32
    %c0_i32_0 = arith.constant 0 : i32
    return %arg0, %c0_i32 : i32, i32
  }
}

module attributes {stable_mosaic.version = 11 : i64} {
  func.func @_prelu_ln_group_kernel(%arg0: i32, %arg1: i32, %arg2: memref<4xf32, #tpu.memory_space<smem>>, %arg3: memref<1x18x64xbf16, #tpu.memory_space<vmem>>, %arg4: memref<1x1x64xf32, #tpu.memory_space<vmem>>, %arg5: memref<1x1x64xf32, #tpu.memory_space<vmem>>, %arg6: memref<1x18x64xbf16, #tpu.memory_space<vmem>>) attributes {dimension_semantics = [#tpu.dimension_semantics<parallel>, #tpu.dimension_semantics<parallel>], iteration_bounds = array<i64: 4, 1>, scalar_prefetch = 0 : i64, scratch_operands = 0 : i64, tpu.core_type = #tpu.core_type<tc>, window_params = [{transform_indices = @transform_0, window_bounds = array<i64: 4>}, {transform_indices = @transform_1, window_bounds = array<i64: 1, 18, 64>}, {transform_indices = @transform_2, window_bounds = array<i64: 1, 1, 64>}, {transform_indices = @transform_3, window_bounds = array<i64: 1, 1, 64>}, {transform_indices = @transform_4, window_bounds = array<i64: 1, 18, 64>}]} {
    %0 = arith.index_cast %arg0 : i32 to index
    %1 = memref.load %arg2[%0] : memref<4xf32, #tpu.memory_space<smem>>
    %c0 = arith.constant 0 : index
    %c0_0 = arith.constant 0 : index
    %c0_1 = arith.constant 0 : index
    %2 = vector.load %arg3[%c0, %c0_0, %c0_1] : memref<1x18x64xbf16, #tpu.memory_space<vmem>>, vector<1x18x64xbf16>
    %3 = vector.shape_cast %2 : vector<1x18x64xbf16> to vector<18x64xbf16>
    %4 = arith.extf %3 : vector<18x64xbf16> to vector<18x64xf32>
    %cst = arith.constant 0.000000e+00 : f32
    %5 = vector.broadcast %cst : f32 to vector<18x64xf32>
    %6 = arith.cmpf oge, %4, %5 : vector<18x64xf32>
    %7 = vector.broadcast %1 : f32 to vector<18x64xf32>
    %8 = arith.mulf %7, %4 : vector<18x64xf32>
    %9 = arith.select %6, %4, %8 : vector<18x64xi1>, vector<18x64xf32>
    %cst_2 = arith.constant dense<0.000000e+00> : vector<18xf32>
    %10 = vector.multi_reduction <add>, %9, %cst_2 [1] : vector<18x64xf32> to vector<18xf32>
    %11 = vector.shape_cast %10 : vector<18xf32> to vector<18x1xf32>
    %cst_3 = arith.constant 6.400000e+01 : f32
    %12 = vector.broadcast %cst_3 : f32 to vector<18x1xf32>
    %13 = arith.divf %11, %12 : vector<18x1xf32>
    %14 = vector.broadcast %13 : vector<18x1xf32> to vector<18x64xf32>
    %15 = arith.subf %9, %14 : vector<18x64xf32>
    %16 = arith.mulf %15, %15 : vector<18x64xf32>
    %cst_4 = arith.constant dense<0.000000e+00> : vector<18xf32>
    %17 = vector.multi_reduction <add>, %16, %cst_4 [1] : vector<18x64xf32> to vector<18xf32>
    %18 = vector.shape_cast %17 : vector<18xf32> to vector<18x1xf32>
    %cst_5 = arith.constant 6.400000e+01 : f32
    %19 = vector.broadcast %cst_5 : f32 to vector<18x1xf32>
    %20 = arith.divf %18, %19 : vector<18x1xf32>
    %21 = vector.broadcast %13 : vector<18x1xf32> to vector<18x64xf32>
    %22 = arith.subf %9, %21 : vector<18x64xf32>
    %cst_6 = arith.constant 9.99999974E-6 : f32
    %23 = vector.broadcast %cst_6 : f32 to vector<18x1xf32>
    %24 = arith.addf %20, %23 : vector<18x1xf32>
    %25 = math.rsqrt %24 : vector<18x1xf32>
    %26 = vector.broadcast %25 : vector<18x1xf32> to vector<18x64xf32>
    %27 = arith.mulf %22, %26 : vector<18x64xf32>
    %c0_7 = arith.constant 0 : index
    %c0_8 = arith.constant 0 : index
    %c0_9 = arith.constant 0 : index
    %28 = vector.load %arg4[%c0_7, %c0_8, %c0_9] : memref<1x1x64xf32, #tpu.memory_space<vmem>>, vector<1x1x64xf32>
    %29 = vector.shape_cast %28 : vector<1x1x64xf32> to vector<1x64xf32>
    %30 = vector.broadcast %29 : vector<1x64xf32> to vector<18x64xf32>
    %31 = arith.mulf %27, %30 : vector<18x64xf32>
    %c0_10 = arith.constant 0 : index
    %c0_11 = arith.constant 0 : index
    %c0_12 = arith.constant 0 : index
    %32 = vector.load %arg5[%c0_10, %c0_11, %c0_12] : memref<1x1x64xf32, #tpu.memory_space<vmem>>, vector<1x1x64xf32>
    %33 = vector.shape_cast %32 : vector<1x1x64xf32> to vector<1x64xf32>
    %34 = vector.broadcast %33 : vector<1x64xf32> to vector<18x64xf32>
    %35 = arith.addf %31, %34 : vector<18x64xf32>
    %cst_13 = arith.constant 1.250000e-01 : f32
    %36 = vector.broadcast %cst_13 : f32 to vector<18x64xf32>
    %37 = arith.mulf %35, %36 : vector<18x64xf32>
    %38 = arith.truncf %37 : vector<18x64xf32> to vector<18x64xbf16>
    %c0_14 = arith.constant 0 : index
    %c0_15 = arith.constant 0 : index
    %c0_16 = arith.constant 0 : index
    %39 = vector.load %arg6[%c0_14, %c0_15, %c0_16] : memref<1x18x64xbf16, #tpu.memory_space<vmem>>, vector<1x18x64xbf16>
    %40 = vector.shape_cast %39 : vector<1x18x64xbf16> to vector<18x64xbf16>
    %41 = vector.shape_cast %38 : vector<18x64xbf16> to vector<1x18x64xbf16>
    tpu.vector_store %arg6[%c0_14, %c0_15, %c0_16], %41 {strides = array<i32>} : memref<1x18x64xbf16, #tpu.memory_space<vmem>>, vector<1x18x64xbf16>,
    return
  }
  func.func @transform_0(%arg0: i32, %arg1: i32) -> i32 {
    %c0_i32 = arith.constant 0 : i32
    %c0_i32_0 = arith.constant 0 : i32
    return %c0_i32 : i32
  }
  func.func @transform_1(%arg0: i32, %arg1: i32) -> (i32, i32, i32) {
    %c0_i32 = arith.constant 0 : i32
    %c0_i32_0 = arith.constant 0 : i32
    return %arg0, %arg1, %c0_i32 : i32, i32, i32
  }
  func.func @transform_2(%arg0: i32, %arg1: i32) -> (i32, i32, i32) {
    %c0_i32 = arith.constant 0 : i32
    %c0_i32_0 = arith.constant 0 : i32
    %c0_i32_1 = arith.constant 0 : i32
    return %arg0, %c0_i32, %c0_i32_0 : i32, i32, i32
  }
  func.func @transform_3(%arg0: i32, %arg1: i32) -> (i32, i32, i32) {
    %c0_i32 = arith.constant 0 : i32
    %c0_i32_0 = arith.constant 0 : i32
    %c0_i32_1 = arith.constant 0 : i32
    return %arg0, %c0_i32, %c0_i32_0 : i32, i32, i32
  }
  func.func @transform_4(%arg0: i32, %arg1: i32) -> (i32, i32, i32) {
    %c0_i32 = arith.constant 0 : i32
    %c0_i32_0 = arith.constant 0 : i32
    return %arg0, %arg1, %c0_i32 : i32, i32, i32
  }
}

module attributes {stable_mosaic.version = 11 : i64} {
  func.func @_prelu_ln_group_kernel(%arg0: i32, %arg1: i32, %arg2: memref<4xf32, #tpu.memory_space<smem>>, %arg3: memref<1x18x64xbf16, #tpu.memory_space<vmem>>, %arg4: memref<1x1x64xf32, #tpu.memory_space<vmem>>, %arg5: memref<1x1x64xf32, #tpu.memory_space<vmem>>, %arg6: memref<1x18x64xbf16, #tpu.memory_space<vmem>>) attributes {dimension_semantics = [#tpu.dimension_semantics<parallel>, #tpu.dimension_semantics<parallel>], iteration_bounds = array<i64: 4, 1>, scalar_prefetch = 0 : i64, scratch_operands = 0 : i64, tpu.core_type = #tpu.core_type<tc>, window_params = [{transform_indices = @transform_0, window_bounds = array<i64: 4>}, {transform_indices = @transform_1, window_bounds = array<i64: 1, 18, 64>}, {transform_indices = @transform_2, window_bounds = array<i64: 1, 1, 64>}, {transform_indices = @transform_3, window_bounds = array<i64: 1, 1, 64>}, {transform_indices = @transform_4, window_bounds = array<i64: 1, 18, 64>}]} {
    %0 = arith.index_cast %arg0 : i32 to index
    %1 = memref.load %arg2[%0] : memref<4xf32, #tpu.memory_space<smem>>
    %c0 = arith.constant 0 : index
    %c0_0 = arith.constant 0 : index
    %c0_1 = arith.constant 0 : index
    %2 = vector.load %arg3[%c0, %c0_0, %c0_1] : memref<1x18x64xbf16, #tpu.memory_space<vmem>>, vector<1x18x64xbf16>
    %3 = vector.shape_cast %2 : vector<1x18x64xbf16> to vector<18x64xbf16>
    %4 = arith.extf %3 : vector<18x64xbf16> to vector<18x64xf32>
    %cst = arith.constant 0.000000e+00 : f32
    %5 = vector.broadcast %cst : f32 to vector<18x64xf32>
    %6 = arith.cmpf oge, %4, %5 : vector<18x64xf32>
    %7 = vector.broadcast %1 : f32 to vector<18x64xf32>
    %8 = arith.mulf %7, %4 : vector<18x64xf32>
    %9 = arith.select %6, %4, %8 : vector<18x64xi1>, vector<18x64xf32>
    %cst_2 = arith.constant dense<0.000000e+00> : vector<18xf32>
    %10 = vector.multi_reduction <add>, %9, %cst_2 [1] : vector<18x64xf32> to vector<18xf32>
    %11 = vector.shape_cast %10 : vector<18xf32> to vector<18x1xf32>
    %cst_3 = arith.constant 6.400000e+01 : f32
    %12 = vector.broadcast %cst_3 : f32 to vector<18x1xf32>
    %13 = arith.divf %11, %12 : vector<18x1xf32>
    %14 = vector.broadcast %13 : vector<18x1xf32> to vector<18x64xf32>
    %15 = arith.subf %9, %14 : vector<18x64xf32>
    %16 = arith.mulf %15, %15 : vector<18x64xf32>
    %cst_4 = arith.constant dense<0.000000e+00> : vector<18xf32>
    %17 = vector.multi_reduction <add>, %16, %cst_4 [1] : vector<18x64xf32> to vector<18xf32>
    %18 = vector.shape_cast %17 : vector<18xf32> to vector<18x1xf32>
    %cst_5 = arith.constant 6.400000e+01 : f32
    %19 = vector.broadcast %cst_5 : f32 to vector<18x1xf32>
    %20 = arith.divf %18, %19 : vector<18x1xf32>
    %21 = vector.broadcast %13 : vector<18x1xf32> to vector<18x64xf32>
    %22 = arith.subf %9, %21 : vector<18x64xf32>
    %cst_6 = arith.constant 9.99999974E-6 : f32
    %23 = vector.broadcast %cst_6 : f32 to vector<18x1xf32>
    %24 = arith.addf %20, %23 : vector<18x1xf32>
    %25 = math.rsqrt %24 : vector<18x1xf32>
    %26 = vector.broadcast %25 : vector<18x1xf32> to vector<18x64xf32>
    %27 = arith.mulf %22, %26 : vector<18x64xf32>
    %c0_7 = arith.constant 0 : index
    %c0_8 = arith.constant 0 : index
    %c0_9 = arith.constant 0 : index
    %28 = vector.load %arg4[%c0_7, %c0_8, %c0_9] : memref<1x1x64xf32, #tpu.memory_space<vmem>>, vector<1x1x64xf32>
    %29 = vector.shape_cast %28 : vector<1x1x64xf32> to vector<1x64xf32>
    %30 = vector.broadcast %29 : vector<1x64xf32> to vector<18x64xf32>
    %31 = arith.mulf %27, %30 : vector<18x64xf32>
    %c0_10 = arith.constant 0 : index
    %c0_11 = arith.constant 0 : index
    %c0_12 = arith.constant 0 : index
    %32 = vector.load %arg5[%c0_10, %c0_11, %c0_12] : memref<1x1x64xf32, #tpu.memory_space<vmem>>, vector<1x1x64xf32>
    %33 = vector.shape_cast %32 : vector<1x1x64xf32> to vector<1x64xf32>
    %34 = vector.broadcast %33 : vector<1x64xf32> to vector<18x64xf32>
    %35 = arith.addf %31, %34 : vector<18x64xf32>
    %36 = arith.truncf %35 : vector<18x64xf32> to vector<18x64xbf16>
    %c0_13 = arith.constant 0 : index
    %c0_14 = arith.constant 0 : index
    %c0_15 = arith.constant 0 : index
    %37 = vector.load %arg6[%c0_13, %c0_14, %c0_15] : memref<1x18x64xbf16, #tpu.memory_space<vmem>>, vector<1x18x64xbf16>
    %38 = vector.shape_cast %37 : vector<1x18x64xbf16> to vector<18x64xbf16>
    %39 = vector.shape_cast %36 : vector<18x64xbf16> to vector<1x18x64xbf16>
    tpu.vector_store %arg6[%c0_13, %c0_14, %c0_15], %39 {strides = array<i32>} : memref<1x18x64xbf16, #tpu.memory_space<vmem>>, vector<1x18x64xbf16>,
    return
  }
  func.func @transform_0(%arg0: i32, %arg1: i32) -> i32 {
    %c0_i32 = arith.constant 0 : i32
    %c0_i32_0 = arith.constant 0 : i32
    return %c0_i32 : i32
  }
  func.func @transform_1(%arg0: i32, %arg1: i32) -> (i32, i32, i32) {
    %c0_i32 = arith.constant 0 : i32
    %c0_i32_0 = arith.constant 0 : i32
    return %arg0, %arg1, %c0_i32 : i32, i32, i32
  }
  func.func @transform_2(%arg0: i32, %arg1: i32) -> (i32, i32, i32) {
    %c0_i32 = arith.constant 0 : i32
    %c0_i32_0 = arith.constant 0 : i32
    %c0_i32_1 = arith.constant 0 : i32
    return %arg0, %c0_i32, %c0_i32_0 : i32, i32, i32
  }
  func.func @transform_3(%arg0: i32, %arg1: i32) -> (i32, i32, i32) {
    %c0_i32 = arith.constant 0 : i32
    %c0_i32_0 = arith.constant 0 : i32
    %c0_i32_1 = arith.constant 0 : i32
    return %arg0, %c0_i32, %c0_i32_0 : i32, i32, i32
  }
  func.func @transform_4(%arg0: i32, %arg1: i32) -> (i32, i32, i32) {
    %c0_i32 = arith.constant 0 : i32
    %c0_i32_0 = arith.constant 0 : i32
    return %arg0, %arg1, %c0_i32 : i32, i32, i32
  }
}

module attributes {stable_mosaic.version = 11 : i64} {
  func.func @_prelu_ln_group_kernel(%arg0: i32, %arg1: i32, %arg2: memref<4xf32, #tpu.memory_space<smem>>, %arg3: memref<1x18x16xbf16, #tpu.memory_space<vmem>>, %arg4: memref<1x1x16xf32, #tpu.memory_space<vmem>>, %arg5: memref<1x1x16xf32, #tpu.memory_space<vmem>>, %arg6: memref<1x18x16xbf16, #tpu.memory_space<vmem>>) attributes {dimension_semantics = [#tpu.dimension_semantics<parallel>, #tpu.dimension_semantics<parallel>], iteration_bounds = array<i64: 4, 1>, scalar_prefetch = 0 : i64, scratch_operands = 0 : i64, tpu.core_type = #tpu.core_type<tc>, window_params = [{transform_indices = @transform_0, window_bounds = array<i64: 4>}, {transform_indices = @transform_1, window_bounds = array<i64: 1, 18, 16>}, {transform_indices = @transform_2, window_bounds = array<i64: 1, 1, 16>}, {transform_indices = @transform_3, window_bounds = array<i64: 1, 1, 16>}, {transform_indices = @transform_4, window_bounds = array<i64: 1, 18, 16>}]} {
    %0 = arith.index_cast %arg0 : i32 to index
    %1 = memref.load %arg2[%0] : memref<4xf32, #tpu.memory_space<smem>>
    %c0 = arith.constant 0 : index
    %c0_0 = arith.constant 0 : index
    %c0_1 = arith.constant 0 : index
    %2 = vector.load %arg3[%c0, %c0_0, %c0_1] : memref<1x18x16xbf16, #tpu.memory_space<vmem>>, vector<1x18x16xbf16>
    %3 = vector.shape_cast %2 : vector<1x18x16xbf16> to vector<18x16xbf16>
    %4 = arith.extf %3 : vector<18x16xbf16> to vector<18x16xf32>
    %cst = arith.constant 0.000000e+00 : f32
    %5 = vector.broadcast %cst : f32 to vector<18x16xf32>
    %6 = arith.cmpf oge, %4, %5 : vector<18x16xf32>
    %7 = vector.broadcast %1 : f32 to vector<18x16xf32>
    %8 = arith.mulf %7, %4 : vector<18x16xf32>
    %9 = arith.select %6, %4, %8 : vector<18x16xi1>, vector<18x16xf32>
    %cst_2 = arith.constant dense<0.000000e+00> : vector<18xf32>
    %10 = vector.multi_reduction <add>, %9, %cst_2 [1] : vector<18x16xf32> to vector<18xf32>
    %11 = vector.shape_cast %10 : vector<18xf32> to vector<18x1xf32>
    %cst_3 = arith.constant 1.600000e+01 : f32
    %12 = vector.broadcast %cst_3 : f32 to vector<18x1xf32>
    %13 = arith.divf %11, %12 : vector<18x1xf32>
    %14 = vector.broadcast %13 : vector<18x1xf32> to vector<18x16xf32>
    %15 = arith.subf %9, %14 : vector<18x16xf32>
    %16 = arith.mulf %15, %15 : vector<18x16xf32>
    %cst_4 = arith.constant dense<0.000000e+00> : vector<18xf32>
    %17 = vector.multi_reduction <add>, %16, %cst_4 [1] : vector<18x16xf32> to vector<18xf32>
    %18 = vector.shape_cast %17 : vector<18xf32> to vector<18x1xf32>
    %cst_5 = arith.constant 1.600000e+01 : f32
    %19 = vector.broadcast %cst_5 : f32 to vector<18x1xf32>
    %20 = arith.divf %18, %19 : vector<18x1xf32>
    %21 = vector.broadcast %13 : vector<18x1xf32> to vector<18x16xf32>
    %22 = arith.subf %9, %21 : vector<18x16xf32>
    %cst_6 = arith.constant 9.99999974E-6 : f32
    %23 = vector.broadcast %cst_6 : f32 to vector<18x1xf32>
    %24 = arith.addf %20, %23 : vector<18x1xf32>
    %25 = math.rsqrt %24 : vector<18x1xf32>
    %26 = vector.broadcast %25 : vector<18x1xf32> to vector<18x16xf32>
    %27 = arith.mulf %22, %26 : vector<18x16xf32>
    %c0_7 = arith.constant 0 : index
    %c0_8 = arith.constant 0 : index
    %c0_9 = arith.constant 0 : index
    %28 = vector.load %arg4[%c0_7, %c0_8, %c0_9] : memref<1x1x16xf32, #tpu.memory_space<vmem>>, vector<1x1x16xf32>
    %29 = vector.shape_cast %28 : vector<1x1x16xf32> to vector<1x16xf32>
    %30 = vector.broadcast %29 : vector<1x16xf32> to vector<18x16xf32>
    %31 = arith.mulf %27, %30 : vector<18x16xf32>
    %c0_10 = arith.constant 0 : index
    %c0_11 = arith.constant 0 : index
    %c0_12 = arith.constant 0 : index
    %32 = vector.load %arg5[%c0_10, %c0_11, %c0_12] : memref<1x1x16xf32, #tpu.memory_space<vmem>>, vector<1x1x16xf32>
    %33 = vector.shape_cast %32 : vector<1x1x16xf32> to vector<1x16xf32>
    %34 = vector.broadcast %33 : vector<1x16xf32> to vector<18x16xf32>
    %35 = arith.addf %31, %34 : vector<18x16xf32>
    %36 = arith.truncf %35 : vector<18x16xf32> to vector<18x16xbf16>
    %c0_13 = arith.constant 0 : index
    %c0_14 = arith.constant 0 : index
    %c0_15 = arith.constant 0 : index
    %37 = vector.load %arg6[%c0_13, %c0_14, %c0_15] : memref<1x18x16xbf16, #tpu.memory_space<vmem>>, vector<1x18x16xbf16>
    %38 = vector.shape_cast %37 : vector<1x18x16xbf16> to vector<18x16xbf16>
    %39 = vector.shape_cast %36 : vector<18x16xbf16> to vector<1x18x16xbf16>
    tpu.vector_store %arg6[%c0_13, %c0_14, %c0_15], %39 {strides = array<i32>} : memref<1x18x16xbf16, #tpu.memory_space<vmem>>, vector<1x18x16xbf16>,
    return
  }
  func.func @transform_0(%arg0: i32, %arg1: i32) -> i32 {
    %c0_i32 = arith.constant 0 : i32
    %c0_i32_0 = arith.constant 0 : i32
    return %c0_i32 : i32
  }
  func.func @transform_1(%arg0: i32, %arg1: i32) -> (i32, i32, i32) {
    %c0_i32 = arith.constant 0 : i32
    %c0_i32_0 = arith.constant 0 : i32
    return %arg0, %arg1, %c0_i32 : i32, i32, i32
  }
  func.func @transform_2(%arg0: i32, %arg1: i32) -> (i32, i32, i32) {
    %c0_i32 = arith.constant 0 : i32
    %c0_i32_0 = arith.constant 0 : i32
    %c0_i32_1 = arith.constant 0 : i32
    return %arg0, %c0_i32, %c0_i32_0 : i32, i32, i32
  }
  func.func @transform_3(%arg0: i32, %arg1: i32) -> (i32, i32, i32) {
    %c0_i32 = arith.constant 0 : i32
    %c0_i32_0 = arith.constant 0 : i32
    %c0_i32_1 = arith.constant 0 : i32
    return %arg0, %c0_i32, %c0_i32_0 : i32, i32, i32
  }
  func.func @transform_4(%arg0: i32, %arg1: i32) -> (i32, i32, i32) {
    %c0_i32 = arith.constant 0 : i32
    %c0_i32_0 = arith.constant 0 : i32
    return %arg0, %arg1, %c0_i32 : i32, i32, i32
  }
}

module attributes {stable_mosaic.version = 11 : i64} {
  func.func @_attn_kernel(%arg0: i32, %arg1: memref<8x9x64xbf16, #tpu.memory_space<vmem>>, %arg2: memref<8x9x64xbf16, #tpu.memory_space<vmem>>, %arg3: memref<8x9x16xbf16, #tpu.memory_space<vmem>>, %arg4: memref<8x9x16xbf16, #tpu.memory_space<vmem>>) attributes {dimension_semantics = [#tpu.dimension_semantics<parallel>], iteration_bounds = array<i64: 1>, scalar_prefetch = 0 : i64, scratch_operands = 0 : i64, tpu.core_type = #tpu.core_type<tc>, window_params = [{transform_indices = @transform_0, window_bounds = array<i64: 8, 9, 64>}, {transform_indices = @transform_1, window_bounds = array<i64: 8, 9, 64>}, {transform_indices = @transform_2, window_bounds = array<i64: 8, 9, 16>}, {transform_indices = @transform_3, window_bounds = array<i64: 8, 9, 16>}]} {
    %c0 = arith.constant 0 : index
    %c0_0 = arith.constant 0 : index
    %c0_1 = arith.constant 0 : index
    %0 = vector.load %arg1[%c0, %c0_0, %c0_1] : memref<8x9x64xbf16, #tpu.memory_space<vmem>>, vector<8x9x64xbf16>
    %c0_2 = arith.constant 0 : index
    %c0_3 = arith.constant 0 : index
    %c0_4 = arith.constant 0 : index
    %1 = vector.load %arg2[%c0_2, %c0_3, %c0_4] : memref<8x9x64xbf16, #tpu.memory_space<vmem>>, vector<8x9x64xbf16>
    "tpu.trace_start"() <{level = 10 : i32, message = "gqd,gkd->gqk"}> : () -> ()
    %cst = arith.constant dense<0.000000e+00> : vector<8x9x9xf32>
    %2 = tpu.matmul %0, %1, %cst {dimension_numbers = #tpu.dot_dimension_numbers<[2], [2], [1], [1], [0, 0, 0, 1, 1, 1], [0], [0]>} : vector<8x9x64xbf16>, vector<8x9x64xbf16>, vector<8x9x9xf32> -> vector<8x9x9xf32>
    "tpu.trace_stop"() : () -> ()
    %cst_5 = arith.constant dense<0xFF800000> : vector<8x9xf32>
    %3 = vector.multi_reduction <maximumf>, %2, %cst_5 [2] : vector<8x9x9xf32> to vector<8x9xf32>
    %4 = vector.shape_cast %3 : vector<8x9xf32> to vector<8x9x1xf32>
    %5 = vector.broadcast %4 : vector<8x9x1xf32> to vector<8x9x9xf32>
    %6 = arith.subf %2, %5 : vector<8x9x9xf32>
    %7 = math.exp %6 : vector<8x9x9xf32>
    %cst_6 = arith.constant dense<0.000000e+00> : vector<8x9xf32>
    %8 = vector.multi_reduction <add>, %7, %cst_6 [2] : vector<8x9x9xf32> to vector<8x9xf32>
    %9 = vector.shape_cast %8 : vector<8x9xf32> to vector<8x9x1xf32>
    %10 = arith.truncf %7 : vector<8x9x9xf32> to vector<8x9x9xbf16>
    %c0_7 = arith.constant 0 : index
    %c0_8 = arith.constant 0 : index
    %c0_9 = arith.constant 0 : index
    %11 = vector.load %arg3[%c0_7, %c0_8, %c0_9] : memref<8x9x16xbf16, #tpu.memory_space<vmem>>, vector<8x9x16xbf16>
    "tpu.trace_start"() <{level = 10 : i32, message = "gqk,gkd->gqd"}> : () -> ()
    %cst_10 = arith.constant dense<0.000000e+00> : vector<8x9x16xf32>
    %12 = tpu.matmul %10, %11, %cst_10 {dimension_numbers = #tpu.dot_dimension_numbers<[2], [1], [1], [2], [0, 0, 0, 1, 1, 2], [0], [0]>} : vector<8x9x9xbf16>, vector<8x9x16xbf16>, vector<8x9x16xf32> -> vector<8x9x16xf32>
    "tpu.trace_stop"() : () -> ()
    %13 = tpu.reciprocal %9 {approx = true} : vector<8x9x1xf32> -> vector<8x9x1xf32>
    %14 = vector.broadcast %13 : vector<8x9x1xf32> to vector<8x9x16xf32>
    %15 = arith.mulf %12, %14 : vector<8x9x16xf32>
    %16 = arith.truncf %15 : vector<8x9x16xf32> to vector<8x9x16xbf16>
    %c0_11 = arith.constant 0 : index
    %c0_12 = arith.constant 0 : index
    %c0_13 = arith.constant 0 : index
    %17 = vector.load %arg4[%c0_11, %c0_12, %c0_13] : memref<8x9x16xbf16, #tpu.memory_space<vmem>>, vector<8x9x16xbf16>
    tpu.vector_store %arg4[%c0_11, %c0_12, %c0_13], %16 {strides = array<i32>} : memref<8x9x16xbf16, #tpu.memory_space<vmem>>, vector<8x9x16xbf16>,
    return
  }
  func.func @transform_0(%arg0: i32) -> (i32, i32, i32) {
    %c0_i32 = arith.constant 0 : i32
    %c0_i32_0 = arith.constant 0 : i32
    %c0_i32_1 = arith.constant 0 : i32
    return %arg0, %c0_i32, %c0_i32_0 : i32, i32, i32
  }
  func.func @transform_1(%arg0: i32) -> (i32, i32, i32) {
    %c0_i32 = arith.constant 0 : i32
    %c0_i32_0 = arith.constant 0 : i32
    %c0_i32_1 = arith.constant 0 : i32
    return %arg0, %c0_i32, %c0_i32_0 : i32, i32, i32
  }
  func.func @transform_2(%arg0: i32) -> (i32, i32, i32) {
    %c0_i32 = arith.constant 0 : i32
    %c0_i32_0 = arith.constant 0 : i32
    %c0_i32_1 = arith.constant 0 : i32
    return %arg0, %c0_i32, %c0_i32_0 : i32, i32, i32
  }
  func.func @transform_3(%arg0: i32) -> (i32, i32, i32) {
    %c0_i32 = arith.constant 0 : i32
    %c0_i32_0 = arith.constant 0 : i32
    %c0_i32_1 = arith.constant 0 : i32
    return %arg0, %c0_i32, %c0_i32_0 : i32, i32, i32
  }
}

module attributes {stable_mosaic.version = 11 : i64} {
  func.func @_matmul_bias_kernel(%arg0: i32, %arg1: memref<144x8xbf16, #tpu.memory_space<vmem>>, %arg2: memref<8x8xbf16, #tpu.memory_space<vmem>>, %arg3: memref<1x8xf32, #tpu.memory_space<vmem>>, %arg4: memref<144x8xbf16, #tpu.memory_space<vmem>>) attributes {dimension_semantics = [#tpu.dimension_semantics<parallel>], iteration_bounds = array<i64: 1>, scalar_prefetch = 0 : i64, scratch_operands = 0 : i64, tpu.core_type = #tpu.core_type<tc>, window_params = [{transform_indices = @transform_0, window_bounds = array<i64: 144, 8>}, {pipeline_mode = #tpu.pipeline_mode<synchronous>, transform_indices = @transform_1, window_bounds = array<i64: 8, 8>}, {pipeline_mode = #tpu.pipeline_mode<synchronous>, transform_indices = @transform_2, window_bounds = array<i64: 1, 8>}, {transform_indices = @transform_3, window_bounds = array<i64: 144, 8>}]} {
    %c0 = arith.constant 0 : index
    %c0_0 = arith.constant 0 : index
    %0 = vector.load %arg1[%c0, %c0_0] : memref<144x8xbf16, #tpu.memory_space<vmem>>, vector<144x8xbf16>
    %c0_1 = arith.constant 0 : index
    %c0_2 = arith.constant 0 : index
    %1 = vector.load %arg2[%c0_1, %c0_2] : memref<8x8xbf16, #tpu.memory_space<vmem>>, vector<8x8xbf16>
    %cst = arith.constant dense<0.000000e+00> : vector<144x8xf32>
    %2 = tpu.matmul %0, %1, %cst {dimension_numbers = #tpu.dot_dimension_numbers<[1], [0], [0], [1], [0, 0, 1, 1], [], []>} : vector<144x8xbf16>, vector<8x8xbf16>, vector<144x8xf32> -> vector<144x8xf32>
    %c0_3 = arith.constant 0 : index
    %c0_4 = arith.constant 0 : index
    %3 = vector.load %arg3[%c0_3, %c0_4] : memref<1x8xf32, #tpu.memory_space<vmem>>, vector<1x8xf32>
    %4 = vector.broadcast %3 : vector<1x8xf32> to vector<144x8xf32>
    %5 = arith.addf %2, %4 : vector<144x8xf32>
    %6 = arith.truncf %5 : vector<144x8xf32> to vector<144x8xbf16>
    %c0_5 = arith.constant 0 : index
    %c0_6 = arith.constant 0 : index
    %7 = vector.load %arg4[%c0_5, %c0_6] : memref<144x8xbf16, #tpu.memory_space<vmem>>, vector<144x8xbf16>
    tpu.vector_store %arg4[%c0_5, %c0_6], %6 {strides = array<i32>} : memref<144x8xbf16, #tpu.memory_space<vmem>>, vector<144x8xbf16>,
    return
  }
  func.func @transform_0(%arg0: i32) -> (i32, i32) {
    %c0_i32 = arith.constant 0 : i32
    %c0_i32_0 = arith.constant 0 : i32
    return %arg0, %c0_i32 : i32, i32
  }
  func.func @transform_1(%arg0: i32) -> (i32, i32) {
    %c0_i32 = arith.constant 0 : i32
    %c0_i32_0 = arith.constant 0 : i32
    %c0_i32_1 = arith.constant 0 : i32
    return %c0_i32, %c0_i32_0 : i32, i32
  }
  func.func @transform_2(%arg0: i32) -> (i32, i32) {
    %c0_i32 = arith.constant 0 : i32
    %c0_i32_0 = arith.constant 0 : i32
    %c0_i32_1 = arith.constant 0 : i32
    return %c0_i32, %c0_i32_0 : i32, i32
  }
  func.func @transform_3(%arg0: i32) -> (i32, i32) {
    %c0_i32 = arith.constant 0 : i32
    %c0_i32_0 = arith.constant 0 : i32
    return %arg0, %c0_i32 : i32, i32
  }
}

module attributes {stable_mosaic.version = 11 : i64} {
  func.func @_prelu_ln_res_group_kernel(%arg0: i32, %arg1: i32, %arg2: memref<1xf32, #tpu.memory_space<smem>>, %arg3: memref<1x18x64xbf16, #tpu.memory_space<vmem>>, %arg4: memref<1x18x64xf32, #tpu.memory_space<vmem>>, %arg5: memref<1x1x64xf32, #tpu.memory_space<vmem>>, %arg6: memref<1x1x64xf32, #tpu.memory_space<vmem>>, %arg7: memref<1x18x64xf32, #tpu.memory_space<vmem>>) attributes {dimension_semantics = [#tpu.dimension_semantics<parallel>, #tpu.dimension_semantics<parallel>], iteration_bounds = array<i64: 1, 1>, scalar_prefetch = 0 : i64, scratch_operands = 0 : i64, tpu.core_type = #tpu.core_type<tc>, window_params = [{transform_indices = @transform_0, window_bounds = array<i64: 1>}, {transform_indices = @transform_1, window_bounds = array<i64: 1, 18, 64>}, {transform_indices = @transform_2, window_bounds = array<i64: 1, 18, 64>}, {transform_indices = @transform_3, window_bounds = array<i64: 1, 1, 64>}, {transform_indices = @transform_4, window_bounds = array<i64: 1, 1, 64>}, {transform_indices = @transform_5, window_bounds = array<i64: 1, 18, 64>}]} {
    %0 = arith.index_cast %arg0 : i32 to index
    %1 = memref.load %arg2[%0] : memref<1xf32, #tpu.memory_space<smem>>
    %c0 = arith.constant 0 : index
    %c0_0 = arith.constant 0 : index
    %c0_1 = arith.constant 0 : index
    %2 = vector.load %arg3[%c0, %c0_0, %c0_1] : memref<1x18x64xbf16, #tpu.memory_space<vmem>>, vector<1x18x64xbf16>
    %3 = vector.shape_cast %2 : vector<1x18x64xbf16> to vector<18x64xbf16>
    %4 = arith.extf %3 : vector<18x64xbf16> to vector<18x64xf32>
    %cst = arith.constant 0.000000e+00 : f32
    %5 = vector.broadcast %cst : f32 to vector<18x64xf32>
    %6 = arith.cmpf oge, %4, %5 : vector<18x64xf32>
    %7 = vector.broadcast %1 : f32 to vector<18x64xf32>
    %8 = arith.mulf %7, %4 : vector<18x64xf32>
    %9 = arith.select %6, %4, %8 : vector<18x64xi1>, vector<18x64xf32>
    %cst_2 = arith.constant dense<0.000000e+00> : vector<18xf32>
    %10 = vector.multi_reduction <add>, %9, %cst_2 [1] : vector<18x64xf32> to vector<18xf32>
    %11 = vector.shape_cast %10 : vector<18xf32> to vector<18x1xf32>
    %cst_3 = arith.constant 6.400000e+01 : f32
    %12 = vector.broadcast %cst_3 : f32 to vector<18x1xf32>
    %13 = arith.divf %11, %12 : vector<18x1xf32>
    %14 = vector.broadcast %13 : vector<18x1xf32> to vector<18x64xf32>
    %15 = arith.subf %9, %14 : vector<18x64xf32>
    %16 = arith.mulf %15, %15 : vector<18x64xf32>
    %cst_4 = arith.constant dense<0.000000e+00> : vector<18xf32>
    %17 = vector.multi_reduction <add>, %16, %cst_4 [1] : vector<18x64xf32> to vector<18xf32>
    %18 = vector.shape_cast %17 : vector<18xf32> to vector<18x1xf32>
    %cst_5 = arith.constant 6.400000e+01 : f32
    %19 = vector.broadcast %cst_5 : f32 to vector<18x1xf32>
    %20 = arith.divf %18, %19 : vector<18x1xf32>
    %21 = vector.broadcast %13 : vector<18x1xf32> to vector<18x64xf32>
    %22 = arith.subf %9, %21 : vector<18x64xf32>
    %cst_6 = arith.constant 9.99999974E-6 : f32
    %23 = vector.broadcast %cst_6 : f32 to vector<18x1xf32>
    %24 = arith.addf %20, %23 : vector<18x1xf32>
    %25 = math.rsqrt %24 : vector<18x1xf32>
    %26 = vector.broadcast %25 : vector<18x1xf32> to vector<18x64xf32>
    %27 = arith.mulf %22, %26 : vector<18x64xf32>
    %c0_7 = arith.constant 0 : index
    %c0_8 = arith.constant 0 : index
    %c0_9 = arith.constant 0 : index
    %28 = vector.load %arg5[%c0_7, %c0_8, %c0_9] : memref<1x1x64xf32, #tpu.memory_space<vmem>>, vector<1x1x64xf32>
    %29 = vector.shape_cast %28 : vector<1x1x64xf32> to vector<1x64xf32>
    %30 = vector.broadcast %29 : vector<1x64xf32> to vector<18x64xf32>
    %31 = arith.mulf %27, %30 : vector<18x64xf32>
    %c0_10 = arith.constant 0 : index
    %c0_11 = arith.constant 0 : index
    %c0_12 = arith.constant 0 : index
    %32 = vector.load %arg6[%c0_10, %c0_11, %c0_12] : memref<1x1x64xf32, #tpu.memory_space<vmem>>, vector<1x1x64xf32>
    %33 = vector.shape_cast %32 : vector<1x1x64xf32> to vector<1x64xf32>
    %34 = vector.broadcast %33 : vector<1x64xf32> to vector<18x64xf32>
    %35 = arith.addf %31, %34 : vector<18x64xf32>
    %c0_13 = arith.constant 0 : index
    %c0_14 = arith.constant 0 : index
    %c0_15 = arith.constant 0 : index
    %36 = vector.load %arg4[%c0_13, %c0_14, %c0_15] : memref<1x18x64xf32, #tpu.memory_space<vmem>>, vector<1x18x64xf32>
    %37 = vector.shape_cast %36 : vector<1x18x64xf32> to vector<18x64xf32>
    %38 = arith.addf %35, %37 : vector<18x64xf32>
    %c0_16 = arith.constant 0 : index
    %c0_17 = arith.constant 0 : index
    %c0_18 = arith.constant 0 : index
    %39 = vector.load %arg7[%c0_16, %c0_17, %c0_18] : memref<1x18x64xf32, #tpu.memory_space<vmem>>, vector<1x18x64xf32>
    %40 = vector.shape_cast %39 : vector<1x18x64xf32> to vector<18x64xf32>
    %41 = vector.shape_cast %38 : vector<18x64xf32> to vector<1x18x64xf32>
    tpu.vector_store %arg7[%c0_16, %c0_17, %c0_18], %41 {strides = array<i32>} : memref<1x18x64xf32, #tpu.memory_space<vmem>>, vector<1x18x64xf32>,
    return
  }
  func.func @transform_0(%arg0: i32, %arg1: i32) -> i32 {
    %c0_i32 = arith.constant 0 : i32
    %c0_i32_0 = arith.constant 0 : i32
    return %c0_i32 : i32
  }
  func.func @transform_1(%arg0: i32, %arg1: i32) -> (i32, i32, i32) {
    %c0_i32 = arith.constant 0 : i32
    %c0_i32_0 = arith.constant 0 : i32
    return %arg0, %arg1, %c0_i32 : i32, i32, i32
  }
  func.func @transform_2(%arg0: i32, %arg1: i32) -> (i32, i32, i32) {
    %c0_i32 = arith.constant 0 : i32
    %c0_i32_0 = arith.constant 0 : i32
    return %arg0, %arg1, %c0_i32 : i32, i32, i32
  }
  func.func @transform_3(%arg0: i32, %arg1: i32) -> (i32, i32, i32) {
    %c0_i32 = arith.constant 0 : i32
    %c0_i32_0 = arith.constant 0 : i32
    %c0_i32_1 = arith.constant 0 : i32
    return %arg0, %c0_i32, %c0_i32_0 : i32, i32, i32
  }
  func.func @transform_4(%arg0: i32, %arg1: i32) -> (i32, i32, i32) {
    %c0_i32 = arith.constant 0 : i32
    %c0_i32_0 = arith.constant 0 : i32
    %c0_i32_1 = arith.constant 0 : i32
    return %arg0, %c0_i32, %c0_i32_0 : i32, i32, i32
  }
  func.func @transform_5(%arg0: i32, %arg1: i32) -> (i32, i32, i32) {
    %c0_i32 = arith.constant 0 : i32
    %c0_i32_0 = arith.constant 0 : i32
    return %arg0, %arg1, %c0_i32 : i32, i32, i32
  }
}

</mosaic_0001>

<bundles_post_ra>
// kernel: gridnet_block_forward.15
= control target key start
LH: loop header
LB: loop body
LE: loop exit
PB: predicated region body
PF: predicated region fallthrough
CT: control target
= control target key end

     0   :  { %vm35_vm0 = vcmask 64512   ;;  %vm96_vm1 = vcmask 58368   ;;  %vm452_vm2 = vcmask 60416   ;;  %vm473_vm3 = vcmask 57344   ;;  %s1014_s0 = inlined_call_operand.vmem [shape: f32[162,8], index: 0, kind: input, shape index: {}]   ;;  %s1015_s1 = inlined_call_operand.vmem [shape: f32[1,8], index: 1, kind: input, shape index: {}]   ;;  %s1016_s2 = inlined_call_operand.vmem [shape: f32[1,8], index: 2, kind: input, shape index: {}]   ;;  %s1017_s3 = inlined_call_operand.vmem [shape: bf16[162,8], index: 3, kind: output, shape index: {}]  }
   0x1   :  { %v588_v0 = vld [vmem:[%s1014_s0] sm:$0xff]  ;;  %v593_v1 = vld [vmem:[%s1014_s0 + $0x10] sm:$0xff]  ;;  %v598_v2 = vld [vmem:[%s1014_s0 + $0x8] sm:$0xff] }
   0x2   :  { %v36_v3 = vsel %vm35_vm0, %v588_v0, 0.0  ;;  %v42_v4 = vsel %vm35_vm0, %v593_v1, 0.0  ;;  %v607_v5 = vld [vmem:[%s1014_s0 + $0x18] sm:$0xff]  ;;  %v39_v6 = vsel %vm35_vm0, %v598_v2, 0.0  ;;  %v616_v8 = vld [vmem:[%s1014_s0 + $0x20] sm:$0xff]  ;;  %v621_v9 = vld [vmem:[%s1014_s0 + $0x28] sm:$0xff] }
   0x3   :  { %37 = vadd.xlane.f32.xlu0 %v36_v3  ;;  %43 = vadd.xlane.f32.xlu1 %v42_v4  ;;  %v45_v7 = vsel %vm35_vm0, %v607_v5, 0.0  ;;  %v48_v10 = vsel %vm35_vm0, %v616_v8, 0.0  ;;  %v51_v11 = vsel %vm35_vm0, %v621_v9, 0.0  ;;  %v630_v12 = vld [vmem:[%s1014_s0 + $0x30] sm:$0xff]  ;;  %v635_v13 = vld [vmem:[%s1014_s0 + $0x38] sm:$0xff]  ;;  %v644_v16 = vld [vmem:[%s1014_s0 + $0x40] sm:$0xff] }
   0x4   :  { %v54_v14 = vsel %vm35_vm0, %v630_v12, 0.0  ;;  %v57_v15 = vsel %vm35_vm0, %v635_v13, 0.0  ;;  %v649_v17 = vld [vmem:[%s1014_s0 + $0x48] sm:$0xff]  ;;  %v60_v18 = vsel %vm35_vm0, %v644_v16, 0.0  ;;  %v658_v20 = vld [vmem:[%s1014_s0 + $0x50] sm:$0xff]  ;;  %v663_v21 = vld [vmem:[%s1014_s0 + $0x58] sm:$0xff] }
   0x5   :  { %v63_v19 = vsel %vm35_vm0, %v649_v17, 0.0  ;;  %v66_v22 = vsel %vm35_vm0, %v658_v20, 0.0  ;;  %v69_v23 = vsel %vm35_vm0, %v663_v21, 0.0  ;;  %v672_v24 = vld [vmem:[%s1014_s0 + $0x60] sm:$0xff]  ;;  %v677_v25 = vld [vmem:[%s1014_s0 + $0x68] sm:$0xff]  ;;  %v686_v28 = vld [vmem:[%s1014_s0 + $0x70] sm:$0xff] }
   0x6   :  { %v72_v26 = vsel %vm35_vm0, %v672_v24, 0.0  ;;  %v75_v27 = vsel %vm35_vm0, %v677_v25, 0.0  ;;  %v691_v29 = vld [vmem:[%s1014_s0 + $0x78] sm:$0xff]  ;;  %v78_v30 = vsel %vm35_vm0, %v686_v28, 0.0  ;;  %v700_v32 = vld [vmem:[%s1014_s0 + $0x80] sm:$0xff]  ;;  %v705_v33 = vld [vmem:[%s1014_s0 + $0x88] sm:$0xff] }
   0x7   :  { %40 = vadd.xlane.f32.xlu0 %v39_v6  ;;  %46 = vadd.xlane.f32.xlu1 %v45_v7  ;;  %v81_v31 = vsel %vm35_vm0, %v691_v29, 0.0  ;;  %v84_v34 = vsel %vm35_vm0, %v700_v32, 0.0  ;;  %v87_v35 = vsel %vm35_vm0, %v705_v33, 0.0  ;;  %v714_v36 = vld [vmem:[%s1014_s0 + $0x90] sm:$0xff]  ;;  %v719_v37 = vld [vmem:[%s1014_s0 + $0x98] sm:$0xff] }
   0x8   :  { %v90_v38 = vsel %vm35_vm0, %v714_v36, 0.0  ;;  %v93_v39 = vsel %vm35_vm0, %v719_v37, 0.0  ;;  %v728_v40 = vld [vmem:[%s1014_s0 + $0xa0] sm:$0x3] }
   0x9   :  { %v97_v41 = vsel %vm96_vm1, %v728_v40, 0.0 }
   0xb   :  { %49 = vadd.xlane.f32.xlu0 %v48_v10  ;;  %52 = vadd.xlane.f32.xlu1 %v51_v11 }
   0xf   :  { %55 = vadd.xlane.f32.xlu0 %v54_v14  ;;  %58 = vadd.xlane.f32.xlu1 %v57_v15 }
  0x13   :  { %61 = vadd.xlane.f32.xlu0 %v60_v18  ;;  %64 = vadd.xlane.f32.xlu1 %v63_v19 }
  0x17   :  { %67 = vadd.xlane.f32.xlu0 %v66_v22  ;;  %70 = vadd.xlane.f32.xlu1 %v69_v23 }
  0x1b   :  { %73 = vadd.xlane.f32.xlu0 %v72_v26  ;;  %76 = vadd.xlane.f32.xlu1 %v75_v27 }
  0x1f   :  { %79 = vadd.xlane.f32.xlu0 %v78_v30  ;;  %82 = vadd.xlane.f32.xlu1 %v81_v31 }
  0x23   :  { %85 = vadd.xlane.f32.xlu0 %v84_v34  ;;  %88 = vadd.xlane.f32.xlu1 %v87_v35 }
  0x27   :  { %91 = vadd.xlane.f32.xlu0 %v90_v38  ;;  %94 = vadd.xlane.f32.xlu1 %v93_v39 }
  0x2b   :  { %98 = vadd.xlane.f32.xlu0 %v97_v41 }
  0x8c   :  { %v38_v42 = vpop.xlane.xlu0 %37  ;;  %v44_v43 = vpop.xlane.xlu1 %43 }
  0x8d   :  { %v101_v44 = vmul.f32 0.125, %v38_v42  ;;  %v103_v45 = vmul.f32 0.125, %v44_v43 }
  0x8f   :  { %v733_v46 = vsub.f32 %v588_v0, %v101_v44  ;;  %v736_v47 = vsub.f32 %v593_v1, %v103_v45 }
  0x90   :  { %v41_v48 = vpop.xlane.xlu0 %40  ;;  %v47_v49 = vpop.xlane.xlu1 %46 }
  0x91   :  { %v102_v50 = vmul.f32 0.125, %v41_v48  ;;  %v104_v51 = vmul.f32 0.125, %v47_v49  ;;  %v143_v52 = vmul.f32 %v733_v46, %v733_v46  ;;  %v145_v53 = vmul.f32 %v736_v47, %v736_v47 }
  0x93   :  { %v743_v54 = vsub.f32 %v598_v2, %v102_v50  ;;  %v746_v55 = vsub.f32 %v607_v5, %v104_v51  ;;  %v164_v56 = vsel %vm35_vm0, %v143_v52, 0.0  ;;  %v170_v59 = vsel %vm35_vm0, %v145_v53, 0.0 }
  0x94   :  { %165 = vadd.xlane.f32.xlu1 %v164_v56  ;;  %v50_v57 = vpop.xlane.xlu0 %49  ;;  %v53_v58 = vpop.xlane.xlu1 %52 }
  0x95   :  { %v105_v60 = vmul.f32 0.125, %v50_v57  ;;  %v106_v61 = vmul.f32 0.125, %v53_v58  ;;  %v144_v62 = vmul.f32 %v743_v54, %v743_v54  ;;  %v146_v63 = vmul.f32 %v746_v55, %v746_v55 }
  0x97   :  { %v755_v0 = vsub.f32 %v616_v8, %v105_v60  ;;  %v758_v1 = vsub.f32 %v621_v9, %v106_v61  ;;  %v167_v2 = vsel %vm35_vm0, %v144_v62, 0.0  ;;  %v173_v5 = vsel %vm35_vm0, %v146_v63, 0.0 }
  0x98   :  { %171 = vadd.xlane.f32.xlu1 %v170_v59  ;;  %168 = vadd.xlane.f32.xlu0 %v167_v2  ;;  %v56_v3 = vpop.xlane.xlu0 %55  ;;  %v59_v4 = vpop.xlane.xlu1 %58 }
  0x99   :  { %v107_v6 = vmul.f32 0.125, %v56_v3  ;;  %v108_v7 = vmul.f32 0.125, %v59_v4  ;;  %v147_v10 = vmul.f32 %v755_v0, %v755_v0  ;;  %v148_v8 = vmul.f32 %v758_v1, %v758_v1 }
  0x9b   :  { %v767_v11 = vsub.f32 %v630_v12, %v107_v6  ;;  %v770_v9 = vsub.f32 %v635_v13, %v108_v7  ;;  %v176_v14 = vsel %vm35_vm0, %v147_v10, 0.0  ;;  %v179_v19 = vsel %vm35_vm0, %v148_v8, 0.0 }
  0x9c   :  { %174 = vadd.xlane.f32.xlu0 %v173_v5  ;;  %177 = vadd.xlane.f32.xlu1 %v176_v14  ;;  %v62_v15 = vpop.xlane.xlu0 %61  ;;  %v65_v18 = vpop.xlane.xlu1 %64 }
  0x9d   :  { %v109_v22 = vmul.f32 0.125, %v62_v15  ;;  %v110_v23 = vmul.f32 0.125, %v65_v18  ;;  %v149_v26 = vmul.f32 %v767_v11, %v767_v11  ;;  %v150_v12 = vmul.f32 %v770_v9, %v770_v9 }
  0x9f   :  { %v779_v27 = vsub.f32 %v644_v16, %v109_v22  ;;  %v782_v13 = vsub.f32 %v649_v17, %v110_v23  ;;  %v182_v30 = vsel %vm35_vm0, %v149_v26, 0.0  ;;  %v185_v35 = vsel %vm35_vm0, %v150_v12, 0.0 }
  0xa0   :  { %180 = vadd.xlane.f32.xlu0 %v179_v19  ;;  %183 = vadd.xlane.f32.xlu1 %v182_v30  ;;  %v68_v31 = vpop.xlane.xlu0 %67  ;;  %v71_v34 = vpop.xlane.xlu1 %70 }
  0xa1   :  { %v111_v38 = vmul.f32 0.125, %v68_v31  ;;  %v112_v39 = vmul.f32 0.125, %v71_v34  ;;  %v151_v41 = vmul.f32 %v779_v27, %v779_v27  ;;  %v152_v16 = vmul.f32 %v782_v13, %v782_v13 }
  0xa3   :  { %v791_v42 = vsub.f32 %v658_v20, %v111_v38  ;;  %v794_v17 = vsub.f32 %v663_v21, %v112_v39  ;;  %v188_v43 = vsel %vm35_vm0, %v151_v41, 0.0  ;;  %v191_v48 = vsel %vm35_vm0, %v152_v16, 0.0 }
  0xa4   :  { %186 = vadd.xlane.f32.xlu0 %v185_v35  ;;  %189 = vadd.xlane.f32.xlu1 %v188_v43  ;;  %v74_v44 = vpop.xlane.xlu0 %73  ;;  %v77_v45 = vpop.xlane.xlu1 %76 }
  0xa5   :  { %v113_v49 = vmul.f32 0.125, %v74_v44  ;;  %v114_v50 = vmul.f32 0.125, %v77_v45  ;;  %v153_v51 = vmul.f32 %v791_v42, %v791_v42  ;;  %v154_v20 = vmul.f32 %v794_v17, %v794_v17 }
  0xa7   :  { %v803_v52 = vsub.f32 %v672_v24, %v113_v49  ;;  %v806_v21 = vsub.f32 %v677_v25, %v114_v50  ;;  %v194_v53 = vsel %vm35_vm0, %v153_v51, 0.0  ;;  %v197_v58 = vsel %vm35_vm0, %v154_v20, 0.0 }
  0xa8   :  { %192 = vadd.xlane.f32.xlu0 %v191_v48  ;;  %195 = vadd.xlane.f32.xlu1 %v194_v53  ;;  %v80_v56 = vpop.xlane.xlu0 %79  ;;  %v83_v57 = vpop.xlane.xlu1 %82 }
  0xa9   :  { %v115_v59 = vmul.f32 0.125, %v80_v56  ;;  %v116_v60 = vmul.f32 0.125, %v83_v57  ;;  %v155_v61 = vmul.f32 %v803_v52, %v803_v52  ;;  %v156_v24 = vmul.f32 %v806_v21, %v806_v21 }
  0xab   :  { %v815_v62 = vsub.f32 %v686_v28, %v115_v59  ;;  %v818_v25 = vsub.f32 %v691_v29, %v116_v60  ;;  %v200_v63 = vsel %vm35_vm0, %v155_v61, 0.0  ;;  %v203_v4 = vsel %vm35_vm0, %v156_v24, 0.0 }
  0xac   :  { %198 = vadd.xlane.f32.xlu0 %v197_v58  ;;  %201 = vadd.xlane.f32.xlu1 %v200_v63  ;;  %v86_v2 = vpop.xlane.xlu0 %85  ;;  %v89_v3 = vpop.xlane.xlu1 %88 }
  0xad   :  { %v117_v5 = vmul.f32 0.125, %v86_v2  ;;  %v118_v6 = vmul.f32 0.125, %v89_v3  ;;  %v157_v7 = vmul.f32 %v815_v62, %v815_v62  ;;  %v158_v28 = vmul.f32 %v818_v25, %v818_v25 }
  0xaf   :  { %v827_v10 = vsub.f32 %v700_v32, %v117_v5  ;;  %v830_v29 = vsub.f32 %v705_v33, %v118_v6  ;;  %v206_v8 = vsel %vm35_vm0, %v157_v7, 0.0  ;;  %v209_v18 = vsel %vm35_vm0, %v158_v28, 0.0 }
  0xb0   :  { %204 = vadd.xlane.f32.xlu0 %v203_v4  ;;  %207 = vadd.xlane.f32.xlu1 %v206_v8  ;;  %v92_v14 = vpop.xlane.xlu0 %91  ;;  %v95_v15 = vpop.xlane.xlu1 %94 }
  0xb1   :  { %v119_v19 = vmul.f32 0.125, %v92_v14  ;;  %v120_v22 = vmul.f32 0.125, %v95_v15  ;;  %v159_v23 = vmul.f32 %v827_v10, %v827_v10  ;;  %v160_v32 = vmul.f32 %v830_v29, %v830_v29  ;;  %v861_v14 = vld [vmem:[%s1015_s1] ss:$0 sm:$0xff] }
  0xb3   :  { %v839_v26 = vsub.f32 %v714_v36, %v119_v19  ;;  %v842_v33 = vsub.f32 %v719_v37, %v120_v22  ;;  %v212_v12 = vsel %vm35_vm0, %v159_v23, 0.0  ;;  %v215_v34 = vsel %vm35_vm0, %v160_v32, 0.0  ;;  %v867_v22 = vld [vmem:[%s1016_s2] ss:$0 sm:$0xff] }
  0xb4   :  { %210 = vadd.xlane.f32.xlu0 %v209_v18  ;;  %213 = vadd.xlane.f32.xlu1 %v212_v12  ;;  %v99_v30 = vpop.xlane.xlu0 %98 }
  0xb5   :  { %v121_v31 = vmul.f32 0.125, %v99_v30  ;;  %v161_v35 = vmul.f32 %v839_v26, %v839_v26  ;;  %v162_v38 = vmul.f32 %v842_v33, %v842_v33 }
  0xb7   :  { %v851_v36 = vsub.f32 %v728_v40, %v121_v31  ;;  %v218_v37 = vsel %vm35_vm0, %v161_v35, 0.0  ;;  %v221_v39 = vsel %vm35_vm0, %v162_v38, 0.0 }
  0xb8   :  { %216 = vadd.xlane.f32.xlu0 %v215_v34  ;;  %219 = vadd.xlane.f32.xlu1 %v218_v37 }
  0xb9   :  { %v163_v41 = vmul.f32 %v851_v36, %v851_v36 }
  0xbb   :  { %v224_v16 = vsel %vm96_vm1, %v163_v41, 0.0 }
  0xbc   :  { %222 = vadd.xlane.f32.xlu0 %v221_v39  ;;  %225 = vadd.xlane.f32.xlu1 %v224_v16 }
 0x11d   :  { %v166_v43 = vpop.xlane.xlu1 %165 }
 0x11e   :  { %v227_v44 = vmul.f32 0.125, %v166_v43 }
 0x120   :  { %v248_v45 = vadd.f32 1e-05, %v227_v44 }
 0x121   :  { %v172_v48 = vpop.xlane.xlu1 %171  ;;  %v169_v49 = vpop.xlane.xlu0 %168 }
 0x122   :  { %523 = vrsqrt.f32 %v248_v45  ;;  %v229_v40 = vmul.f32 0.125, %v172_v48  ;;  %v228_v50 = vmul.f32 0.125, %v169_v49 }
 0x124   :  { %v250_v51 = vadd.f32 1e-05, %v229_v40  ;;  %v249_v20 = vadd.f32 1e-05, %v228_v50 }
 0x125   :  { %v178_v53 = vpop.xlane.xlu1 %177  ;;  %v175_v56 = vpop.xlane.xlu0 %174 }
 0x126   :  { %525 = vrsqrt.f32 %v250_v51  ;;  %v231_v57 = vmul.f32 0.125, %v178_v53  ;;  %v230_v58 = vmul.f32 0.125, %v175_v56 }
 0x127   :  { %527 = vrsqrt.f32 %v249_v20 }
 0x128   :  { %v252_v59 = vadd.f32 1e-05, %v231_v57  ;;  %v251_v60 = vadd.f32 1e-05, %v230_v58 }
 0x129   :  { %v184_v61 = vpop.xlane.xlu1 %183  ;;  %v181_v24 = vpop.xlane.xlu0 %180 }
 0x12a   :  { %529 = vrsqrt.f32 %v252_v59  ;;  %v233_v63 = vmul.f32 0.125, %v184_v61  ;;  %v232_v2 = vmul.f32 0.125, %v181_v24 }
 0x12b   :  { %531 = vrsqrt.f32 %v251_v60 }
 0x12c   :  { %v254_v3 = vadd.f32 1e-05, %v233_v63  ;;  %v253_v4 = vadd.f32 1e-05, %v232_v2 }
 0x12d   :  { %v190_v5 = vpop.xlane.xlu1 %189  ;;  %v187_v6 = vpop.xlane.xlu0 %186 }
 0x12e   :  { %533 = vrsqrt.f32 %v254_v3  ;;  %v235_v7 = vmul.f32 0.125, %v190_v5  ;;  %v234_v28 = vmul.f32 0.125, %v187_v6 }
 0x12f   :  { %v524_v8 = vpop.eup %523  ;;  %535 = vrsqrt.f32 %v253_v4 }
 0x130   :  { %v290_v15 = vmul.f32 %v524_v8, %v733_v46  ;;  %v256_v18 = vadd.f32 1e-05, %v235_v7  ;;  %v255_v19 = vadd.f32 1e-05, %v234_v28 }
 0x131   :  { %v196_v23 = vpop.xlane.xlu1 %195  ;;  %v193_v32 = vpop.xlane.xlu0 %192 }
 0x132   :  { %v318_v12 = vmul.f32 %v861_v14, %v290_v15  ;;  %537 = vrsqrt.f32 %v256_v18  ;;  %v237_v30 = vmul.f32 0.125, %v196_v23  ;;  %v236_v31 = vmul.f32 0.125, %v193_v32 }
 0x133   :  { %v526_v34 = vpop.eup %525  ;;  %539 = vrsqrt.f32 %v255_v19 }
 0x134   :  { %v528_v35 = vpop.eup %527  ;;  %v346_v38 = vadd.f32 %v867_v22, %v318_v12  ;;  %v292_v46 = vmul.f32 %v526_v34, %v736_v47  ;;  %v258_v37 = vadd.f32 1e-05, %v237_v30  ;;  %v257_v39 = vadd.f32 1e-05, %v236_v31 }
 0x135   :  { %v291_v41 = vmul.f32 %v528_v35, %v743_v54  ;;  %v202_v16 = vpop.xlane.xlu1 %201  ;;  %v199_v43 = vpop.xlane.xlu0 %198 }
 0x136   :  { %v502_v44 = vpack.c.bf16 %v346_v38, %v346_v38  ;;  %v320_v45 = vmul.f32 %v861_v14, %v292_v46  ;;  %541 = vrsqrt.f32 %v258_v37  ;;  %v239_v48 = vmul.f32 0.125, %v202_v16 }
 0x137   :  { %v530_v49 = vpop.eup %529  ;;  %v319_v40 = vmul.f32 %v861_v14, %v291_v41  ;;  %543 = vrsqrt.f32 %v257_v39  ;;  %v238_v50 = vmul.f32 0.125, %v199_v43 }
 0x138   :  { %v532_v51 = vpop.eup %531  ;;  %453 = vst.msk [vmem:[%s1017_s3] sm:$0xf] %vm452_vm2, %v502_v44  ;;  %v348_v47 = vadd.f32 %v867_v22, %v320_v45  ;;  %v294_v54 = vmul.f32 %v530_v49, %v755_v0  ;;  %v260_v20 = vadd.f32 1e-05, %v239_v48 }
 0x139   :  { %v347_v53 = vadd.f32 %v867_v22, %v319_v40  ;;  %v293_v56 = vmul.f32 %v532_v51, %v746_v55  ;;  %v259_v57 = vadd.f32 1e-05, %v238_v50  ;;  %v208_v58 = vpop.xlane.xlu1 %207  ;;  %v205_v59 = vpop.xlane.xlu0 %204 }
 0x13a   :  { %v504_v60 = vpack.c.bf16 %v348_v47, %v348_v47  ;;  %v322_v61 = vmul.f32 %v861_v14, %v294_v54  ;;  %545 = vrsqrt.f32 %v260_v20  ;;  %v241_v24 = vmul.f32 0.125, %v208_v58 }
 0x13b   :  { %v534_v63 = vpop.eup %533  ;;  %v503_v2 = vpack.c.bf16 %v347_v53, %v347_v53  ;;  %v321_v3 = vmul.f32 %v861_v14, %v293_v56  ;;  %547 = vrsqrt.f32 %v259_v57  ;;  %v240_v4 = vmul.f32 0.125, %v205_v59 }
 0x13c   :  { %v536_v0 = vpop.eup %535  ;;  %455 = vst.msk [vmem:[%s1017_s3 + $0x8] sm:$0xf] %vm452_vm2, %v504_v60  ;;  %v350_v55 = vadd.f32 %v867_v22, %v322_v61  ;;  %v296_v5 = vmul.f32 %v534_v63, %v767_v11  ;;  %v262_v6 = vadd.f32 1e-05, %v241_v24 }
 0x13d   :  { %454 = vst.msk [vmem:[%s1017_s3 + $0x4] sm:$0xf] %vm452_vm2, %v503_v2  ;;  %v349_v7 = vadd.f32 %v867_v22, %v321_v3  ;;  %v295_v28 = vmul.f32 %v536_v0, %v758_v1  ;;  %v261_v8 = vadd.f32 1e-05, %v240_v4  ;;  %v214_v15 = vpop.xlane.xlu1 %213  ;;  %v211_v18 = vpop.xlane.xlu0 %210 }
 0x13e   :  { %v506_v19 = vpack.c.bf16 %v350_v55, %v350_v55  ;;  %v324_v23 = vmul.f32 %v861_v14, %v296_v5  ;;  %549 = vrsqrt.f32 %v262_v6  ;;  %v243_v32 = vmul.f32 0.125, %v214_v15 }
 0x13f   :  { %v538_v12 = vpop.eup %537  ;;  %v505_v11 = vpack.c.bf16 %v349_v7, %v349_v7  ;;  %v323_v30 = vmul.f32 %v861_v14, %v295_v28  ;;  %551 = vrsqrt.f32 %v261_v8  ;;  %v242_v31 = vmul.f32 0.125, %v211_v18 }
 0x140   :  { %v540_v34 = vpop.eup %539  ;;  %457 = vst.msk [vmem:[%s1017_s3 + $0x10] sm:$0xf] %vm452_vm2, %v506_v19  ;;  %v352_v1 = vadd.f32 %v867_v22, %v324_v23  ;;  %v298_v35 = vmul.f32 %v538_v12, %v779_v27  ;;  %v264_v38 = vadd.f32 1e-05, %v243_v32 }
 0x141   :  { %456 = vst.msk [vmem:[%s1017_s3 + $0xc] sm:$0xf] %vm452_vm2, %v505_v11  ;;  %v351_v46 = vadd.f32 %v867_v22, %v323_v30  ;;  %v297_v37 = vmul.f32 %v540_v34, %v770_v9  ;;  %v263_v39 = vadd.f32 1e-05, %v242_v31  ;;  %v220_v41 = vpop.xlane.xlu1 %219  ;;  %v217_v16 = vpop.xlane.xlu0 %216 }
 0x142   :  { %v508_v43 = vpack.c.bf16 %v352_v1, %v352_v1  ;;  %v326_v44 = vmul.f32 %v861_v14, %v298_v35  ;;  %553 = vrsqrt.f32 %v264_v38  ;;  %v245_v45 = vmul.f32 0.125, %v220_v41 }
 0x143   :  { %v542_v48 = vpop.eup %541  ;;  %v507_v27 = vpack.c.bf16 %v351_v46, %v351_v46  ;;  %v325_v49 = vmul.f32 %v861_v14, %v297_v37  ;;  %555 = vrsqrt.f32 %v263_v39  ;;  %v244_v40 = vmul.f32 0.125, %v217_v16 }
 0x144   :  { %v544_v50 = vpop.eup %543  ;;  %459 = vst.msk [vmem:[%s1017_s3 + $0x18] sm:$0xf] %vm452_vm2, %v508_v43  ;;  %v354_v9 = vadd.f32 %v867_v22, %v326_v44  ;;  %v300_v51 = vmul.f32 %v542_v48, %v791_v42  ;;  %v266_v47 = vadd.f32 1e-05, %v245_v45 }
 0x145   :  { %458 = vst.msk [vmem:[%s1017_s3 + $0x14] sm:$0xf] %vm452_vm2, %v507_v27  ;;  %v353_v54 = vadd.f32 %v867_v22, %v325_v49  ;;  %v299_v20 = vmul.f32 %v544_v50, %v782_v13  ;;  %v265_v53 = vadd.f32 1e-05, %v244_v40  ;;  %v226_v56 = vpop.xlane.xlu1 %225  ;;  %v223_v57 = vpop.xlane.xlu0 %222 }
 0x146   :  { %v510_v58 = vpack.c.bf16 %v354_v9, %v354_v9  ;;  %v328_v59 = vmul.f32 %v861_v14, %v300_v51  ;;  %557 = vrsqrt.f32 %v266_v47  ;;  %v247_v60 = vmul.f32 0.125, %v226_v56 }
 0x147   :  { %v546_v61 = vpop.eup %545  ;;  %v509_v42 = vpack.c.bf16 %v353_v54, %v353_v54  ;;  %v327_v24 = vmul.f32 %v861_v14, %v299_v20  ;;  %559 = vrsqrt.f32 %v265_v53  ;;  %v246_v63 = vmul.f32 0.125, %v223_v57 }
 0x148   :  { %v548_v2 = vpop.eup %547  ;;  %461 = vst.msk [vmem:[%s1017_s3 + $0x20] sm:$0xf] %vm452_vm2, %v510_v58  ;;  %v356_v13 = vadd.f32 %v867_v22, %v328_v59  ;;  %v302_v3 = vmul.f32 %v546_v61, %v803_v52  ;;  %v268_v4 = vadd.f32 1e-05, %v247_v60 }
 0x149   :  { %460 = vst.msk [vmem:[%s1017_s3 + $0x1c] sm:$0xf] %vm452_vm2, %v509_v42  ;;  %v355_v0 = vadd.f32 %v867_v22, %v327_v24  ;;  %v301_v55 = vmul.f32 %v548_v2, %v794_v17  ;;  %v267_v5 = vadd.f32 1e-05, %v246_v63 }
 0x14a   :  { %v512_v6 = vpack.c.bf16 %v356_v13, %v356_v13  ;;  %v330_v7 = vmul.f32 %v861_v14, %v302_v3  ;;  %561 = vrsqrt.f32 %v268_v4 }
 0x14b   :  { %v550_v28 = vpop.eup %549  ;;  %v511_v8 = vpack.c.bf16 %v355_v0, %v355_v0  ;;  %v329_v15 = vmul.f32 %v861_v14, %v301_v55  ;;  %563 = vrsqrt.f32 %v267_v5 }
 0x14c   :  { %v552_v52 = vpop.eup %551  ;;  %463 = vst.msk [vmem:[%s1017_s3 + $0x28] sm:$0xf] %vm452_vm2, %v512_v6  ;;  %v358_v18 = vadd.f32 %v867_v22, %v330_v7  ;;  %v304_v17 = vmul.f32 %v550_v28, %v815_v62 }
 0x14d   :  { %462 = vst.msk [vmem:[%s1017_s3 + $0x24] sm:$0xf] %vm452_vm2, %v511_v8  ;;  %v357_v19 = vadd.f32 %v867_v22, %v329_v15  ;;  %v303_v23 = vmul.f32 %v552_v52, %v806_v21 }
 0x14e   :  { %v514_v32 = vpack.c.bf16 %v358_v18, %v358_v18  ;;  %v332_v12 = vmul.f32 %v861_v14, %v304_v17 }
 0x14f   :  { %v554_v11 = vpop.eup %553  ;;  %v513_v30 = vpack.c.bf16 %v357_v19, %v357_v19  ;;  %v331_v31 = vmul.f32 %v861_v14, %v303_v23 }
 0x150   :  { %v556_v34 = vpop.eup %555  ;;  %465 = vst.msk [vmem:[%s1017_s3 + $0x30] sm:$0xf] %vm452_vm2, %v514_v32  ;;  %v360_v62 = vadd.f32 %v867_v22, %v332_v12  ;;  %v306_v1 = vmul.f32 %v554_v11, %v827_v10 }
 0x151   :  { %464 = vst.msk [vmem:[%s1017_s3 + $0x2c] sm:$0xf] %vm452_vm2, %v513_v30  ;;  %v359_v21 = vadd.f32 %v867_v22, %v331_v31  ;;  %v305_v35 = vmul.f32 %v556_v34, %v818_v25 }
 0x152   :  { %v516_v38 = vpack.c.bf16 %v360_v62, %v360_v62  ;;  %v334_v46 = vmul.f32 %v861_v14, %v306_v1 }
 0x153   :  { %v558_v37 = vpop.eup %557  ;;  %v515_v39 = vpack.c.bf16 %v359_v21, %v359_v21  ;;  %v333_v41 = vmul.f32 %v861_v14, %v305_v35 }
 0x154   :  { %v560_v16 = vpop.eup %559  ;;  %467 = vst.msk [vmem:[%s1017_s3 + $0x38] sm:$0xf] %vm452_vm2, %v516_v38  ;;  %v362_v10 = vadd.f32 %v867_v22, %v334_v46  ;;  %v308_v43 = vmul.f32 %v558_v37, %v839_v26 }
 0x155   :  { %466 = vst.msk [vmem:[%s1017_s3 + $0x34] sm:$0xf] %vm452_vm2, %v515_v39  ;;  %v361_v25 = vadd.f32 %v867_v22, %v333_v41  ;;  %v307_v44 = vmul.f32 %v560_v16, %v830_v29 }
 0x156   :  { %v518_v45 = vpack.c.bf16 %v362_v10, %v362_v10  ;;  %v336_v48 = vmul.f32 %v861_v14, %v308_v43 }
 0x157   :  { %v562_v27 = vpop.eup %561  ;;  %v517_v49 = vpack.c.bf16 %v361_v25, %v361_v25  ;;  %v335_v40 = vmul.f32 %v861_v14, %v307_v44 }
 0x158   :  { %v564_v50 = vpop.eup %563  ;;  %469 = vst.msk [vmem:[%s1017_s3 + $0x40] sm:$0xf] %vm452_vm2, %v518_v45  ;;  %v364_v26 = vadd.f32 %v867_v22, %v336_v48  ;;  %v310_v9 = vmul.f32 %v562_v27, %v851_v36 }
 0x159   :  { %468 = vst.msk [vmem:[%s1017_s3 + $0x3c] sm:$0xf] %vm452_vm2, %v517_v49  ;;  %v363_v29 = vadd.f32 %v867_v22, %v335_v40  ;;  %v309_v51 = vmul.f32 %v564_v50, %v842_v33 }
 0x15a   :  { %v520_v47 = vpack.c.bf16 %v364_v26, %v364_v26  ;;  %v338_v54 = vmul.f32 %v861_v14, %v310_v9 }
 0x15b   :  { %v519_v20 = vpack.c.bf16 %v363_v29, %v363_v29  ;;  %v337_v53 = vmul.f32 %v861_v14, %v309_v51 }
 0x15c   :  { %471 = vst.msk [vmem:[%s1017_s3 + $0x48] sm:$0xf] %vm452_vm2, %v520_v47  ;;  %v366_v36 = vadd.f32 %v867_v22, %v338_v54 }
 0x15d   :  { %470 = vst.msk [vmem:[%s1017_s3 + $0x44] sm:$0xf] %vm452_vm2, %v519_v20  ;;  %v365_v33 = vadd.f32 %v867_v22, %v337_v53 }
 0x15e   :  { %v522_v56 = vpack.c.bf16 %v366_v36, %v366_v36 }
 0x15f   :  { %v521_v57 = vpack.c.bf16 %v365_v33, %v365_v33 }
 0x160   :  { %474 = vst.msk [vmem:[%s1017_s3 + $0x50] sm:$0x1] %vm473_vm3, %v522_v56 }
 0x161   :  { %472 = vst.msk [vmem:[%s1017_s3 + $0x4c] sm:$0xf] %vm452_vm2, %v521_v57 }

// kernel: gridnet_block_forward.16
= control target key start
LH: loop header
LB: loop body
LE: loop exit
PB: predicated region body
PF: predicated region fallthrough
CT: control target
= control target key end

     0   :  { %s862_s12 = smov 0   ;;  %s864_s13 = smov 0   ;;  %s1038_s0 = inlined_call_operand.vmem [shape: bf16[72,24], index: 0, kind: input, shape index: {}]   ;;  %s1039_s1 = inlined_call_operand.vmem [shape: bf16[24,1024], index: 1, kind: input, shape index: {}]   ;;  %s1040_s2 = inlined_call_operand.vmem [shape: f32[2,1,512], index: 2, kind: input, shape index: {}]   ;;  %s1041_s3 = inlined_call_operand.vmem [shape: f32[2,72,512], index: 3, kind: output, shape index: {}]  }
   0x1   :  { %s866_s14 = smov 0   ;;  %s868_s15 = smov 0  }
   0x2   :  { %s870_s16 = smov 0  }
   0x3 LB: > { %s25_s17 = sadd.s32 1, %s835_s15  ;;  %p65_p1 = scmp.ne.s32.totalorder %s827_s13, %s823_s12  ;;  %s839_s16 = sphi %s870_s16, %s13_s16   ;;  %s835_s15 = sphi %s868_s15, %s1045_s15   ;;  %s831_s14 = sphi %s866_s14, %s1044_s14   ;;  %s827_s13 = sphi %s864_s13, %s1043_s13   ;;  %s823_s12 = sphi %s862_s12, %s1042_s12  }
   0x4   : > { %p27_p0 = scmp.ge.s32.totalorder %s25_s17, 2  ;;  %p66_p2 = scmp.eq.s32.totalorder %s839_s16, 0 }
   0x5   : > { %s58_s19 = sadd.s32 1, %s827_s13  ;;  %p708_p5 = scmp.ge.s32.totalorder %s839_s16, 2 }
   0x6   : > { %s1047_s17 = smov (%p27_p0, %s25_s17), 0  ;;  %p67_p3 = por %p66_p2, %p65_p1 }
   0x7   : > { %s55_s18 = ssub.s32 %s835_s15, %s1047_s17  ;;  %154 = sbr.rel (%p708_p5) target bundleno = 19 (0x13), region = 20 }
   0x8   : > { %p56_p4 = scmp.eq.s32.totalorder %s55_s18, 0 }
   0xa   : > { %s897_s20 = scalar_select %p56_p4, %s827_s13, %s58_s19  }
   0xc   : > { %157 = sbr.rel (!%p67_p3) target bundleno = 19 (0x13), region = 24  ;;  %s159_s21 = sand.u32 (%p67_p3), 1, %s827_s13  }
   0xd   : > { %s741_s22 = sshll.u32 (%p67_p3), %s835_s15, 4  ;;  %s742_s23 = smul.u32 (%p67_p3), 48, %s159_s21 }
   0xe   : > { %s164_s26 = scalar_lea.vmem (%p67_p3), %s1039_s1, %s741_s22 }
   0xf   : > { %v177_v0 = vld [vmem:[%s164_s26] sm:$0xff] (%p67_p3)  ;;  %v179_v1 = vld [vmem:[%s164_s26 + $0x8] sm:$0xff] (%p67_p3)  ;;  %s161_s27 = scalar_lea.vmem (%p67_p3), [#allocation2], %s742_s23 }
  0x10   : > { %v181_v2 = vld [vmem:[%s164_s26 + $0x20] sm:$0xff] (%p67_p3)  ;;  %v183_v3 = vld [vmem:[%s164_s26 + $0x28] sm:$0xff] (%p67_p3)  ;;  %178 = vst [vmem:[%s161_s27] sm:$0xff] (%p67_p3), %v177_v0  ;;  %180 = vst [vmem:[%s161_s27 + $0x8] sm:$0xff] (%p67_p3), %v179_v1 }
  0x11   : > { %v185_v4 = vld [vmem:[%s164_s26 + $0x40] sm:$0xff]  ;;  %v187_v5 = vld [vmem:[%s164_s26 + $0x48] sm:$0xff]  ;;  %182 = vst [vmem:[%s161_s27 + $0x10] sm:$0xff] %v181_v2  ;;  %184 = vst [vmem:[%s161_s27 + $0x18] sm:$0xff] %v183_v3 }
  0x12   : > { %186 = vst [vmem:[%s161_s27 + $0x20] sm:$0xff] %v185_v4  ;;  %188 = vst [vmem:[%s161_s27 + $0x28] sm:$0xff] %v187_v5 }
  0x13 PF: > { %p711_p6 = scmp.ge.s32.totalorder %s839_s16, 1  ;;  %p200_p7 = scmp.lt.s32.totalorder %s839_s16, 3 }
  0x15   : > { %p201_p8 = pnand %p711_p6, %p200_p7 }
  0x16   : > { %s207_s28 = sand.u32 (!%p201_p8), 1, %s823_s12   ;;  %p251_p9 = scmp.lt.s32.totalorder (!%p201_p8), %s831_s14, 1 }
  0x17   : > { %204 = sbr.rel (%p201_p8) target bundleno = 271 (0x10f), region = 51 }
  0x18   : > { %s743_s29 = smul.u32 (!%p201_p8), 48, %s207_s28 }
  0x1a   : > { %s209_s30 = scalar_lea.vmem (!%p201_p8), [#allocation2], %s743_s29 }
  0x1c   : > { %v841_v6 = vmov 0   ;;  %v280_v7 = vld [vmem:[%s209_s30 + $0x20] sm:$0xff]  ;;  %vm373_vm0 = vcmask 1043456   ;;  %v281_v8 = vld [vmem:[%s209_s30 + $0x28] sm:$0xff]  ;;  %vm357_vm1 = vcmask 195584   ;;  %s1049_s14 = smov (!%p251_p9, %s831_s14), 1  ;;  %v284_v24 = vlaneseq }
  0x1d   : > { %418 = vmatprep.mubr.bf16.mxu0 %v841_v6  ;;  %499 = vmatprep.mubr.bf16.mxu1 %v841_v6  ;;  %v724_v9 = vcombine.high %v280_v7, %v280_v7  ;;  %v726_v10 = vcombine.high %v281_v8, %v281_v8  ;;  %v723_v11 = vcombine.low %v280_v7, %v280_v7  ;;  %v790_v13 = vld [vmem:[%s209_s30 + $0x4] ss:$16 sps:$4 sm:$0xff]   ;;  %v792_v14 = vld [vmem:[%s209_s30 + $0xc] ss:$16 sps:$4 sm:$0xff]   ;;  %v794_v17 = vld [vmem:[%s209_s30] ss:$16 sps:$4 sm:$0xff]  }
  0x1e   : > { %v725_v12 = vcombine.low %v281_v8, %v281_v8  ;;  %v795_v18 = vld [vmem:[%s209_s30 + $0x8] ss:$16 sps:$4 sm:$0xff]   ;;  %v796_v19 = vld [vmem:[%s1038_s0] sm:$0xff]   ;;  %v798_v21 = vld [vmem:[%s1038_s0 + $0x10] sm:$0xff]   ;;  %s712_s19 = sshll.u32 %s1049_s14, 2  ;;  %v285_v25 = vshrl.u32 %v284_v24, 7 }
  0x1f   : > { %727 = vmatprep.subr.msk.bf16.mxu0 %vm373_vm0, %v724_v9  ;;  %733 = vmatprep.subr.msk.bf16.mxu1 %vm373_vm0, %v726_v10  ;;  %v375_v15 = vsel %vm373_vm0, %v723_v11, 0  ;;  %v797_v20 = vld [vmem:[%s1038_s0 + $0x8] sm:$0xff]   ;;  %v799_v22 = vld [vmem:[%s1038_s0 + $0x18] sm:$0xff]   ;;  %v800_v23 = vld [vmem:[%s1038_s0 + $0x20] ss:$0 sps:$4 sm:$0xff]   ;;  %s254_s23 = scalar_lea.vmem %s1040_s2, %s712_s19  ;;  %s744_s24 = smul.u32 288, %s1049_s14 }
  0x20   : > { %v381_v16 = vsel %vm373_vm0, %v725_v12, 0  ;;  %399 = vmatpush1.bf16.msra.mxu0 %v375_v15  ;;  %v286_v26 = vsub.s32 0, %v285_v25  ;;  %v294_v27 = vsub.s32 2, %v285_v25  ;;  %v282_v28 = vld [vmem:[%s254_s23] sm:$0xf]  ;;  %v290_v29 = vsub.s32 1, %v285_v25 }
  0x21   : > { %480 = vmatpush1.bf16.msra.mxu1 %v381_v16  ;;  %400 = vmatprep.subr.bf16.mxu0 %v790_v13  ;;  %v298_v30 = vsub.s32 3, %v285_v25  ;;  %s949_s27 = scalar_lea.vmem %s1041_s3, %s744_s24 }
  0x22   : > { %481 = vmatprep.subr.bf16.mxu1 %v792_v14  ;;  %v938_v31 = vrot.slane %v282_v28, %v286_v26  ;;  %v940_v32 = vrot.slane %v282_v28, %v294_v27  ;;  %v942_v33 = vrot.slane %v282_v28, %v290_v29 }
  0x23   : > { %v944_v34 = vrot.slane %v282_v28, %v298_v30 }
  0x24   : > { %401 = vmatpush1.bf16.msra.mxu0 %v794_v17 }
  0x25   : > { %482 = vmatpush1.bf16.msra.mxu1 %v795_v18 }
  0x27   : > { %728 = vmatmul.mubr.msk.bf16.vlgmr.msra.gmra.mxu0 %vm357_vm1, %v796_v19 }
  0x28   : > { %734 = vmatmul.mubr.msk.bf16.vlgmr.msra.gmra.mxu1 %vm357_vm1, %v796_v19  ;;  %428 = vmatprep.mubr.bf16.mxu0 %v841_v6 }
  0x29   : > { %509 = vmatprep.mubr.bf16.mxu1 %v841_v6 }
  0x2f   : > { %729 = vmatmul.mubr.msk.bf16.gmra.mxu0 %vm357_vm1, %v797_v20 }
  0x30   : > { %735 = vmatmul.mubr.msk.bf16.gmra.mxu1 %vm357_vm1, %v797_v20  ;;  %438 = vmatprep.mubr.bf16.mxu0 %v841_v6 }
  0x31   : > { %519 = vmatprep.mubr.bf16.mxu1 %v841_v6 }
  0x37   : > { %730 = vmatmul.mubr.msk.bf16.gmra.mxu0 %vm357_vm1, %v798_v21 }
  0x38   : > { %736 = vmatmul.mubr.msk.bf16.gmra.mxu1 %vm357_vm1, %v798_v21  ;;  %448 = vmatprep.mubr.bf16.mxu0 %v841_v6 }
  0x39   : > { %529 = vmatprep.mubr.bf16.mxu1 %v841_v6 }
  0x3f   : > { %731 = vmatmul.mubr.msk.bf16.gmra.mxu0 %vm357_vm1, %v799_v22 }
  0x40   : > { %737 = vmatmul.mubr.msk.bf16.gmra.mxu1 %vm357_vm1, %v799_v22  ;;  %458 = vmatprep.mubr.bf16.mxu0 %v841_v6 }
  0x41   : > { %539 = vmatprep.mubr.bf16.mxu1 %v841_v6 }
  0x47   : > { %732 = vmatmul.mubr.msk.bf16.gmra.mxu0 %vm357_vm1, %v800_v23 }
  0x48   : > { %738 = vmatmul.mubr.msk.bf16.gmra.mxu1 %vm357_vm1, %v800_v23 }
  0xe7   : > { %v420_v35 = vpop.f32.mrf.mxu0 }
  0xe8   : > { %v501_v36 = vpop.f32.mrf.mxu1  ;;  %v421_v37 = vadd.f32 %v420_v35, %v938_v31 }
  0xe9   : > { %v502_v38 = vadd.f32 %v501_v36, %v940_v32  ;;  %v422_v39 = vpop.f32.mrf.mxu0 }
  0xea   : > { %v503_v40 = vpop.f32.mrf.mxu1  ;;  %548 = vst [vmem:[%s949_s27] sm:$0xff] %v421_v37  ;;  %v423_v41 = vadd.f32 %v422_v39, %v942_v33 }
  0xeb   : > { %550 = vst [vmem:[%s949_s27 + $0x10] sm:$0xff] %v502_v38  ;;  %v504_v42 = vadd.f32 %v503_v40, %v944_v34  ;;  %v424_v43 = vpop.f32.mrf.mxu0 }
  0xec   : > { %v505_v44 = vpop.f32.mrf.mxu1  ;;  %549 = vst [vmem:[%s949_s27 + $0x8] sm:$0xff] %v423_v41  ;;  %v425_v45 = vadd.f32 %v424_v43, %v938_v31 }
  0xed   : > { %551 = vst [vmem:[%s949_s27 + $0x18] sm:$0xff] %v504_v42  ;;  %v506_v46 = vadd.f32 %v505_v44, %v940_v32  ;;  %v426_v47 = vpop.f32.mrf.mxu0 }
  0xee   : > { %v507_v48 = vpop.f32.mrf.mxu1  ;;  %552 = vst [vmem:[%s949_s27 + $0x20] sm:$0xff] %v425_v45  ;;  %v427_v49 = vadd.f32 %v426_v47, %v942_v33 }
  0xef   : > { %554 = vst [vmem:[%s949_s27 + $0x30] sm:$0xff] %v506_v46  ;;  %v508_v50 = vadd.f32 %v507_v48, %v944_v34  ;;  %v430_v51 = vpop.f32.mrf.mxu0 }
  0xf0   : > { %v511_v52 = vpop.f32.mrf.mxu1  ;;  %553 = vst [vmem:[%s949_s27 + $0x28] sm:$0xff] %v427_v49  ;;  %v431_v53 = vadd.f32 %v430_v51, %v938_v31 }
  0xf1   : > { %555 = vst [vmem:[%s949_s27 + $0x38] sm:$0xff] %v508_v50  ;;  %v512_v54 = vadd.f32 %v511_v52, %v940_v32  ;;  %v432_v55 = vpop.f32.mrf.mxu0 }
  0xf2   : > { %v513_v56 = vpop.f32.mrf.mxu1  ;;  %556 = vst [vmem:[%s949_s27 + $0x40] sm:$0xff] %v431_v53  ;;  %v433_v57 = vadd.f32 %v432_v55, %v942_v33 }
  0xf3   : > { %558 = vst [vmem:[%s949_s27 + $0x50] sm:$0xff] %v512_v54  ;;  %v514_v58 = vadd.f32 %v513_v56, %v944_v34  ;;  %v434_v59 = vpop.f32.mrf.mxu0 }
  0xf4   : > { %v515_v60 = vpop.f32.mrf.mxu1  ;;  %557 = vst [vmem:[%s949_s27 + $0x48] sm:$0xff] %v433_v57  ;;  %v435_v61 = vadd.f32 %v434_v59, %v938_v31 }
  0xf5   : > { %559 = vst [vmem:[%s949_s27 + $0x58] sm:$0xff] %v514_v58  ;;  %v516_v62 = vadd.f32 %v515_v60, %v940_v32  ;;  %v436_v63 = vpop.f32.mrf.mxu0 }
  0xf6   : > { %v517_v0 = vpop.f32.mrf.mxu1  ;;  %560 = vst [vmem:[%s949_s27 + $0x60] sm:$0xff] %v435_v61  ;;  %v437_v1 = vadd.f32 %v436_v63, %v942_v33 }
  0xf7   : > { %562 = vst [vmem:[%s949_s27 + $0x70] sm:$0xff] %v516_v62  ;;  %v518_v2 = vadd.f32 %v517_v0, %v944_v34  ;;  %v440_v3 = vpop.f32.mrf.mxu0 }
  0xf8   : > { %v521_v4 = vpop.f32.mrf.mxu1  ;;  %561 = vst [vmem:[%s949_s27 + $0x68] sm:$0xff] %v437_v1  ;;  %v441_v5 = vadd.f32 %v440_v3, %v938_v31 }
  0xf9   : > { %563 = vst [vmem:[%s949_s27 + $0x78] sm:$0xff] %v518_v2  ;;  %v522_v6 = vadd.f32 %v521_v4, %v940_v32  ;;  %v442_v7 = vpop.f32.mrf.mxu0 }
  0xfa   : > { %v523_v8 = vpop.f32.mrf.mxu1  ;;  %564 = vst [vmem:[%s949_s27 + $0x80] sm:$0xff] %v441_v5  ;;  %v443_v9 = vadd.f32 %v442_v7, %v942_v33 }
  0xfb   : > { %566 = vst [vmem:[%s949_s27 + $0x90] sm:$0xff] %v522_v6  ;;  %v524_v10 = vadd.f32 %v523_v8, %v944_v34  ;;  %v444_v11 = vpop.f32.mrf.mxu0 }
  0xfc   : > { %v525_v12 = vpop.f32.mrf.mxu1  ;;  %565 = vst [vmem:[%s949_s27 + $0x88] sm:$0xff] %v443_v9  ;;  %v445_v13 = vadd.f32 %v444_v11, %v938_v31 }
  0xfd   : > { %567 = vst [vmem:[%s949_s27 + $0x98] sm:$0xff] %v524_v10  ;;  %v526_v14 = vadd.f32 %v525_v12, %v940_v32  ;;  %v446_v15 = vpop.f32.mrf.mxu0 }
  0xfe   : > { %v527_v16 = vpop.f32.mrf.mxu1  ;;  %568 = vst [vmem:[%s949_s27 + $0xa0] sm:$0xff] %v445_v13  ;;  %v447_v17 = vadd.f32 %v446_v15, %v942_v33 }
  0xff   : > { %570 = vst [vmem:[%s949_s27 + $0xb0] sm:$0xff] %v526_v14  ;;  %v528_v18 = vadd.f32 %v527_v16, %v944_v34  ;;  %v450_v19 = vpop.f32.mrf.mxu0 }
 0x100   : > { %v531_v20 = vpop.f32.mrf.mxu1  ;;  %569 = vst [vmem:[%s949_s27 + $0xa8] sm:$0xff] %v447_v17  ;;  %v451_v21 = vadd.f32 %v450_v19, %v938_v31 }
 0x101   : > { %571 = vst [vmem:[%s949_s27 + $0xb8] sm:$0xff] %v528_v18  ;;  %v532_v22 = vadd.f32 %v531_v20, %v940_v32  ;;  %v452_v23 = vpop.f32.mrf.mxu0 }
 0x102   : > { %v533_v24 = vpop.f32.mrf.mxu1  ;;  %572 = vst [vmem:[%s949_s27 + $0xc0] sm:$0xff] %v451_v21  ;;  %v453_v25 = vadd.f32 %v452_v23, %v942_v33 }
 0x103   : > { %574 = vst [vmem:[%s949_s27 + $0xd0] sm:$0xff] %v532_v22  ;;  %v534_v26 = vadd.f32 %v533_v24, %v944_v34  ;;  %v454_v27 = vpop.f32.mrf.mxu0 }
 0x104   : > { %v535_v28 = vpop.f32.mrf.mxu1  ;;  %573 = vst [vmem:[%s949_s27 + $0xc8] sm:$0xff] %v453_v25  ;;  %v455_v29 = vadd.f32 %v454_v27, %v938_v31 }
 0x105   : > { %575 = vst [vmem:[%s949_s27 + $0xd8] sm:$0xff] %v534_v26  ;;  %v536_v30 = vadd.f32 %v535_v28, %v940_v32  ;;  %v456_v35 = vpop.f32.mrf.mxu0 }
 0x106   : > { %v537_v36 = vpop.f32.mrf.mxu1  ;;  %576 = vst [vmem:[%s949_s27 + $0xe0] sm:$0xff] %v455_v29  ;;  %v457_v37 = vadd.f32 %v456_v35, %v942_v33 }
 0x107   : > { %578 = vst [vmem:[%s949_s27 + $0xf0] sm:$0xff] %v536_v30  ;;  %v538_v38 = vadd.f32 %v537_v36, %v944_v34  ;;  %v460_v39 = vpop.f32.mrf.mxu0 }
 0x108   : > { %v541_v40 = vpop.f32.mrf.mxu1  ;;  %577 = vst [vmem:[%s949_s27 + $0xe8] sm:$0xff] %v457_v37  ;;  %v461_v41 = vadd.f32 %v460_v39, %v938_v31 }
 0x109   : > { %579 = vst [vmem:[%s949_s27 + $0xf8] sm:$0xff] %v538_v38  ;;  %v542_v42 = vadd.f32 %v541_v40, %v940_v32  ;;  %v462_v43 = vpop.f32.mrf.mxu0 }
 0x10a   : > { %v543_v44 = vpop.f32.mrf.mxu1  ;;  %580 = vst [vmem:[%s949_s27 + $0x100] sm:$0xff] %v461_v41  ;;  %v463_v45 = vadd.f32 %v462_v43, %v942_v33 }
 0x10b   : > { %582 = vst [vmem:[%s949_s27 + $0x110] sm:$0xff] %v542_v42  ;;  %v544_v46 = vadd.f32 %v543_v44, %v944_v34  ;;  %v464_v47 = vpop.f32.mrf.mxu0 }
 0x10c   : > { %v545_v48 = vpop.f32.mrf.mxu1  ;;  %581 = vst [vmem:[%s949_s27 + $0x108] sm:$0xff] %v463_v45 }
 0x10d   : > { %583 = vst [vmem:[%s949_s27 + $0x118] sm:$0xff] %v544_v46  ;;  %v465_v49 = vpop.f32.mrf.mxu0 }
 0x10e   : > { %v546_v50 = vpop.f32.mrf.mxu1 }
 0x10f PF: > { %s13_s16 = sadd.s32 1, %s839_s16   ;;  %s1042_s12 = smov %s827_s13 }
 0x110   : > { %p10_p10 = scmp.ge.s32.totalorder %s13_s16, 4   ;;  %s1043_s13 = smov %s897_s20 }
 0x111   : > { %s1044_s14 = smov %s835_s15  ;;  %s1045_s15 = smov %s1047_s17 }
 0x112   :  { %12 = sbr.rel (!%p10_p10) target bundleno = 3 (0x3), region = 96 }

// kernel: gridnet_block_forward.17
= control target key start
LH: loop header
LB: loop body
LE: loop exit
PB: predicated region body
PF: predicated region fallthrough
CT: control target
= control target key end

     0   :  { %s872_s9 = smov 0   ;;  %s969_s0 = inlined_call_operand.vmem [shape: f32[2,4,18,512], index: 0, kind: input, shape index: {}]   ;;  %s970_s1 = inlined_call_operand.vmem [shape: bf16[2,128,512], index: 1, kind: input, shape index: {}]   ;;  %s971_s2 = inlined_call_operand.vmem [shape: f32[2,4,18,128], index: 2, kind: output, shape index: {}]  }
   0x1 LB: > { %s878_s10 = sadd.s32 4294967295, %s849_s9   ;;  %p672_p0 = scmp.ge.s32.totalorder %s849_s9, 1  ;;  %s849_s9 = sphi %s872_s9, %s12_s9  }
   0x2   : > { %p122_p1 = scmp.lt.s32.totalorder %s849_s9, 3 }
   0x4   : > { %p123_p2 = pnand %p672_p0, %p122_p1 }
   0x5   : > { %p149_p3 = scmp.lt.s32.totalorder (!%p123_p2), %s878_s10, 1  ;;  %s899_s24 = smov (!%p123_p2), 0  }
   0x6   : > { %126 = sbr.rel (%p123_p2) target bundleno = 309 (0x135), region = 28 }
   0xb   : > { %v855_v0 = vmov 0.0   ;;  %s150_s11 = scalar_select %p149_p3, %s878_s10, 1 }
   0xc   : > { %165 = vst [vmem:[#allocation2 + $0x10] sm:$0xff] %v855_v0  ;;  %166 = vst [vmem:[#allocation2] sm:$0xff] %v855_v0 }
   0xd   : > { %167 = vst [vmem:[#allocation2 + $0x8] sm:$0x3] %v855_v0  ;;  %168 = vst [vmem:[#allocation3 + $0x8] sm:$0xff] %v855_v0  ;;  %s723_s12 = smul.u32 384, %s150_s11  ;;  %s721_s13 = sshll.u32 %s150_s11, 8 }
   0xe   : > { %169 = vst [vmem:[#allocation3] sm:$0xff] %v855_v0  ;;  %170 = vst [vmem:[#allocation3 + $0x10] sm:$0x3] %v855_v0  ;;  %s887_s16 = scalar_lea.vmem %s970_s1, %s721_s13  ;;  %s724_s17 = smul.u32 96, %s150_s11 }
   0xf   : > { %s892_s20 = scalar_lea.vmem %s969_s0, %s723_s12 }
  0x10   : > { %s897_s23 = scalar_lea.vmem %s971_s2, %s724_s17 }
  0x11 LB: >> { %v743_v1 = vld [vmem:[%s887_s16 + $0xe4] ss:$16 sps:$4 sm:$0xff]   ;;  %v745_v2 = vld [vmem:[%s887_s16 + $0xe0] ss:$16 sps:$4 sm:$0xff]   ;;  %v856_v3 = vmov 0   ;;  %p177_p4 = scmp.eq.s32.totalorder %s878_s10, 0  ;;  %s853_s24 = sphi %s899_s24, %s176_s24  }
  0x12   : >> { %424 = vmatprep.mubr.bf16.mxu0 %v856_v3  ;;  %475 = vmatprep.mubr.bf16.mxu1 %v856_v3  ;;  %v746_v4 = vld [vmem:[%s887_s16 + $0xc4] ss:$16 sps:$4 sm:$0xff]   ;;  %v748_v5 = vld [vmem:[%s887_s16 + $0xc0] ss:$16 sps:$4 sm:$0xff]   ;;  %v754_v7 = vld [vmem:[%s887_s16 + $0xec] ss:$16 sps:$4 sm:$0xff]  }
  0x13   : >> { %392 = vmatprep.subr.bf16.mxu0 %v743_v1  ;;  %v749_v6 = vld [vmem:[%s887_s16 + $0xa4] ss:$16 sps:$4 sm:$0xff]   ;;  %v757_v8 = vld [vmem:[%s887_s16 + $0xe8] ss:$16 sps:$4 sm:$0xff]   ;;  %v751_v9 = vld [vmem:[%s887_s16 + $0xa0] ss:$16 sps:$4 sm:$0xff]   ;;  %443 = vmatprep.subr.bf16.mxu1 %v754_v7 }
  0x14   : >> { %393 = vmatpush1.bf16.msra.mxu0 %v745_v2  ;;  %v752_v10 = vld [vmem:[%s887_s16 + $0x84] ss:$16 sps:$4 sm:$0xff]   ;;  %444 = vmatpush1.bf16.msra.mxu1 %v757_v8  ;;  %v760_v11 = vld [vmem:[%s887_s16 + $0xcc] ss:$16 sps:$4 sm:$0xff]   ;;  %v763_v12 = vld [vmem:[%s887_s16 + $0xc8] ss:$16 sps:$4 sm:$0xff]  }
  0x15   : >> { %394 = vmatprep.subr.bf16.mxu0 %v746_v4  ;;  %445 = vmatprep.subr.bf16.mxu1 %v760_v11  ;;  %v756_v13 = vld [vmem:[%s887_s16 + $0x80] ss:$16 sps:$4 sm:$0xff]   ;;  %v758_v14 = vld [vmem:[%s887_s16 + $0x64] ss:$16 sps:$4 sm:$0xff]   ;;  %v766_v15 = vld [vmem:[%s887_s16 + $0xac] ss:$16 sps:$4 sm:$0xff]  }
  0x16   : >> { %v769_v16 = vld [vmem:[%s887_s16 + $0xa8] ss:$16 sps:$4 sm:$0xff]   ;;  %v772_v17 = vld [vmem:[%s887_s16 + $0x8c] ss:$16 sps:$4 sm:$0xff]   ;;  %v762_v18 = vld [vmem:[%s887_s16 + $0x60] ss:$16 sps:$4 sm:$0xff]  }
  0x17   : >> { %v764_v19 = vld [vmem:[%s887_s16 + $0x44] ss:$16 sps:$4 sm:$0xff]   ;;  %v775_v20 = vld [vmem:[%s887_s16 + $0x88] ss:$16 sps:$4 sm:$0xff]   ;;  %v778_v21 = vld [vmem:[%s887_s16 + $0x6c] ss:$16 sps:$4 sm:$0xff]  }
  0x18   : >> { %395 = vmatpush1.bf16.msra.mxu0 %v748_v5  ;;  %446 = vmatpush1.bf16.msra.mxu1 %v763_v12  ;;  %v768_v22 = vld [vmem:[%s887_s16 + $0x40] ss:$16 sps:$4 sm:$0xff]   ;;  %v770_v23 = vld [vmem:[%s887_s16 + $0x24] ss:$16 sps:$4 sm:$0xff]   ;;  %v781_v24 = vld [vmem:[%s887_s16 + $0x68] ss:$16 sps:$4 sm:$0xff]  }
  0x19   : >> { %396 = vmatprep.subr.bf16.mxu0 %v749_v6  ;;  %447 = vmatprep.subr.bf16.mxu1 %v766_v15  ;;  %v782_v25 = vld [vmem:[%s887_s16 + $0x4c] ss:$16 sps:$4 sm:$0xff]   ;;  %v774_v26 = vld [vmem:[%s887_s16 + $0x20] ss:$16 sps:$4 sm:$0xff]   ;;  %v776_v27 = vld [vmem:[%s887_s16 + $0x4] ss:$16 sps:$4 sm:$0xff]  }
  0x1a   : >> { %v784_v28 = vld [vmem:[%s887_s16 + $0x48] ss:$16 sps:$4 sm:$0xff]   ;;  %v785_v29 = vld [vmem:[%s887_s16 + $0x2c] ss:$16 sps:$4 sm:$0xff]   ;;  %v780_v30 = vld [vmem:[%s887_s16] ss:$16 sps:$4 sm:$0xff]  }
  0x1b   : >> { %v195_v31 = vld [vmem:[#allocation2 + $0x10] sm:$0xff]  ;;  %v196_v32 = vld [vmem:[#allocation2] sm:$0xff]  ;;  %v787_v33 = vld [vmem:[%s887_s16 + $0x28] ss:$16 sps:$4 sm:$0xff]   ;;  %s178_s25 = ssub.s32 3, %s853_s24 }
  0x1c   : >> { %397 = vmatpush1.bf16.msra.mxu0 %v751_v9  ;;  %448 = vmatpush1.bf16.msra.mxu1 %v769_v16  ;;  %v788_v34 = vld [vmem:[%s887_s16 + $0xc] ss:$16 sps:$4 sm:$0xff]   ;;  %v198_v35 = vpack.c.bf16 %v196_v32, %v195_v31  ;;  %v790_v36 = vld [vmem:[%s887_s16 + $0x8] ss:$16 sps:$4 sm:$0xff]   ;;  %s943_s26 = scalar_select %p177_p4, %s853_s24, %s178_s25 }
  0x1d   : >> { %398 = vmatprep.subr.bf16.mxu0 %v752_v10  ;;  %449 = vmatprep.subr.bf16.mxu1 %v772_v17  ;;  %v197_v37 = vld [vmem:[#allocation2 + $0x8] sm:$0x3]  ;;  %s176_s24 = sadd.s32 1, %s853_s24  }
  0x1e   : >> { %v199_v38 = vpack.c.bf16 %v197_v37, %v197_v37  ;;  %s722_s27 = smul.u32 96, %s943_s26  ;;  %p173_p5 = scmp.ge.s32.totalorder %s176_s24, 4  }
  0x1f   : >> { %s587_s29 = smul.u32 24, %s943_s26 }
  0x20   : >> { %399 = vmatpush1.bf16.msra.mxu0 %v756_v13  ;;  %450 = vmatpush1.bf16.msra.mxu1 %v775_v20  ;;  %s947_s28 = scalar_lea.vmem %s892_s20, %s722_s27 }
  0x21   : >> { %400 = vmatprep.subr.bf16.mxu0 %v758_v14  ;;  %451 = vmatprep.subr.bf16.mxu1 %v778_v21  ;;  %v183_v39 = vld [vmem:[%s947_s28] sm:$0xff]  ;;  %v184_v41 = vld [vmem:[%s947_s28 + $0x8] sm:$0xff]  ;;  %v186_v61 = vld [vmem:[%s947_s28 + $0x18] sm:$0xff]  ;;  %s588_s30 = scalar_lea.vmem %s897_s23, %s587_s29 }
  0x22   : >> { %v187_v44 = vld [vmem:[%s947_s28 + $0x20] sm:$0xff]  ;;  %v188_v48 = vld [vmem:[%s947_s28 + $0x28] sm:$0xff]  ;;  %v185_v4 = vld [vmem:[%s947_s28 + $0x10] sm:$0xff] }
  0x23   : >> { %v191_v53 = vld [vmem:[%s947_s28 + $0x40] sm:$0x3]  ;;  %v192_v58 = vld [vmem:[%s947_s28 + $0x48] sm:$0x3]  ;;  %v190_v7 = vld [vmem:[%s947_s28 + $0x38] sm:$0xff] }
  0x24   : >> { %401 = vmatpush1.bf16.msra.mxu0 %v762_v18  ;;  %452 = vmatpush1.bf16.msra.mxu1 %v781_v24  ;;  %v189_v11 = vld [vmem:[%s947_s28 + $0x30] sm:$0xff]  ;;  %v194_v15 = vld [vmem:[%s947_s28 + $0x58] sm:$0x3] }
  0x25   : >> { %402 = vmatprep.subr.bf16.mxu0 %v764_v19  ;;  %453 = vmatprep.subr.bf16.mxu1 %v782_v25  ;;  %v193_v20 = vld [vmem:[%s947_s28 + $0x50] sm:$0x3] }
  0x28   : >> { %403 = vmatpush1.bf16.msra.mxu0 %v768_v22  ;;  %454 = vmatpush1.bf16.msra.mxu1 %v784_v28 }
  0x29   : >> { %404 = vmatprep.subr.bf16.mxu0 %v770_v23  ;;  %455 = vmatprep.subr.bf16.mxu1 %v785_v29 }
  0x2c   : >> { %405 = vmatpush1.bf16.msra.mxu0 %v774_v26  ;;  %456 = vmatpush1.bf16.msra.mxu1 %v787_v33 }
  0x2d   : >> { %406 = vmatprep.subr.bf16.mxu0 %v776_v27  ;;  %457 = vmatprep.subr.bf16.mxu1 %v788_v34 }
  0x30   : >> { %407 = vmatpush1.bf16.msra.mxu0 %v780_v30  ;;  %458 = vmatpush1.bf16.msra.mxu1 %v790_v36 }
  0x33   : >> { %425 = vmatmul.mubr.bf16.vlgmr.msra.gmra.mxu0 %v198_v35  ;;  %476 = vmatmul.mubr.bf16.vlgmr.msra.gmra.mxu1 %v198_v35 }
  0x34   : >> { %434 = vmatprep.mubr.bf16.mxu0 %v856_v3  ;;  %485 = vmatprep.mubr.bf16.mxu1 %v856_v3 }
  0x3b   : >> { %435 = vmatmul.mubr.bf16.gmra.mxu0 %v199_v38  ;;  %486 = vmatmul.mubr.bf16.gmra.mxu1 %v199_v38 }
  0xf3   : >> { %v426_v40 = vpop.f32.mrf.mxu0  ;;  %v477_v51 = vpop.f32.mrf.mxu1 }
  0xf4   : >> { %v494_v42 = vadd.f32 %v426_v40, %v183_v39  ;;  %v496_v10 = vadd.f32 %v477_v51, %v185_v4  ;;  %v563_v39 = vld [vmem:[#allocation3 + $0x8] sm:$0xff] }
  0xf5   : >> { %v428_v43 = vpop.f32.mrf.mxu0  ;;  %v479_v56 = vpop.f32.mrf.mxu1 }
  0xf6   : >> { %v710_v45 = vmul.f32 -1.442695, %v494_v42  ;;  %v495_v46 = vadd.f32 %v428_v43, %v184_v41  ;;  %v497_v5 = vadd.f32 %v479_v56, %v186_v61  ;;  %v565_v56 = vld [vmem:[#allocation3 + $0x10] sm:$0x3] }
  0xf7   : >> { %v430_v47 = vpop.f32.mrf.mxu0  ;;  %v481_v62 = vpop.f32.mrf.mxu1 }
  0xf8   : >> { %791 = vpow2.f32 %v710_v45  ;;  %v713_v49 = vmul.f32 -1.442695, %v495_v46  ;;  %v498_v50 = vadd.f32 %v430_v47, %v187_v44  ;;  %v716_v13 = vmul.f32 -1.442695, %v497_v5  ;;  %v564_v47 = vld [vmem:[#allocation3] sm:$0xff] }
  0xf9   : >> { %v432_v52 = vpop.f32.mrf.mxu0  ;;  %v483_v2 = vpop.f32.mrf.mxu1  ;;  %v500_v18 = vadd.f32 %v481_v62, %v189_v11 }
  0xfa   : >> { %793 = vpow2.f32 %v713_v49  ;;  %v711_v54 = vmul.f32 -1.442695, %v498_v50  ;;  %v499_v55 = vadd.f32 %v432_v52, %v188_v48  ;;  %v501_v14 = vadd.f32 %v483_v2, %v190_v7 }
  0xfb   : >> { %v436_v57 = vpop.f32.mrf.mxu0  ;;  %v487_v8 = vpop.f32.mrf.mxu1 }
  0xfc   : >> { %795 = vpow2.f32 %v711_v54  ;;  %v714_v59 = vmul.f32 -1.442695, %v499_v55  ;;  %v502_v60 = vadd.f32 %v436_v57, %v191_v53  ;;  %v717_v23 = vmul.f32 -1.442695, %v501_v14 }
  0xfd   : >> { %v438_v63 = vpop.f32.mrf.mxu0  ;;  %v489_v12 = vpop.f32.mrf.mxu1  ;;  %v504_v27 = vadd.f32 %v487_v8, %v193_v20 }
  0xfe   : >> { %797 = vpow2.f32 %v714_v59  ;;  %v712_v0 = vmul.f32 -1.442695, %v502_v60  ;;  %v503_v1 = vadd.f32 %v438_v63, %v192_v58  ;;  %v505_v24 = vadd.f32 %v489_v12, %v194_v15 }
  0xff   : >> { %v440_v3 = vpop.f32.mrf.mxu0  ;;  %v491_v16 = vpop.f32.mrf.mxu1 }
 0x100   : >> { %799 = vpow2.f32 %v712_v0  ;;  %v715_v6 = vmul.f32 -1.442695, %v503_v1  ;;  %v718_v30 = vmul.f32 -1.442695, %v505_v24 }
 0x101   : >> { %v441_v9 = vpop.f32.mrf.mxu0  ;;  %v492_v21 = vpop.f32.mrf.mxu1 }
 0x102   : >> { %801 = vpow2.f32 %v715_v6 }
 0x103   : >> { %803 = vtanh.f32 %v496_v10 }
 0x104   : >> { %805 = vpow2.f32 %v716_v13 }
 0x105   : >> { %v792_v17 = vpop.eup %791 }
 0x106   : >> { %v515_v19 = vadd.f32 1.0, %v792_v17 }
 0x107   : >> { %v794_v22 = vpop.eup %793 }
 0x108   : >> { %807 = vrcp.f32 %v515_v19  ;;  %v533_v25 = vadd.f32 1.0, %v794_v22 }
 0x109   : >> { %v796_v26 = vpop.eup %795  ;;  %809 = vtanh.f32 %v500_v18 }
 0x10a   : >> { %811 = vrcp.f32 %v533_v25  ;;  %v516_v28 = vadd.f32 1.0, %v796_v26 }
 0x10b   : >> { %v798_v29 = vpop.eup %797  ;;  %813 = vpow2.f32 %v717_v23 }
 0x10c   : >> { %815 = vrcp.f32 %v516_v28  ;;  %v534_v31 = vadd.f32 1.0, %v798_v29 }
 0x10d   : >> { %v800_v32 = vpop.eup %799  ;;  %817 = vtanh.f32 %v504_v27 }
 0x10e   : >> { %819 = vrcp.f32 %v534_v31  ;;  %v517_v33 = vadd.f32 1.0, %v800_v32 }
 0x10f   : >> { %v802_v34 = vpop.eup %801  ;;  %821 = vpow2.f32 %v718_v30 }
 0x110   : >> { %823 = vrcp.f32 %v517_v33  ;;  %v535_v35 = vadd.f32 1.0, %v802_v34  ;;  %v804_v36 = vpop.eup %803 }
 0x111   : >> { %v806_v37 = vpop.eup %805 }
 0x112   : >> { %825 = vrcp.f32 %v535_v35  ;;  %v554_v42 = vadd.f32 1.0, %v806_v37 }
 0x114   : >> { %827 = vrcp.f32 %v554_v42 }
 0x115   : >> { %v808_v38 = vpop.eup %807 }
 0x116   : >> { %v810_v40 = vpop.eup %809  ;;  %v569_v45 = vmul.f32 %v808_v38, %v804_v36 }
 0x117   : >> { %v812_v41 = vpop.eup %811 }
 0x118   : >> { %v814_v43 = vpop.eup %813  ;;  %v566_v44 = vmul.f32 %v812_v41, %v563_v39 }
 0x119   : >> { %v816_v46 = vpop.eup %815  ;;  %v555_v51 = vadd.f32 1.0, %v814_v43 }
 0x11a   : >> { %v818_v48 = vpop.eup %817  ;;  %v572_v49 = vadd.f32 %v569_v45, %v566_v44  ;;  %v570_v54 = vmul.f32 %v816_v46, %v810_v40 }
 0x11b   : >> { %v820_v50 = vpop.eup %819 }
 0x11c   : >> { %v822_v52 = vpop.eup %821  ;;  %829 = vtanh.f32 %v572_v49  ;;  %581 = vst [vmem:[#allocation3 + $0x8] sm:$0xff] %v572_v49  ;;  %v567_v53 = vmul.f32 %v820_v50, %v564_v47 }
 0x11d   : >> { %v824_v55 = vpop.eup %823  ;;  %831 = vrcp.f32 %v555_v51  ;;  %v556_v59 = vadd.f32 1.0, %v822_v52 }
 0x11e   : >> { %v573_v57 = vadd.f32 %v570_v54, %v567_v53  ;;  %v571_v61 = vmul.f32 %v824_v55, %v818_v48 }
 0x11f   : >> { %v826_v58 = vpop.eup %825 }
 0x120   : >> { %833 = vtanh.f32 %v573_v57  ;;  %582 = vst [vmem:[#allocation3] sm:$0xff] %v573_v57  ;;  %v568_v60 = vmul.f32 %v826_v58, %v565_v56 }
 0x121   : >> { %835 = vrcp.f32 %v556_v59  ;;  %v828_v63 = vpop.eup %827 }
 0x122   : >> { %v574_v62 = vadd.f32 %v571_v61, %v568_v60 }
 0x124   : >> { %837 = vtanh.f32 %v574_v62  ;;  %583 = vst [vmem:[#allocation3 + $0x10] sm:$0x3] %v574_v62 }
 0x129   : >> { %v830_v0 = vpop.eup %829 }
 0x12a   : >> { %v578_v1 = vmul.f32 %v830_v0, %v828_v63  ;;  %v832_v2 = vpop.eup %831 }
 0x12c   : >> { %584 = vst [vmem:[#allocation2 + $0x10] sm:$0xff] %v578_v1  ;;  %589 = vst [vmem:[%s588_s30] sm:$0xff] %v578_v1 }
 0x12d   : >> { %v834_v3 = vpop.eup %833 }
 0x12e   : >> { %v579_v4 = vmul.f32 %v834_v3, %v832_v2  ;;  %v836_v5 = vpop.eup %835 }
 0x130   : >> { %585 = vst [vmem:[#allocation2] sm:$0xff] %v579_v4  ;;  %590 = vst [vmem:[%s588_s30 + $0x8] sm:$0xff] %v579_v4  ;;  %175 = sbr.rel (!%p173_p5) target bundleno = 17 (0x11), region = 70 }
 0x131   : >> { %v838_v6 = vpop.eup %837 }
 0x132   : >> { %v580_v7 = vmul.f32 %v838_v6, %v836_v5 }
 0x134   : >> { %586 = vst [vmem:[#allocation2 + $0x8] sm:$0x3] %v580_v7  ;;  %591 = vst [vmem:[%s588_s30 + $0x10] sm:$0x3] %v580_v7 }
 0x135 PF: > { %s12_s9 = sadd.s32 1, %s849_s9  }
 0x136   : > { %p9_p6 = scmp.ge.s32.totalorder %s12_s9, 4  }
 0x138   :  { %11 = sbr.rel (!%p9_p6) target bundleno = 1 (0x1), region = 81 }

// kernel: gridnet_block_forward.18
= control target key start
LH: loop header
LB: loop body
LE: loop exit
PB: predicated region body
PF: predicated region fallthrough
CT: control target
= control target key end

     0   :  { %vm268_vm0 = vcmask 195584   ;;  %s526_s1 = inlined_call_operand.vmem [shape: bf16[256,24], index: 1, kind: input, shape index: {}]   ;;  %s527_s0 = inlined_call_operand.vmem [shape: bf16[72,256], index: 0, kind: input, shape index: {}]   ;;  %s528_s2 = inlined_call_operand.vmem [shape: f32[72,24], index: 2, kind: output, shape index: {}]  }
   0x1   :  { %v370_v0 = vld [vmem:[%s526_s1 + $0x78] sm:$0xff]   ;;  %v372_v2 = vld [vmem:[%s526_s1 + $0x70] sm:$0xff]   ;;  %v374_v4 = vld [vmem:[%s526_s1 + $0x68] sm:$0xff]  }
   0x2   :  { %v371_v1 = vld [vmem:[%s526_s1 + $0x38] sm:$0xff]   ;;  %308 = vmatprep.subr.bf16.mxu0 %v370_v0  ;;  %354 = vmatprep.subr.bf16.mxu1 %v370_v0  ;;  %v373_v3 = vld [vmem:[%s526_s1 + $0x30] sm:$0xff]   ;;  %v375_v5 = vld [vmem:[%s526_s1 + $0x28] sm:$0xff]  }
   0x3   :  { %309 = vmatpush3.bf16.msra.mxu0 %v371_v1  ;;  %362 = vmatpush3.bf16.msra.mxu1 %v371_v1  ;;  %v376_v6 = vld [vmem:[%s526_s1 + $0x60] sm:$0xff]   ;;  %v378_v8 = vld [vmem:[%s526_s1 + $0x58] sm:$0xff]   ;;  %v380_v10 = vld [vmem:[%s526_s1 + $0x50] sm:$0xff]  }
   0x4   :  { %310 = vmatprep.subr.bf16.mxu0 %v372_v2  ;;  %355 = vmatprep.subr.bf16.mxu1 %v372_v2  ;;  %v377_v7 = vld [vmem:[%s526_s1 + $0x20] sm:$0xff]   ;;  %v379_v9 = vld [vmem:[%s526_s1 + $0x18] sm:$0xff]   ;;  %v381_v13 = vld [vmem:[%s526_s1 + $0x10] sm:$0xff]  }
   0x5   :  { %v388_v11 = vld [vmem:[%s527_s0 + $0x4] ss:$8 sps:$4 sm:$0xff]   ;;  %v391_v12 = vld [vmem:[%s527_s0 + $0x34] ss:$8 sps:$4 sm:$0xff]   ;;  %v386_v19 = vld [vmem:[%s527_s0] ss:$8 sps:$4 sm:$0xff]  }
   0x6   :  { %v382_v14 = vld [vmem:[%s526_s1 + $0x48] sm:$0xff]   ;;  %228 = vmatprep.mubr.bf16.mxu0 %v388_v11  ;;  %252 = vmatprep.mubr.bf16.mxu1 %v391_v12  ;;  %v384_v16 = vld [vmem:[%s526_s1 + $0x40] sm:$0xff]   ;;  %v389_v20 = vld [vmem:[%s527_s0 + $0x30] ss:$8 sps:$4 sm:$0xff]  }
   0x7   :  { %311 = vmatpush3.bf16.msra.mxu0 %v373_v3  ;;  %363 = vmatpush3.bf16.msra.mxu1 %v373_v3  ;;  %v383_v15 = vld [vmem:[%s526_s1 + $0x8] sm:$0xff]   ;;  %v385_v17 = vld [vmem:[%s526_s1] sm:$0xff]   ;;  %v392_v21 = vld [vmem:[%s527_s0 + $0x14] ss:$8 sps:$4 sm:$0xff]  }
   0x8   :  { %312 = vmatprep.subr.bf16.mxu0 %v374_v4  ;;  %356 = vmatprep.subr.bf16.mxu1 %v374_v4  ;;  %v20_v18 = vld [vmem:[%s527_s0 + $0x40] sm:$0xff]  ;;  %v394_v23 = vld [vmem:[%s527_s0 + $0x10] ss:$8 sps:$4 sm:$0xff]  }
   0x9   :  { %v291_v22 = vcombine.high %v20_v18, %v20_v18  ;;  %v290_v24 = vcombine.low %v20_v18, %v20_v18  ;;  %v397_v25 = vld [vmem:[%s527_s0 + $0x24] ss:$8 sps:$4 sm:$0xff]   ;;  %v399_v26 = vld [vmem:[%s527_s0 + $0x20] ss:$8 sps:$4 sm:$0xff]  }
   0xb   :  { %313 = vmatpush3.bf16.msra.mxu0 %v375_v5  ;;  %364 = vmatpush3.bf16.msra.mxu1 %v375_v5 }
   0xc   :  { %314 = vmatprep.subr.bf16.mxu0 %v376_v6  ;;  %357 = vmatprep.subr.bf16.mxu1 %v376_v6 }
   0xf   :  { %315 = vmatpush3.bf16.msra.mxu0 %v377_v7  ;;  %365 = vmatpush3.bf16.msra.mxu1 %v377_v7 }
  0x10   :  { %316 = vmatprep.subr.bf16.mxu0 %v378_v8  ;;  %358 = vmatprep.subr.bf16.mxu1 %v378_v8 }
  0x13   :  { %317 = vmatpush3.bf16.msra.mxu0 %v379_v9  ;;  %366 = vmatpush3.bf16.msra.mxu1 %v379_v9 }
  0x14   :  { %318 = vmatprep.subr.bf16.mxu0 %v380_v10  ;;  %359 = vmatprep.subr.bf16.mxu1 %v380_v10 }
  0x17   :  { %319 = vmatpush3.bf16.msra.mxu0 %v381_v13  ;;  %367 = vmatpush3.bf16.msra.mxu1 %v381_v13 }
  0x18   :  { %320 = vmatprep.subr.bf16.mxu0 %v382_v14  ;;  %360 = vmatprep.subr.bf16.mxu1 %v382_v14 }
  0x1b   :  { %321 = vmatpush3.bf16.msra.mxu0 %v383_v15  ;;  %368 = vmatpush3.bf16.msra.mxu1 %v383_v15 }
  0x1c   :  { %322 = vmatprep.subr.bf16.mxu0 %v384_v16  ;;  %361 = vmatprep.subr.bf16.mxu1 %v384_v16 }
  0x1f   :  { %323 = vmatpush3.bf16.msra.mxu0 %v385_v17  ;;  %369 = vmatpush3.bf16.msra.mxu1 %v385_v17 }
  0x22   :  { %229 = vmatmul.mubr.bf16.vlgmr.msra.gmra.mxu0 %v386_v19  ;;  %253 = vmatmul.mubr.bf16.vlgmr.msra.gmra.mxu1 %v389_v20 }
  0x23   :  { %236 = vmatprep.mubr.bf16.mxu0 %v392_v21  ;;  %260 = vmatprep.mubr.bf16.mxu1 %v291_v22 }
  0x2a   :  { %237 = vmatmul.mubr.bf16.gmra.mxu0 %v394_v23  ;;  %261 = vmatmul.mubr.bf16.gmra.mxu1 %v290_v24 }
  0x2b   :  { %244 = vmatprep.mubr.bf16.mxu0 %v397_v25 }
  0x32   :  { %245 = vmatmul.mubr.bf16.gmra.mxu0 %v399_v26 }
  0xe2   :  { %v324_v27 = vpop.f32.mrf.mxu0  ;;  %v342_v28 = vpop.f32.mrf.mxu1 }
  0xe4   :  { %v325_v29 = vpop.f32.mrf.mxu0  ;;  %v343_v30 = vpop.f32.mrf.mxu1 }
  0xe5   :  { %v326_v31 = vadd.f32 %v325_v29, %v324_v27  ;;  %v344_v32 = vadd.f32 %v343_v30, %v342_v28 }
  0xe6   :  { %v327_v33 = vpop.f32.mrf.mxu0  ;;  %v345_v34 = vpop.f32.mrf.mxu1 }
  0xe7   :  { %269 = vst.msk [vmem:[%s528_s2] sm:$0xff] %vm268_vm0, %v326_v31  ;;  %275 = vst.msk [vmem:[%s528_s2 + $0x30] sm:$0xff] %vm268_vm0, %v344_v32 }
  0xe8   :  { %v328_v35 = vpop.f32.mrf.mxu0  ;;  %v346_v36 = vpop.f32.mrf.mxu1 }
  0xe9   :  { %v329_v37 = vadd.f32 %v328_v35, %v327_v33  ;;  %v347_v38 = vadd.f32 %v346_v36, %v345_v34 }
  0xea   :  { %v330_v39 = vpop.f32.mrf.mxu0  ;;  %v348_v40 = vpop.f32.mrf.mxu1 }
  0xeb   :  { %270 = vst.msk [vmem:[%s528_s2 + $0x8] sm:$0xff] %vm268_vm0, %v329_v37  ;;  %276 = vst.msk [vmem:[%s528_s2 + $0x38] sm:$0xff] %vm268_vm0, %v347_v38 }
  0xec   :  { %v331_v41 = vpop.f32.mrf.mxu0  ;;  %v349_v42 = vpop.f32.mrf.mxu1 }
  0xed   :  { %v332_v43 = vadd.f32 %v331_v41, %v330_v39  ;;  %v350_v44 = vadd.f32 %v349_v42, %v348_v40 }
  0xee   :  { %v333_v45 = vpop.f32.mrf.mxu0  ;;  %v351_v46 = vpop.f32.mrf.mxu1 }
  0xef   :  { %271 = vst.msk [vmem:[%s528_s2 + $0x10] sm:$0xff] %vm268_vm0, %v332_v43  ;;  %277 = vst.msk [vmem:[%s528_s2 + $0x40] sm:$0xff] %vm268_vm0, %v350_v44 }
  0xf0   :  { %v334_v47 = vpop.f32.mrf.mxu0  ;;  %v352_v48 = vpop.f32.mrf.mxu1 }
  0xf1   :  { %v335_v49 = vadd.f32 %v334_v47, %v333_v45 }
  0xf2   :  { %v336_v50 = vpop.f32.mrf.mxu0 }
  0xf3   :  { %272 = vst.msk [vmem:[%s528_s2 + $0x18] sm:$0xff] %vm268_vm0, %v335_v49 }
  0xf4   :  { %v337_v51 = vpop.f32.mrf.mxu0 }
  0xf5   :  { %v338_v52 = vadd.f32 %v337_v51, %v336_v50 }
  0xf6   :  { %v339_v53 = vpop.f32.mrf.mxu0 }
  0xf7   :  { %273 = vst.msk [vmem:[%s528_s2 + $0x20] sm:$0xff] %vm268_vm0, %v338_v52 }
  0xf8   :  { %v340_v54 = vpop.f32.mrf.mxu0 }
  0xf9   :  { %v341_v55 = vadd.f32 %v340_v54, %v339_v53 }
  0xfb   :  { %274 = vst.msk [vmem:[%s528_s2 + $0x28] sm:$0xff] %vm268_vm0, %v341_v55 }

// kernel: gridnet_block_forward.23
= control target key start
LH: loop header
LB: loop body
LE: loop exit
PB: predicated region body
PF: predicated region fallthrough
CT: control target
= control target key end

     0   :  { %vm114_vm0 = vcmask 1043456   ;;  %v434_v0 = vmov 0.0   ;;  %vm435_vm1 = vmmov 0   ;;  %vm86_vm2 = vcmask 64512   ;;  %s599_s1 = inlined_call_operand.vmem [shape: bf16[8,72], index: 1, kind: input, shape index: {}]   ;;  %s600_s0 = inlined_call_operand.vmem [shape: bf16[144,8], index: 0, kind: input, shape index: {}]   ;;  %s601_s2 = inlined_call_operand.vmem [shape: f32[1,72], index: 2, kind: input, shape index: {}]   ;;  %s602_s3 = inlined_call_operand.vmem [shape: bf16[144,72], index: 3, kind: output, shape index: {}]  }
   0x1   :  { %383 = vmatprep.subr.bf16.mxu0 %v434_v0  ;;  %v33_v1 = vld [vmem:[%s599_s1] sm:$0xf]  ;;  %421 = vmatprep.subr.bf16.mxu1 %v434_v0  ;;  %v426_v4 = vld [vmem:[%s600_s0 + $0x28] sm:$0xff]   ;;  %v428_v6 = vld [vmem:[%s600_s0 + $0x30] sm:$0xff]   ;;  %vm295_vm3 = vcmask 584704  }
   0x2   :  { %v116_v2 = vsel %vm114_vm0, %v33_v1, 0  ;;  %385 = vmatprep.mubr.msk.bf16.mxu0 %vm435_vm1, %v434_v0  ;;  %v425_v3 = vld [vmem:[%s600_s0] sm:$0xff]   ;;  %405 = vmatprep.mubr.msk.bf16.mxu1 %vm435_vm1, %v434_v0  ;;  %v427_v5 = vld [vmem:[%s600_s0 + $0x8] sm:$0xff]   ;;  %v429_v7 = vld [vmem:[%s600_s0 + $0x10] sm:$0xff]  }
   0x3   :  { %384 = vmatpush3.bf16.msra.mxu0 %v116_v2  ;;  %422 = vmatpush3.bf16.msra.mxu1 %v116_v2  ;;  %v430_v8 = vld [vmem:[%s600_s0 + $0x38] sm:$0xff]   ;;  %v432_v10 = vld [vmem:[%s600_s0 + $0x40] sm:$0xff]  }
   0x4   :  { %v431_v9 = vld [vmem:[%s600_s0 + $0x18] sm:$0xff]   ;;  %v433_v11 = vld [vmem:[%s600_s0 + $0x20] sm:$0xff]  }
   0x5   :  { %v507_v12 = vld [vmem:[%s601_s2] ss:$0 sm:$0xff] }
   0x6   :  { %386 = vmatmul.mubr.msk.bf16.vlgmr.msra.gmra.mxu0 %vm86_vm2, %v425_v3  ;;  %406 = vmatmul.mubr.msk.bf16.vlgmr.msra.gmra.mxu1 %vm86_vm2, %v426_v4 }
   0x7   :  { %389 = vmatprep.mubr.msk.bf16.mxu0 %vm435_vm1, %v434_v0  ;;  %409 = vmatprep.mubr.msk.bf16.mxu1 %vm435_vm1, %v434_v0 }
   0xe   :  { %390 = vmatmul.mubr.msk.bf16.gmra.mxu0 %vm86_vm2, %v427_v5  ;;  %410 = vmatmul.mubr.msk.bf16.gmra.mxu1 %vm86_vm2, %v428_v6 }
   0xf   :  { %393 = vmatprep.mubr.msk.bf16.mxu0 %vm435_vm1, %v434_v0  ;;  %413 = vmatprep.mubr.msk.bf16.mxu1 %vm435_vm1, %v434_v0 }
  0x16   :  { %394 = vmatmul.mubr.msk.bf16.gmra.mxu0 %vm86_vm2, %v429_v7  ;;  %414 = vmatmul.mubr.msk.bf16.gmra.mxu1 %vm86_vm2, %v430_v8 }
  0x17   :  { %397 = vmatprep.mubr.msk.bf16.mxu0 %vm435_vm1, %v434_v0  ;;  %417 = vmatprep.mubr.msk.bf16.mxu1 %vm435_vm1, %v434_v0 }
  0x1e   :  { %398 = vmatmul.mubr.msk.bf16.gmra.mxu0 %vm86_vm2, %v431_v9  ;;  %418 = vmatmul.mubr.msk.bf16.gmra.mxu1 %vm86_vm2, %v432_v10 }
  0x1f   :  { %401 = vmatprep.mubr.msk.bf16.mxu0 %vm435_vm1, %v434_v0 }
  0x26   :  { %402 = vmatmul.mubr.msk.bf16.gmra.mxu0 %vm86_vm2, %v433_v11 }
  0xc6   :  { %v152_v13 = vpop.f32.mrf.mxu0  ;;  %v192_v14 = vpop.f32.mrf.mxu1 }
  0xc7   :  { %v153_v15 = vadd.f32 %v507_v12, %v152_v13  ;;  %v193_v16 = vadd.f32 %v507_v12, %v192_v14 }
  0xc8   :  { %v387_v17 = vpop.f32.mrf.mxu0  ;;  %v407_v18 = vpop.f32.mrf.mxu1 }
  0xc9   :  { %v355_v19 = vpack.c.bf16 %v153_v15, %v153_v15  ;;  %v365_v20 = vpack.c.bf16 %v193_v16, %v193_v16 }
  0xca   :  { %v155_v21 = vpop.f32.mrf.mxu0  ;;  %v195_v22 = vpop.f32.mrf.mxu1 }
  0xcb   :  { %296 = vst.msk [vmem:[%s602_s3] sm:$0xf] %vm295_vm3, %v355_v19  ;;  %306 = vst.msk [vmem:[%s602_s3 + $0x28] sm:$0xf] %vm295_vm3, %v365_v20  ;;  %v156_v23 = vadd.f32 %v507_v12, %v155_v21  ;;  %v196_v24 = vadd.f32 %v507_v12, %v195_v22 }
  0xcc   :  { %v388_v25 = vpop.f32.mrf.mxu0  ;;  %v408_v26 = vpop.f32.mrf.mxu1 }
  0xcd   :  { %v356_v27 = vpack.c.bf16 %v156_v23, %v156_v23  ;;  %v366_v28 = vpack.c.bf16 %v196_v24, %v196_v24 }
  0xce   :  { %v160_v29 = vpop.f32.mrf.mxu0  ;;  %v200_v30 = vpop.f32.mrf.mxu1 }
  0xcf   :  { %297 = vst.msk [vmem:[%s602_s3 + $0x4] sm:$0xf] %vm295_vm3, %v356_v27  ;;  %307 = vst.msk [vmem:[%s602_s3 + $0x2c] sm:$0xf] %vm295_vm3, %v366_v28  ;;  %v161_v31 = vadd.f32 %v507_v12, %v160_v29  ;;  %v201_v32 = vadd.f32 %v507_v12, %v200_v30 }
  0xd0   :  { %v391_v33 = vpop.f32.mrf.mxu0  ;;  %v411_v34 = vpop.f32.mrf.mxu1 }
  0xd1   :  { %v357_v35 = vpack.c.bf16 %v161_v31, %v161_v31  ;;  %v367_v36 = vpack.c.bf16 %v201_v32, %v201_v32 }
  0xd2   :  { %v163_v37 = vpop.f32.mrf.mxu0  ;;  %v203_v38 = vpop.f32.mrf.mxu1 }
  0xd3   :  { %298 = vst.msk [vmem:[%s602_s3 + $0x8] sm:$0xf] %vm295_vm3, %v357_v35  ;;  %308 = vst.msk [vmem:[%s602_s3 + $0x30] sm:$0xf] %vm295_vm3, %v367_v36  ;;  %v164_v39 = vadd.f32 %v507_v12, %v163_v37  ;;  %v204_v40 = vadd.f32 %v507_v12, %v203_v38 }
  0xd4   :  { %v392_v41 = vpop.f32.mrf.mxu0  ;;  %v412_v42 = vpop.f32.mrf.mxu1 }
  0xd5   :  { %v358_v43 = vpack.c.bf16 %v164_v39, %v164_v39  ;;  %v368_v44 = vpack.c.bf16 %v204_v40, %v204_v40 }
  0xd6   :  { %v168_v45 = vpop.f32.mrf.mxu0  ;;  %v208_v46 = vpop.f32.mrf.mxu1 }
  0xd7   :  { %299 = vst.msk [vmem:[%s602_s3 + $0xc] sm:$0xf] %vm295_vm3, %v358_v43  ;;  %309 = vst.msk [vmem:[%s602_s3 + $0x34] sm:$0xf] %vm295_vm3, %v368_v44  ;;  %v169_v47 = vadd.f32 %v507_v12, %v168_v45  ;;  %v209_v48 = vadd.f32 %v507_v12, %v208_v46 }
  0xd8   :  { %v395_v49 = vpop.f32.mrf.mxu0  ;;  %v415_v50 = vpop.f32.mrf.mxu1 }
  0xd9   :  { %v359_v51 = vpack.c.bf16 %v169_v47, %v169_v47  ;;  %v369_v52 = vpack.c.bf16 %v209_v48, %v209_v48 }
  0xda   :  { %v171_v53 = vpop.f32.mrf.mxu0  ;;  %v211_v54 = vpop.f32.mrf.mxu1 }
  0xdb   :  { %300 = vst.msk [vmem:[%s602_s3 + $0x10] sm:$0xf] %vm295_vm3, %v359_v51  ;;  %310 = vst.msk [vmem:[%s602_s3 + $0x38] sm:$0xf] %vm295_vm3, %v369_v52  ;;  %v172_v55 = vadd.f32 %v507_v12, %v171_v53  ;;  %v212_v56 = vadd.f32 %v507_v12, %v211_v54 }
  0xdc   :  { %v396_v57 = vpop.f32.mrf.mxu0  ;;  %v416_v58 = vpop.f32.mrf.mxu1 }
  0xdd   :  { %v360_v59 = vpack.c.bf16 %v172_v55, %v172_v55  ;;  %v370_v60 = vpack.c.bf16 %v212_v56, %v212_v56 }
  0xde   :  { %v176_v61 = vpop.f32.mrf.mxu0  ;;  %v216_v62 = vpop.f32.mrf.mxu1 }
  0xdf   :  { %301 = vst.msk [vmem:[%s602_s3 + $0x14] sm:$0xf] %vm295_vm3, %v360_v59  ;;  %311 = vst.msk [vmem:[%s602_s3 + $0x3c] sm:$0xf] %vm295_vm3, %v370_v60  ;;  %v177_v63 = vadd.f32 %v507_v12, %v176_v61  ;;  %v217_v0 = vadd.f32 %v507_v12, %v216_v62 }
  0xe0   :  { %v399_v1 = vpop.f32.mrf.mxu0  ;;  %v419_v2 = vpop.f32.mrf.mxu1 }
  0xe1   :  { %v361_v3 = vpack.c.bf16 %v177_v63, %v177_v63  ;;  %v371_v4 = vpack.c.bf16 %v217_v0, %v217_v0 }
  0xe2   :  { %v179_v5 = vpop.f32.mrf.mxu0  ;;  %v219_v6 = vpop.f32.mrf.mxu1 }
  0xe3   :  { %302 = vst.msk [vmem:[%s602_s3 + $0x18] sm:$0xf] %vm295_vm3, %v361_v3  ;;  %312 = vst.msk [vmem:[%s602_s3 + $0x40] sm:$0xf] %vm295_vm3, %v371_v4  ;;  %v180_v7 = vadd.f32 %v507_v12, %v179_v5  ;;  %v220_v8 = vadd.f32 %v507_v12, %v219_v6 }
  0xe4   :  { %v400_v9 = vpop.f32.mrf.mxu0  ;;  %v420_v10 = vpop.f32.mrf.mxu1 }
  0xe5   :  { %v362_v11 = vpack.c.bf16 %v180_v7, %v180_v7  ;;  %v372_v13 = vpack.c.bf16 %v220_v8, %v220_v8 }
  0xe6   :  { %v184_v14 = vpop.f32.mrf.mxu0 }
  0xe7   :  { %303 = vst.msk [vmem:[%s602_s3 + $0x1c] sm:$0xf] %vm295_vm3, %v362_v11  ;;  %313 = vst.msk [vmem:[%s602_s3 + $0x44] sm:$0xf] %vm295_vm3, %v372_v13  ;;  %v185_v15 = vadd.f32 %v507_v12, %v184_v14 }
  0xe8   :  { %v403_v16 = vpop.f32.mrf.mxu0 }
  0xe9   :  { %v363_v17 = vpack.c.bf16 %v185_v15, %v185_v15 }
  0xea   :  { %v187_v18 = vpop.f32.mrf.mxu0 }
  0xeb   :  { %304 = vst.msk [vmem:[%s602_s3 + $0x20] sm:$0xf] %vm295_vm3, %v363_v17  ;;  %v188_v19 = vadd.f32 %v507_v12, %v187_v18 }
  0xec   :  { %v404_v20 = vpop.f32.mrf.mxu0 }
  0xed   :  { %v364_v21 = vpack.c.bf16 %v188_v19, %v188_v19 }
  0xef   :  { %305 = vst.msk [vmem:[%s602_s3 + $0x24] sm:$0xf] %vm295_vm3, %v364_v21 }

// kernel: gridnet_block_forward.24
= control target key start
LH: loop header
LB: loop body
LE: loop exit
PB: predicated region body
PF: predicated region fallthrough
CT: control target
= control target key end

     0   :  { %9 = vsyncpa [#allocation3], 0  ;;  %s630_s15 = smov 0   ;;  %s632_s16 = smov 0   ;;  %s711_s0 = inlined_call_operand.vmem [shape: f32[4], index: 0, kind: input, shape index: {}]   ;;  %s712_s1 = inlined_call_operand.vmem [shape: bf16[4,18,64], index: 1, kind: input, shape index: {}]   ;;  %s713_s2 = inlined_call_operand.vmem [shape: f32[4,1,64], index: 2, kind: input, shape index: {}]   ;;  %s714_s3 = inlined_call_operand.vmem [shape: f32[4,1,64], index: 3, kind: input, shape index: {}]   ;;  %s715_s4 = inlined_call_operand.vmem [shape: bf16[4,18,64], index: 4, kind: output, shape index: {}]  }
   0x1   :  { %s634_s17 = smov 0  }
   0x2 LB: > { %s496_s18 = sadd.s32 4294967295, %s602_s17   ;;  %s27_s19 = sadd.s32 1, %s598_s16  ;;  %s602_s17 = sphi %s634_s17, %s15_s17   ;;  %s598_s16 = sphi %s632_s16, %s719_s16   ;;  %s594_s15 = sphi %s630_s15, %s718_s15  }
   0x3   : > { %p29_p0 = scmp.ge.s32.totalorder %s27_s19, 4  ;;  %p498_p1 = scmp.ge.s32.totalorder %s602_s17, 1 }
   0x4   : > { %p161_p2 = scmp.lt.s32.totalorder %s602_s17, 5  ;;  %p655_p4 = scmp.eq.s32.totalorder %s496_s18, 0 }
   0x5   : > { %s721_s19 = smov (%p29_p0, %s27_s19), 0  ;;  %s174_s24 = sshll.u32 %s711_s0, 4  ;;  %s175_s24 = int_to_ptr.vmem [resolvable:$true] %s174_s24 }
   0x6   : > { %p651_p3 = pnand %p498_p1, %p161_p2  ;;  %s561_s25 = scalar_lea.vmem %s175_s24, 16 }
   0x7   : > { %p562_p7 = scmp.ne.s32.totalorder %s175_s24, %s561_s25  ;;  %p569_p11 = scmp.lt.s32.totalorder %s175_s24, %s175_s24 }
   0x8   : > { %p524_p5 = pneg %p651_p3  ;;  %p570_p12 = scmp.lt.s32.totalorder %s561_s25, %s561_s25 }
   0xa   : > { %p525_p6 = pnand %p655_p4, %p524_p5  ;;  %p571_p13 = por %p570_p12, %p569_p11 }
   0xc   : > { %p563_p8 = pneg %p525_p6 }
   0xe   : > { %p564_p9 = pnand %p563_p8, %p562_p7 }
  0x10   : > { %p565_p10 = pneg %p564_p9 }
  0x12   : > { %p572_p0 = pnand %p571_p13, %p565_p10 }
  0x14   : > { %575 = shalt.err (!%p572_p0)
}
  0x15   : > { %s604_s26 = smov [#allocation2]   ;;  %212 = sbr.rel (%p651_p3) target bundleno = 359 (0x167), region = 36 }
  0x16   : > { %527 = dma.vmem_to_smem (!%p525_p6), %s175_s24, 16, %s604_s26, [#allocation3]  }
  0x1a   : > { %589 = dma.done.wait (%p655_p4), [#allocation3], 16  }
  0x1b   : > { %591 = vsyncadd (%p655_p4), [#allocation3], 4294967280 }
  0x1c   : > { %218 = sfence }
  0x1d   : > { %p254_p1 = scmp.lt.s32.totalorder %s594_s15, 3  ;;  %s279_s27 = sld [smem:[#allocation2 + %s594_s15]]  ;;  %vm296_vm0 = vcmask 523264   ;;  %vm303_vm1 = vcmask 517120   ;;  %vm374_vm5 = vcmask 519168   ;;  %vm377_vm6 = vcmask 516096  }
  0x1f   : > { %s723_s15 = smov (!%p254_p1, %s594_s15), 3 }
  0x20   : > { %s519_s28 = smul.u32 12, %s723_s15  ;;  %s265_s8 = scalar_lea.vmem %s713_s2, %s723_s15 }
  0x21   : > { %s268_s11 = scalar_lea.vmem %s714_s3, %s723_s15  ;;  %v505_v40 = vld [vmem:[%s265_s8] ss:$0 sm:$0xff] }
  0x22   : > { %s261_s5 = scalar_lea.vmem %s712_s1, %s519_s28  ;;  %v506_v42 = vld [vmem:[%s268_s11] ss:$0 sm:$0xff]  ;;  %s277_s14 = scalar_lea.vmem %s715_s4, %s519_s28 }
  0x23   : > { %v516_v0 = vld [vmem:[%s261_s5] sm:$0xff]   ;;  %v289_v1 = vstv %s279_s27  ;;  %v282_v2 = vld [vmem:[%s261_s5 + $0x8] sm:$0x1] }
  0x24   : > { %v517_v3 = vunpack.c.l.bf16 %v516_v0  ;;  %v285_v4 = vunpack.c.l.bf16 %v282_v2  ;;  %v518_v5 = vunpack.c.h.bf16 %v516_v0 }
  0x26   : > { %vm286_vm2 = vcmp.ge.f32.partialorder %v517_v3, 0.0  ;;  %v290_v6 = vmul.f32 %v517_v3, %v289_v1  ;;  %vm288_vm3 = vcmp.ge.f32.partialorder %v285_v4, 0.0  ;;  %v292_v7 = vmul.f32 %v289_v1, %v285_v4 }
  0x27   : > { %vm287_vm4 = vcmp.ge.f32.partialorder %v518_v5, 0.0  ;;  %v291_v8 = vmul.f32 %v518_v5, %v289_v1 }
  0x28   : > { %v293_v9 = vsel %vm286_vm2, %v517_v3, %v290_v6  ;;  %v295_v10 = vsel %vm288_vm3, %v285_v4, %v292_v7 }
  0x29   : > { %v297_v11 = vsel %vm296_vm0, %v293_v9, 0.0  ;;  %v304_v12 = vsel %vm303_vm1, %v295_v10, 0.0  ;;  %v294_v13 = vsel %vm287_vm4, %v518_v5, %v291_v8 }
  0x2a   : > { %298 = vadd.xlane.f32.xlu0 %v297_v11  ;;  %305 = vadd.xlane.f32.xlu1 %v304_v12  ;;  %v300_v14 = vsel %vm296_vm0, %v294_v13, 0.0 }
  0x2e   : > { %301 = vadd.xlane.f32.xlu0 %v300_v14 }
  0xb3   : > { %v299_v15 = vpop.xlane.xlu0 %298  ;;  %v306_v16 = vpop.xlane.xlu1 %305 }
  0xb4   : > { %v308_v17 = vmul.f32 0.015625, %v299_v15  ;;  %v310_v18 = vmul.f32 0.015625, %v306_v16 }
  0xb6   : > { %v311_v19 = vsub.f32 %v293_v9, %v308_v17  ;;  %v313_v20 = vsub.f32 %v295_v10, %v310_v18 }
  0xb7   : > { %v302_v21 = vpop.xlane.xlu0 %301 }
  0xb8   : > { %v309_v22 = vmul.f32 0.015625, %v302_v21  ;;  %v314_v23 = vmul.f32 %v311_v19, %v311_v19  ;;  %v316_v24 = vmul.f32 %v313_v20, %v313_v20 }
  0xba   : > { %v312_v25 = vsub.f32 %v294_v13, %v309_v22  ;;  %v317_v26 = vsel %vm296_vm0, %v314_v23, 0.0  ;;  %v323_v27 = vsel %vm303_vm1, %v316_v24, 0.0 }
  0xbb   : > { %318 = vadd.xlane.f32.xlu1 %v317_v26 }
  0xbc   : > { %v315_v28 = vmul.f32 %v312_v25, %v312_v25 }
  0xbe   : > { %v320_v29 = vsel %vm296_vm0, %v315_v28, 0.0 }
  0xbf   : > { %324 = vadd.xlane.f32.xlu1 %v323_v27  ;;  %321 = vadd.xlane.f32.xlu0 %v320_v29 }
 0x144   : > { %v319_v30 = vpop.xlane.xlu1 %318 }
 0x145   : > { %v326_v31 = vmul.f32 0.015625, %v319_v30 }
 0x147   : > { %v329_v32 = vadd.f32 1e-05, %v326_v31 }
 0x148   : > { %v325_v33 = vpop.xlane.xlu1 %324  ;;  %v322_v34 = vpop.xlane.xlu0 %321 }
 0x149   : > { %555 = vrsqrt.f32 %v329_v32  ;;  %v328_v35 = vmul.f32 0.015625, %v325_v33  ;;  %v327_v36 = vmul.f32 0.015625, %v322_v34 }
 0x14b   : > { %v331_v37 = vadd.f32 1e-05, %v328_v35  ;;  %v330_v38 = vadd.f32 1e-05, %v327_v36 }
 0x14d   : > { %557 = vrsqrt.f32 %v331_v37 }
 0x14e   : > { %559 = vrsqrt.f32 %v330_v38 }
 0x156   : > { %v556_v39 = vpop.eup %555 }
 0x157   : > { %v335_v41 = vmul.f32 %v556_v39, %v311_v19 }
 0x159   : > { %v345_v43 = vmul.f32 %v505_v40, %v335_v41 }
 0x15a   : > { %v558_v44 = vpop.eup %557 }
 0x15b   : > { %v560_v45 = vpop.eup %559  ;;  %v355_v46 = vadd.f32 %v506_v42, %v345_v43  ;;  %v337_v47 = vmul.f32 %v558_v44, %v313_v20 }
 0x15c   : > { %v336_v48 = vmul.f32 %v560_v45, %v312_v25 }
 0x15d   : > { %v358_v49 = vmul.f32 0.125, %v355_v46  ;;  %v347_v50 = vmul.f32 %v505_v40, %v337_v47 }
 0x15e   : > { %v346_v51 = vmul.f32 %v505_v40, %v336_v48 }
 0x15f   : > { %v512_v52 = vpack.c.bf16 %v358_v49, %v358_v49  ;;  %v357_v53 = vadd.f32 %v506_v42, %v347_v50 }
 0x160   : > { %v356_v54 = vadd.f32 %v506_v42, %v346_v51 }
 0x161   : > { %375 = vst.msk [vmem:[%s277_s14] sm:$0xf] %vm374_vm5, %v512_v52  ;;  %v360_v55 = vmul.f32 0.125, %v357_v53 }
 0x162   : > { %v359_v56 = vmul.f32 0.125, %v356_v54 }
 0x163   : > { %v514_v57 = vpack.c.bf16 %v360_v55, %v360_v55 }
 0x164   : > { %v513_v58 = vpack.c.bf16 %v359_v56, %v359_v56 }
 0x165   : > { %378 = vst.msk [vmem:[%s277_s14 + $0x8] sm:$0x1] %vm377_vm6, %v514_v57 }
 0x166   : > { %376 = vst.msk [vmem:[%s277_s14 + $0x4] sm:$0xf] %vm374_vm5, %v513_v58 }
 0x167 PF: > { %s15_s17 = sadd.s32 1, %s602_s17   ;;  %s718_s15 = smov %s598_s16 }
 0x168   : > { %p12_p2 = scmp.ge.s32.totalorder %s15_s17, 6   ;;  %s719_s16 = smov %s721_s19 }
 0x16a   :  { %14 = sbr.rel (!%p12_p2) target bundleno = 2 (0x2), region = 77 }
 0x16f   :  { %409 = vsyncpa [#allocation3], 1 }
 0x170   :  { %411 = vsyncpa [#allocation3 + $0x1], 1 }

// kernel: gridnet_block_forward.25
= control target key start
LH: loop header
LB: loop body
LE: loop exit
PB: predicated region body
PF: predicated region fallthrough
CT: control target
= control target key end

     0   :  { %9 = vsyncpa [#allocation3], 0  ;;  %s627_s15 = smov 0   ;;  %s629_s16 = smov 0   ;;  %s708_s0 = inlined_call_operand.vmem [shape: f32[4], index: 0, kind: input, shape index: {}]   ;;  %s709_s1 = inlined_call_operand.vmem [shape: bf16[4,18,64], index: 1, kind: input, shape index: {}]   ;;  %s710_s2 = inlined_call_operand.vmem [shape: f32[4,1,64], index: 2, kind: input, shape index: {}]   ;;  %s711_s3 = inlined_call_operand.vmem [shape: f32[4,1,64], index: 3, kind: input, shape index: {}]   ;;  %s712_s4 = inlined_call_operand.vmem [shape: bf16[4,18,64], index: 4, kind: output, shape index: {}]  }
   0x1   :  { %s631_s17 = smov 0  }
   0x2 LB: > { %s493_s18 = sadd.s32 4294967295, %s599_s17   ;;  %s27_s19 = sadd.s32 1, %s595_s16  ;;  %s599_s17 = sphi %s631_s17, %s15_s17   ;;  %s595_s16 = sphi %s629_s16, %s716_s16   ;;  %s591_s15 = sphi %s627_s15, %s715_s15  }
   0x3   : > { %p29_p0 = scmp.ge.s32.totalorder %s27_s19, 4  ;;  %p495_p1 = scmp.ge.s32.totalorder %s599_s17, 1 }
   0x4   : > { %p161_p2 = scmp.lt.s32.totalorder %s599_s17, 5  ;;  %p652_p4 = scmp.eq.s32.totalorder %s493_s18, 0 }
   0x5   : > { %s718_s19 = smov (%p29_p0, %s27_s19), 0  ;;  %s174_s24 = sshll.u32 %s708_s0, 4  ;;  %s175_s24 = int_to_ptr.vmem [resolvable:$true] %s174_s24 }
   0x6   : > { %p648_p3 = pnand %p495_p1, %p161_p2  ;;  %s558_s25 = scalar_lea.vmem %s175_s24, 16 }
   0x7   : > { %p559_p7 = scmp.ne.s32.totalorder %s175_s24, %s558_s25  ;;  %p566_p11 = scmp.lt.s32.totalorder %s175_s24, %s175_s24 }
   0x8   : > { %p521_p5 = pneg %p648_p3  ;;  %p567_p12 = scmp.lt.s32.totalorder %s558_s25, %s558_s25 }
   0xa   : > { %p522_p6 = pnand %p652_p4, %p521_p5  ;;  %p568_p13 = por %p567_p12, %p566_p11 }
   0xc   : > { %p560_p8 = pneg %p522_p6 }
   0xe   : > { %p561_p9 = pnand %p560_p8, %p559_p7 }
  0x10   : > { %p562_p10 = pneg %p561_p9 }
  0x12   : > { %p569_p0 = pnand %p568_p13, %p562_p10 }
  0x14   : > { %572 = shalt.err (!%p569_p0)
}
  0x15   : > { %s601_s26 = smov [#allocation2]   ;;  %212 = sbr.rel (%p648_p3) target bundleno = 357 (0x165), region = 36 }
  0x16   : > { %524 = dma.vmem_to_smem (!%p522_p6), %s175_s24, 16, %s601_s26, [#allocation3]  }
  0x1a   : > { %586 = dma.done.wait (%p652_p4), [#allocation3], 16  }
  0x1b   : > { %588 = vsyncadd (%p652_p4), [#allocation3], 4294967280 }
  0x1c   : > { %218 = sfence }
  0x1d   : > { %p254_p1 = scmp.lt.s32.totalorder %s591_s15, 3  ;;  %s279_s27 = sld [smem:[#allocation2 + %s591_s15]]  ;;  %vm296_vm0 = vcmask 523264   ;;  %vm303_vm1 = vcmask 517120   ;;  %vm371_vm5 = vcmask 519168   ;;  %vm374_vm6 = vcmask 516096  }
  0x1f   : > { %s720_s15 = smov (!%p254_p1, %s591_s15), 3 }
  0x20   : > { %s516_s28 = smul.u32 12, %s720_s15  ;;  %s265_s8 = scalar_lea.vmem %s710_s2, %s720_s15 }
  0x21   : > { %s268_s11 = scalar_lea.vmem %s711_s3, %s720_s15  ;;  %v502_v40 = vld [vmem:[%s265_s8] ss:$0 sm:$0xff] }
  0x22   : > { %s261_s5 = scalar_lea.vmem %s709_s1, %s516_s28  ;;  %v503_v42 = vld [vmem:[%s268_s11] ss:$0 sm:$0xff]  ;;  %s277_s14 = scalar_lea.vmem %s712_s4, %s516_s28 }
  0x23   : > { %v513_v0 = vld [vmem:[%s261_s5] sm:$0xff]   ;;  %v289_v1 = vstv %s279_s27  ;;  %v282_v2 = vld [vmem:[%s261_s5 + $0x8] sm:$0x1] }
  0x24   : > { %v514_v3 = vunpack.c.l.bf16 %v513_v0  ;;  %v285_v4 = vunpack.c.l.bf16 %v282_v2  ;;  %v515_v5 = vunpack.c.h.bf16 %v513_v0 }
  0x26   : > { %vm286_vm2 = vcmp.ge.f32.partialorder %v514_v3, 0.0  ;;  %v290_v6 = vmul.f32 %v514_v3, %v289_v1  ;;  %vm288_vm3 = vcmp.ge.f32.partialorder %v285_v4, 0.0  ;;  %v292_v7 = vmul.f32 %v289_v1, %v285_v4 }
  0x27   : > { %vm287_vm4 = vcmp.ge.f32.partialorder %v515_v5, 0.0  ;;  %v291_v8 = vmul.f32 %v515_v5, %v289_v1 }
  0x28   : > { %v293_v9 = vsel %vm286_vm2, %v514_v3, %v290_v6  ;;  %v295_v10 = vsel %vm288_vm3, %v285_v4, %v292_v7 }
  0x29   : > { %v297_v11 = vsel %vm296_vm0, %v293_v9, 0.0  ;;  %v304_v12 = vsel %vm303_vm1, %v295_v10, 0.0  ;;  %v294_v13 = vsel %vm287_vm4, %v515_v5, %v291_v8 }
  0x2a   : > { %298 = vadd.xlane.f32.xlu0 %v297_v11  ;;  %305 = vadd.xlane.f32.xlu1 %v304_v12  ;;  %v300_v14 = vsel %vm296_vm0, %v294_v13, 0.0 }
  0x2e   : > { %301 = vadd.xlane.f32.xlu0 %v300_v14 }
  0xb3   : > { %v299_v15 = vpop.xlane.xlu0 %298  ;;  %v306_v16 = vpop.xlane.xlu1 %305 }
  0xb4   : > { %v308_v17 = vmul.f32 0.015625, %v299_v15  ;;  %v310_v18 = vmul.f32 0.015625, %v306_v16 }
  0xb6   : > { %v311_v19 = vsub.f32 %v293_v9, %v308_v17  ;;  %v313_v20 = vsub.f32 %v295_v10, %v310_v18 }
  0xb7   : > { %v302_v21 = vpop.xlane.xlu0 %301 }
  0xb8   : > { %v309_v22 = vmul.f32 0.015625, %v302_v21  ;;  %v314_v23 = vmul.f32 %v311_v19, %v311_v19  ;;  %v316_v24 = vmul.f32 %v313_v20, %v313_v20 }
  0xba   : > { %v312_v25 = vsub.f32 %v294_v13, %v309_v22  ;;  %v317_v26 = vsel %vm296_vm0, %v314_v23, 0.0  ;;  %v323_v27 = vsel %vm303_vm1, %v316_v24, 0.0 }
  0xbb   : > { %318 = vadd.xlane.f32.xlu1 %v317_v26 }
  0xbc   : > { %v315_v28 = vmul.f32 %v312_v25, %v312_v25 }
  0xbe   : > { %v320_v29 = vsel %vm296_vm0, %v315_v28, 0.0 }
  0xbf   : > { %324 = vadd.xlane.f32.xlu1 %v323_v27  ;;  %321 = vadd.xlane.f32.xlu0 %v320_v29 }
 0x144   : > { %v319_v30 = vpop.xlane.xlu1 %318 }
 0x145   : > { %v326_v31 = vmul.f32 0.015625, %v319_v30 }
 0x147   : > { %v329_v32 = vadd.f32 1e-05, %v326_v31 }
 0x148   : > { %v325_v33 = vpop.xlane.xlu1 %324  ;;  %v322_v34 = vpop.xlane.xlu0 %321 }
 0x149   : > { %552 = vrsqrt.f32 %v329_v32  ;;  %v328_v35 = vmul.f32 0.015625, %v325_v33  ;;  %v327_v36 = vmul.f32 0.015625, %v322_v34 }
 0x14b   : > { %v331_v37 = vadd.f32 1e-05, %v328_v35  ;;  %v330_v38 = vadd.f32 1e-05, %v327_v36 }
 0x14d   : > { %554 = vrsqrt.f32 %v331_v37 }
 0x14e   : > { %556 = vrsqrt.f32 %v330_v38 }
 0x156   : > { %v553_v39 = vpop.eup %552 }
 0x157   : > { %v335_v41 = vmul.f32 %v553_v39, %v311_v19 }
 0x159   : > { %v345_v43 = vmul.f32 %v502_v40, %v335_v41 }
 0x15a   : > { %v555_v44 = vpop.eup %554 }
 0x15b   : > { %v557_v45 = vpop.eup %556  ;;  %v355_v46 = vadd.f32 %v503_v42, %v345_v43  ;;  %v337_v47 = vmul.f32 %v555_v44, %v313_v20 }
 0x15c   : > { %v336_v48 = vmul.f32 %v557_v45, %v312_v25 }
 0x15d   : > { %v509_v49 = vpack.c.bf16 %v355_v46, %v355_v46  ;;  %v347_v50 = vmul.f32 %v502_v40, %v337_v47 }
 0x15e   : > { %v346_v51 = vmul.f32 %v502_v40, %v336_v48 }
 0x15f   : > { %372 = vst.msk [vmem:[%s277_s14] sm:$0xf] %vm371_vm5, %v509_v49  ;;  %v357_v52 = vadd.f32 %v503_v42, %v347_v50 }
 0x160   : > { %v356_v53 = vadd.f32 %v503_v42, %v346_v51 }
 0x161   : > { %v511_v54 = vpack.c.bf16 %v357_v52, %v357_v52 }
 0x162   : > { %v510_v55 = vpack.c.bf16 %v356_v53, %v356_v53 }
 0x163   : > { %375 = vst.msk [vmem:[%s277_s14 + $0x8] sm:$0x1] %vm374_vm6, %v511_v54 }
 0x164   : > { %373 = vst.msk [vmem:[%s277_s14 + $0x4] sm:$0xf] %vm371_vm5, %v510_v55 }
 0x165 PF: > { %s15_s17 = sadd.s32 1, %s599_s17   ;;  %s715_s15 = smov %s595_s16 }
 0x166   : > { %p12_p2 = scmp.ge.s32.totalorder %s15_s17, 6   ;;  %s716_s16 = smov %s718_s19 }
 0x168   :  { %14 = sbr.rel (!%p12_p2) target bundleno = 2 (0x2), region = 77 }
 0x16d   :  { %406 = vsyncpa [#allocation3], 1 }
 0x16e   :  { %408 = vsyncpa [#allocation3 + $0x1], 1 }

// kernel: gridnet_block_forward.26
= control target key start
LH: loop header
LB: loop body
LE: loop exit
PB: predicated region body
PF: predicated region fallthrough
CT: control target
= control target key end

     0   :  { %9 = vsyncpa [#allocation3], 0  ;;  %s627_s15 = smov 0   ;;  %s629_s16 = smov 0   ;;  %s708_s0 = inlined_call_operand.vmem [shape: f32[4], index: 0, kind: input, shape index: {}]   ;;  %s709_s1 = inlined_call_operand.vmem [shape: bf16[4,18,16], index: 1, kind: input, shape index: {}]   ;;  %s710_s2 = inlined_call_operand.vmem [shape: f32[4,1,16], index: 2, kind: input, shape index: {}]   ;;  %s711_s3 = inlined_call_operand.vmem [shape: f32[4,1,16], index: 3, kind: input, shape index: {}]   ;;  %s712_s4 = inlined_call_operand.vmem [shape: bf16[4,18,16], index: 4, kind: output, shape index: {}]  }
   0x1   :  { %s631_s17 = smov 0  }
   0x2 LB: > { %s493_s18 = sadd.s32 4294967295, %s599_s17   ;;  %s27_s19 = sadd.s32 1, %s595_s16  ;;  %s599_s17 = sphi %s631_s17, %s15_s17   ;;  %s595_s16 = sphi %s629_s16, %s716_s16   ;;  %s591_s15 = sphi %s627_s15, %s715_s15  }
   0x3   : > { %p29_p0 = scmp.ge.s32.totalorder %s27_s19, 4  ;;  %p495_p1 = scmp.ge.s32.totalorder %s599_s17, 1 }
   0x4   : > { %p161_p2 = scmp.lt.s32.totalorder %s599_s17, 5  ;;  %p652_p4 = scmp.eq.s32.totalorder %s493_s18, 0 }
   0x5   : > { %s718_s19 = smov (%p29_p0, %s27_s19), 0  ;;  %s174_s24 = sshll.u32 %s708_s0, 4  ;;  %s175_s24 = int_to_ptr.vmem [resolvable:$true] %s174_s24 }
   0x6   : > { %p648_p3 = pnand %p495_p1, %p161_p2  ;;  %s558_s25 = scalar_lea.vmem %s175_s24, 16 }
   0x7   : > { %p559_p7 = scmp.ne.s32.totalorder %s175_s24, %s558_s25  ;;  %p566_p11 = scmp.lt.s32.totalorder %s175_s24, %s175_s24 }
   0x8   : > { %p521_p5 = pneg %p648_p3  ;;  %p567_p12 = scmp.lt.s32.totalorder %s558_s25, %s558_s25 }
   0xa   : > { %p522_p6 = pnand %p652_p4, %p521_p5  ;;  %p568_p13 = por %p567_p12, %p566_p11 }
   0xc   : > { %p560_p8 = pneg %p522_p6 }
   0xe   : > { %p561_p9 = pnand %p560_p8, %p559_p7 }
  0x10   : > { %p562_p10 = pneg %p561_p9 }
  0x12   : > { %p569_p0 = pnand %p568_p13, %p562_p10 }
  0x14   : > { %572 = shalt.err (!%p569_p0)
}
  0x15   : > { %s601_s26 = smov [#allocation2]   ;;  %212 = sbr.rel (%p648_p3) target bundleno = 357 (0x165), region = 36 }
  0x16   : > { %524 = dma.vmem_to_smem (!%p522_p6), %s175_s24, 16, %s601_s26, [#allocation3]  }
  0x1a   : > { %586 = dma.done.wait (%p652_p4), [#allocation3], 16  }
  0x1b   : > { %588 = vsyncadd (%p652_p4), [#allocation3], 4294967280 }
  0x1c   : > { %218 = sfence }
  0x1d   : > { %p254_p1 = scmp.lt.s32.totalorder %s591_s15, 3  ;;  %s279_s27 = sld [smem:[#allocation2 + %s591_s15]]  ;;  %vm296_vm0 = vcmask 130048   ;;  %vm303_vm1 = vcmask 123904   ;;  %vm371_vm5 = vcmask 125952   ;;  %vm374_vm6 = vcmask 122880  }
  0x1f   : > { %s720_s15 = smov (!%p254_p1, %s591_s15), 3 }
  0x20   : > { %s516_s28 = smul.u32 12, %s720_s15  ;;  %s265_s8 = scalar_lea.vmem %s710_s2, %s720_s15 }
  0x21   : > { %s268_s11 = scalar_lea.vmem %s711_s3, %s720_s15  ;;  %v502_v40 = vld [vmem:[%s265_s8] ss:$0 sm:$0xff] }
  0x22   : > { %s261_s5 = scalar_lea.vmem %s709_s1, %s516_s28  ;;  %v503_v42 = vld [vmem:[%s268_s11] ss:$0 sm:$0xff]  ;;  %s277_s14 = scalar_lea.vmem %s712_s4, %s516_s28 }
  0x23   : > { %v513_v0 = vld [vmem:[%s261_s5] sm:$0xff]   ;;  %v289_v1 = vstv %s279_s27  ;;  %v282_v2 = vld [vmem:[%s261_s5 + $0x8] sm:$0x1] }
  0x24   : > { %v514_v3 = vunpack.c.l.bf16 %v513_v0  ;;  %v285_v4 = vunpack.c.l.bf16 %v282_v2  ;;  %v515_v5 = vunpack.c.h.bf16 %v513_v0 }
  0x26   : > { %vm286_vm2 = vcmp.ge.f32.partialorder %v514_v3, 0.0  ;;  %v290_v6 = vmul.f32 %v514_v3, %v289_v1  ;;  %vm288_vm3 = vcmp.ge.f32.partialorder %v285_v4, 0.0  ;;  %v292_v7 = vmul.f32 %v289_v1, %v285_v4 }
  0x27   : > { %vm287_vm4 = vcmp.ge.f32.partialorder %v515_v5, 0.0  ;;  %v291_v8 = vmul.f32 %v515_v5, %v289_v1 }
  0x28   : > { %v293_v9 = vsel %vm286_vm2, %v514_v3, %v290_v6  ;;  %v295_v10 = vsel %vm288_vm3, %v285_v4, %v292_v7 }
  0x29   : > { %v297_v11 = vsel %vm296_vm0, %v293_v9, 0.0  ;;  %v304_v12 = vsel %vm303_vm1, %v295_v10, 0.0  ;;  %v294_v13 = vsel %vm287_vm4, %v515_v5, %v291_v8 }
  0x2a   : > { %298 = vadd.xlane.f32.xlu0 %v297_v11  ;;  %305 = vadd.xlane.f32.xlu1 %v304_v12  ;;  %v300_v14 = vsel %vm296_vm0, %v294_v13, 0.0 }
  0x2e   : > { %301 = vadd.xlane.f32.xlu0 %v300_v14 }
  0xb3   : > { %v299_v15 = vpop.xlane.xlu0 %298  ;;  %v306_v16 = vpop.xlane.xlu1 %305 }
  0xb4   : > { %v308_v17 = vmul.f32 0.0625, %v299_v15  ;;  %v310_v18 = vmul.f32 0.0625, %v306_v16 }
  0xb6   : > { %v311_v19 = vsub.f32 %v293_v9, %v308_v17  ;;  %v313_v20 = vsub.f32 %v295_v10, %v310_v18 }
  0xb7   : > { %v302_v21 = vpop.xlane.xlu0 %301 }
  0xb8   : > { %v309_v22 = vmul.f32 0.0625, %v302_v21  ;;  %v314_v23 = vmul.f32 %v311_v19, %v311_v19  ;;  %v316_v24 = vmul.f32 %v313_v20, %v313_v20 }
  0xba   : > { %v312_v25 = vsub.f32 %v294_v13, %v309_v22  ;;  %v317_v26 = vsel %vm296_vm0, %v314_v23, 0.0  ;;  %v323_v27 = vsel %vm303_vm1, %v316_v24, 0.0 }
  0xbb   : > { %318 = vadd.xlane.f32.xlu1 %v317_v26 }
  0xbc   : > { %v315_v28 = vmul.f32 %v312_v25, %v312_v25 }
  0xbe   : > { %v320_v29 = vsel %vm296_vm0, %v315_v28, 0.0 }
  0xbf   : > { %324 = vadd.xlane.f32.xlu1 %v323_v27  ;;  %321 = vadd.xlane.f32.xlu0 %v320_v29 }
 0x144   : > { %v319_v30 = vpop.xlane.xlu1 %318 }
 0x145   : > { %v326_v31 = vmul.f32 0.0625, %v319_v30 }
 0x147   : > { %v329_v32 = vadd.f32 1e-05, %v326_v31 }
 0x148   : > { %v325_v33 = vpop.xlane.xlu1 %324  ;;  %v322_v34 = vpop.xlane.xlu0 %321 }
 0x149   : > { %552 = vrsqrt.f32 %v329_v32  ;;  %v328_v35 = vmul.f32 0.0625, %v325_v33  ;;  %v327_v36 = vmul.f32 0.0625, %v322_v34 }
 0x14b   : > { %v331_v37 = vadd.f32 1e-05, %v328_v35  ;;  %v330_v38 = vadd.f32 1e-05, %v327_v36 }
 0x14d   : > { %554 = vrsqrt.f32 %v331_v37 }
 0x14e   : > { %556 = vrsqrt.f32 %v330_v38 }
 0x156   : > { %v553_v39 = vpop.eup %552 }
 0x157   : > { %v335_v41 = vmul.f32 %v553_v39, %v311_v19 }
 0x159   : > { %v345_v43 = vmul.f32 %v502_v40, %v335_v41 }
 0x15a   : > { %v555_v44 = vpop.eup %554 }
 0x15b   : > { %v557_v45 = vpop.eup %556  ;;  %v355_v46 = vadd.f32 %v503_v42, %v345_v43  ;;  %v337_v47 = vmul.f32 %v555_v44, %v313_v20 }
 0x15c   : > { %v336_v48 = vmul.f32 %v557_v45, %v312_v25 }
 0x15d   : > { %v509_v49 = vpack.c.bf16 %v355_v46, %v355_v46  ;;  %v347_v50 = vmul.f32 %v502_v40, %v337_v47 }
 0x15e   : > { %v346_v51 = vmul.f32 %v502_v40, %v336_v48 }
 0x15f   : > { %372 = vst.msk [vmem:[%s277_s14] sm:$0xf] %vm371_vm5, %v509_v49  ;;  %v357_v52 = vadd.f32 %v503_v42, %v347_v50 }
 0x160   : > { %v356_v53 = vadd.f32 %v503_v42, %v346_v51 }
 0x161   : > { %v511_v54 = vpack.c.bf16 %v357_v52, %v357_v52 }
 0x162   : > { %v510_v55 = vpack.c.bf16 %v356_v53, %v356_v53 }
 0x163   : > { %375 = vst.msk [vmem:[%s277_s14 + $0x8] sm:$0x1] %vm374_vm6, %v511_v54 }
 0x164   : > { %373 = vst.msk [vmem:[%s277_s14 + $0x4] sm:$0xf] %vm371_vm5, %v510_v55 }
 0x165 PF: > { %s15_s17 = sadd.s32 1, %s599_s17   ;;  %s715_s15 = smov %s595_s16 }
 0x166   : > { %p12_p2 = scmp.ge.s32.totalorder %s15_s17, 6   ;;  %s716_s16 = smov %s718_s19 }
 0x168   :  { %14 = sbr.rel (!%p12_p2) target bundleno = 2 (0x2), region = 77 }
 0x16d   :  { %406 = vsyncpa [#allocation3], 1 }
 0x16e   :  { %408 = vsyncpa [#allocation3 + $0x1], 1 }

// kernel: gridnet_block_forward.28
= control target key start
LH: loop header
LB: loop body
LE: loop exit
PB: predicated region body
PF: predicated region fallthrough
CT: control target
= control target key end

     0   :  { %vm114_vm0 = vcmask 1043456   ;;  %v434_v0 = vmov 0.0   ;;  %vm435_vm1 = vmmov 0   ;;  %vm86_vm2 = vcmask 64512   ;;  %s599_s1 = inlined_call_operand.vmem [shape: bf16[8,8], index: 1, kind: input, shape index: {}]   ;;  %s600_s0 = inlined_call_operand.vmem [shape: bf16[144,8], index: 0, kind: input, shape index: {}]   ;;  %s601_s2 = inlined_call_operand.vmem [shape: f32[1,8], index: 2, kind: input, shape index: {}]   ;;  %s602_s3 = inlined_call_operand.vmem [shape: bf16[144,8], index: 3, kind: output, shape index: {}]  }
   0x1   :  { %383 = vmatprep.subr.bf16.mxu0 %v434_v0  ;;  %v33_v1 = vld [vmem:[%s599_s1] sm:$0xf]  ;;  %421 = vmatprep.subr.bf16.mxu1 %v434_v0  ;;  %v426_v4 = vld [vmem:[%s600_s0 + $0x28] sm:$0xff]   ;;  %v428_v6 = vld [vmem:[%s600_s0 + $0x30] sm:$0xff]   ;;  %vm295_vm3 = vcmask 60416  }
   0x2   :  { %v116_v2 = vsel %vm114_vm0, %v33_v1, 0  ;;  %385 = vmatprep.mubr.msk.bf16.mxu0 %vm435_vm1, %v434_v0  ;;  %v425_v3 = vld [vmem:[%s600_s0] sm:$0xff]   ;;  %405 = vmatprep.mubr.msk.bf16.mxu1 %vm435_vm1, %v434_v0  ;;  %v427_v5 = vld [vmem:[%s600_s0 + $0x8] sm:$0xff]   ;;  %v429_v7 = vld [vmem:[%s600_s0 + $0x10] sm:$0xff]  }
   0x3   :  { %384 = vmatpush3.bf16.msra.mxu0 %v116_v2  ;;  %422 = vmatpush3.bf16.msra.mxu1 %v116_v2  ;;  %v430_v8 = vld [vmem:[%s600_s0 + $0x38] sm:$0xff]   ;;  %v432_v10 = vld [vmem:[%s600_s0 + $0x40] sm:$0xff]  }
   0x4   :  { %v431_v9 = vld [vmem:[%s600_s0 + $0x18] sm:$0xff]   ;;  %v433_v11 = vld [vmem:[%s600_s0 + $0x20] sm:$0xff]  }
   0x5   :  { %v507_v12 = vld [vmem:[%s601_s2] ss:$0 sm:$0xff] }
   0x6   :  { %386 = vmatmul.mubr.msk.bf16.vlgmr.msra.gmra.mxu0 %vm86_vm2, %v425_v3  ;;  %406 = vmatmul.mubr.msk.bf16.vlgmr.msra.gmra.mxu1 %vm86_vm2, %v426_v4 }
   0x7   :  { %389 = vmatprep.mubr.msk.bf16.mxu0 %vm435_vm1, %v434_v0  ;;  %409 = vmatprep.mubr.msk.bf16.mxu1 %vm435_vm1, %v434_v0 }
   0xe   :  { %390 = vmatmul.mubr.msk.bf16.gmra.mxu0 %vm86_vm2, %v427_v5  ;;  %410 = vmatmul.mubr.msk.bf16.gmra.mxu1 %vm86_vm2, %v428_v6 }
   0xf   :  { %393 = vmatprep.mubr.msk.bf16.mxu0 %vm435_vm1, %v434_v0  ;;  %413 = vmatprep.mubr.msk.bf16.mxu1 %vm435_vm1, %v434_v0 }
  0x16   :  { %394 = vmatmul.mubr.msk.bf16.gmra.mxu0 %vm86_vm2, %v429_v7  ;;  %414 = vmatmul.mubr.msk.bf16.gmra.mxu1 %vm86_vm2, %v430_v8 }
  0x17   :  { %397 = vmatprep.mubr.msk.bf16.mxu0 %vm435_vm1, %v434_v0  ;;  %417 = vmatprep.mubr.msk.bf16.mxu1 %vm435_vm1, %v434_v0 }
  0x1e   :  { %398 = vmatmul.mubr.msk.bf16.gmra.mxu0 %vm86_vm2, %v431_v9  ;;  %418 = vmatmul.mubr.msk.bf16.gmra.mxu1 %vm86_vm2, %v432_v10 }
  0x1f   :  { %401 = vmatprep.mubr.msk.bf16.mxu0 %vm435_vm1, %v434_v0 }
  0x26   :  { %402 = vmatmul.mubr.msk.bf16.gmra.mxu0 %vm86_vm2, %v433_v11 }
  0xc6   :  { %v152_v13 = vpop.f32.mrf.mxu0  ;;  %v192_v14 = vpop.f32.mrf.mxu1 }
  0xc7   :  { %v153_v15 = vadd.f32 %v507_v12, %v152_v13  ;;  %v193_v16 = vadd.f32 %v507_v12, %v192_v14 }
  0xc8   :  { %v387_v17 = vpop.f32.mrf.mxu0  ;;  %v407_v18 = vpop.f32.mrf.mxu1 }
  0xc9   :  { %v355_v19 = vpack.c.bf16 %v153_v15, %v153_v15  ;;  %v365_v20 = vpack.c.bf16 %v193_v16, %v193_v16 }
  0xca   :  { %v155_v21 = vpop.f32.mrf.mxu0  ;;  %v195_v22 = vpop.f32.mrf.mxu1 }
  0xcb   :  { %296 = vst.msk [vmem:[%s602_s3] sm:$0xf] %vm295_vm3, %v355_v19  ;;  %306 = vst.msk [vmem:[%s602_s3 + $0x28] sm:$0xf] %vm295_vm3, %v365_v20  ;;  %v156_v23 = vadd.f32 %v507_v12, %v155_v21  ;;  %v196_v24 = vadd.f32 %v507_v12, %v195_v22 }
  0xcc   :  { %v388_v25 = vpop.f32.mrf.mxu0  ;;  %v408_v26 = vpop.f32.mrf.mxu1 }
  0xcd   :  { %v356_v27 = vpack.c.bf16 %v156_v23, %v156_v23  ;;  %v366_v28 = vpack.c.bf16 %v196_v24, %v196_v24 }
  0xce   :  { %v160_v29 = vpop.f32.mrf.mxu0  ;;  %v200_v30 = vpop.f32.mrf.mxu1 }
  0xcf   :  { %297 = vst.msk [vmem:[%s602_s3 + $0x4] sm:$0xf] %vm295_vm3, %v356_v27  ;;  %307 = vst.msk [vmem:[%s602_s3 + $0x2c] sm:$0xf] %vm295_vm3, %v366_v28  ;;  %v161_v31 = vadd.f32 %v507_v12, %v160_v29  ;;  %v201_v32 = vadd.f32 %v507_v12, %v200_v30 }
  0xd0   :  { %v391_v33 = vpop.f32.mrf.mxu0  ;;  %v411_v34 = vpop.f32.mrf.mxu1 }
  0xd1   :  { %v357_v35 = vpack.c.bf16 %v161_v31, %v161_v31  ;;  %v367_v36 = vpack.c.bf16 %v201_v32, %v201_v32 }
  0xd2   :  { %v163_v37 = vpop.f32.mrf.mxu0  ;;  %v203_v38 = vpop.f32.mrf.mxu1 }
  0xd3   :  { %298 = vst.msk [vmem:[%s602_s3 + $0x8] sm:$0xf] %vm295_vm3, %v357_v35  ;;  %308 = vst.msk [vmem:[%s602_s3 + $0x30] sm:$0xf] %vm295_vm3, %v367_v36  ;;  %v164_v39 = vadd.f32 %v507_v12, %v163_v37  ;;  %v204_v40 = vadd.f32 %v507_v12, %v203_v38 }
  0xd4   :  { %v392_v41 = vpop.f32.mrf.mxu0  ;;  %v412_v42 = vpop.f32.mrf.mxu1 }
  0xd5   :  { %v358_v43 = vpack.c.bf16 %v164_v39, %v164_v39  ;;  %v368_v44 = vpack.c.bf16 %v204_v40, %v204_v40 }
  0xd6   :  { %v168_v45 = vpop.f32.mrf.mxu0  ;;  %v208_v46 = vpop.f32.mrf.mxu1 }
  0xd7   :  { %299 = vst.msk [vmem:[%s602_s3 + $0xc] sm:$0xf] %vm295_vm3, %v358_v43  ;;  %309 = vst.msk [vmem:[%s602_s3 + $0x34] sm:$0xf] %vm295_vm3, %v368_v44  ;;  %v169_v47 = vadd.f32 %v507_v12, %v168_v45  ;;  %v209_v48 = vadd.f32 %v507_v12, %v208_v46 }
  0xd8   :  { %v395_v49 = vpop.f32.mrf.mxu0  ;;  %v415_v50 = vpop.f32.mrf.mxu1 }
  0xd9   :  { %v359_v51 = vpack.c.bf16 %v169_v47, %v169_v47  ;;  %v369_v52 = vpack.c.bf16 %v209_v48, %v209_v48 }
  0xda   :  { %v171_v53 = vpop.f32.mrf.mxu0  ;;  %v211_v54 = vpop.f32.mrf.mxu1 }
  0xdb   :  { %300 = vst.msk [vmem:[%s602_s3 + $0x10] sm:$0xf] %vm295_vm3, %v359_v51  ;;  %310 = vst.msk [vmem:[%s602_s3 + $0x38] sm:$0xf] %vm295_vm3, %v369_v52  ;;  %v172_v55 = vadd.f32 %v507_v12, %v171_v53  ;;  %v212_v56 = vadd.f32 %v507_v12, %v211_v54 }
  0xdc   :  { %v396_v57 = vpop.f32.mrf.mxu0  ;;  %v416_v58 = vpop.f32.mrf.mxu1 }
  0xdd   :  { %v360_v59 = vpack.c.bf16 %v172_v55, %v172_v55  ;;  %v370_v60 = vpack.c.bf16 %v212_v56, %v212_v56 }
  0xde   :  { %v176_v61 = vpop.f32.mrf.mxu0  ;;  %v216_v62 = vpop.f32.mrf.mxu1 }
  0xdf   :  { %301 = vst.msk [vmem:[%s602_s3 + $0x14] sm:$0xf] %vm295_vm3, %v360_v59  ;;  %311 = vst.msk [vmem:[%s602_s3 + $0x3c] sm:$0xf] %vm295_vm3, %v370_v60  ;;  %v177_v63 = vadd.f32 %v507_v12, %v176_v61  ;;  %v217_v0 = vadd.f32 %v507_v12, %v216_v62 }
  0xe0   :  { %v399_v1 = vpop.f32.mrf.mxu0  ;;  %v419_v2 = vpop.f32.mrf.mxu1 }
  0xe1   :  { %v361_v3 = vpack.c.bf16 %v177_v63, %v177_v63  ;;  %v371_v4 = vpack.c.bf16 %v217_v0, %v217_v0 }
  0xe2   :  { %v179_v5 = vpop.f32.mrf.mxu0  ;;  %v219_v6 = vpop.f32.mrf.mxu1 }
  0xe3   :  { %302 = vst.msk [vmem:[%s602_s3 + $0x18] sm:$0xf] %vm295_vm3, %v361_v3  ;;  %312 = vst.msk [vmem:[%s602_s3 + $0x40] sm:$0xf] %vm295_vm3, %v371_v4  ;;  %v180_v7 = vadd.f32 %v507_v12, %v179_v5  ;;  %v220_v8 = vadd.f32 %v507_v12, %v219_v6 }
  0xe4   :  { %v400_v9 = vpop.f32.mrf.mxu0  ;;  %v420_v10 = vpop.f32.mrf.mxu1 }
  0xe5   :  { %v362_v11 = vpack.c.bf16 %v180_v7, %v180_v7  ;;  %v372_v13 = vpack.c.bf16 %v220_v8, %v220_v8 }
  0xe6   :  { %v184_v14 = vpop.f32.mrf.mxu0 }
  0xe7   :  { %303 = vst.msk [vmem:[%s602_s3 + $0x1c] sm:$0xf] %vm295_vm3, %v362_v11  ;;  %313 = vst.msk [vmem:[%s602_s3 + $0x44] sm:$0xf] %vm295_vm3, %v372_v13  ;;  %v185_v15 = vadd.f32 %v507_v12, %v184_v14 }
  0xe8   :  { %v403_v16 = vpop.f32.mrf.mxu0 }
  0xe9   :  { %v363_v17 = vpack.c.bf16 %v185_v15, %v185_v15 }
  0xea   :  { %v187_v18 = vpop.f32.mrf.mxu0 }
  0xeb   :  { %304 = vst.msk [vmem:[%s602_s3 + $0x20] sm:$0xf] %vm295_vm3, %v363_v17  ;;  %v188_v19 = vadd.f32 %v507_v12, %v187_v18 }
  0xec   :  { %v404_v20 = vpop.f32.mrf.mxu0 }
  0xed   :  { %v364_v21 = vpack.c.bf16 %v188_v19, %v188_v19 }
  0xef   :  { %305 = vst.msk [vmem:[%s602_s3 + $0x24] sm:$0xf] %vm295_vm3, %v364_v21 }

// kernel: gridnet_block_forward.27
= control target key start
LH: loop header
LB: loop body
LE: loop exit
PB: predicated region body
PF: predicated region fallthrough
CT: control target
= control target key end

     0   :  { %vm57_vm0 = vcmask 523264   ;;  %v1521_v0 = vmov 0.0   ;;  %vm1522_vm1 = vmmov 0   ;;  %vm504_vm2 = vcmask 72704   ;;  %s1930_s1 = inlined_call_operand.vmem [shape: bf16[8,9,64], index: 1, kind: input, shape index: {}]   ;;  %s1931_s0 = inlined_call_operand.vmem [shape: bf16[8,9,64], index: 0, kind: input, shape index: {}]   ;;  %s1932_s2 = inlined_call_operand.vmem [shape: bf16[8,9,16], index: 2, kind: input, shape index: {}]   ;;  %s1933_s3 = inlined_call_operand.vmem [shape: bf16[8,9,16], index: 3, kind: output, shape index: {}]  }
   0x1   :  { %1334 = vmatprep.subr.bf16.mxu0 %v1521_v0  ;;  %1340 = vmatprep.subr.bf16.mxu1 %v1521_v0  ;;  %v1433_v1 = vld [vmem:[%s1930_s1] sm:$0x1f]   ;;  %v1434_v2 = vld [vmem:[%s1930_s1 + $0x8] sm:$0x1f]   ;;  %v1437_v6 = vld [vmem:[%s1930_s1 + $0x10] sm:$0x1f]  }
   0x2   :  { %1336 = vmatprep.mubr.msk.bf16.mxu0 %vm1522_vm1, %v1521_v0  ;;  %1342 = vmatprep.mubr.msk.bf16.mxu1 %vm1522_vm1, %v1521_v0  ;;  %v62_v3 = vsel %vm57_vm0, %v1433_v1, 0  ;;  %v119_v4 = vsel %vm57_vm0, %v1434_v2, 0  ;;  %v1435_v5 = vld [vmem:[%s1931_s0] sm:$0x1f]   ;;  %v1438_v7 = vld [vmem:[%s1930_s1 + $0x18] sm:$0x1f]  }
   0x3   :  { %1335 = vmatpush3.bf16.xpose.msra.mxu0 %v62_v3  ;;  %1341 = vmatpush3.bf16.xpose.msra.mxu1 %v119_v4  ;;  %v1436_v8 = vld [vmem:[%s1931_s0 + $0x8] sm:$0x1f]   ;;  %v176_v9 = vsel %vm57_vm0, %v1437_v6, 0  ;;  %v233_v10 = vsel %vm57_vm0, %v1438_v7, 0  ;;  %v1441_v11 = vld [vmem:[%s1930_s1 + $0x20] sm:$0x1f]  }
   0x4   :  { %1346 = vmatprep.subr.bf16.mxu0 %v1521_v0  ;;  %1352 = vmatprep.subr.bf16.mxu1 %v1521_v0  ;;  %v1442_v12 = vld [vmem:[%s1930_s1 + $0x28] sm:$0x1f]   ;;  %v1439_v13 = vld [vmem:[%s1931_s0 + $0x10] sm:$0x1f]   ;;  %v1440_v14 = vld [vmem:[%s1931_s0 + $0x18] sm:$0x1f]  }
   0x5   :  { %v290_v15 = vsel %vm57_vm0, %v1441_v11, 0  ;;  %v347_v16 = vsel %vm57_vm0, %v1442_v12, 0  ;;  %v1445_v17 = vld [vmem:[%s1930_s1 + $0x30] sm:$0x1f]   ;;  %v1446_v18 = vld [vmem:[%s1930_s1 + $0x38] sm:$0x1f]  }
   0x6   :  { %v1443_v19 = vld [vmem:[%s1931_s0 + $0x20] sm:$0x1f]   ;;  %v1444_v20 = vld [vmem:[%s1931_s0 + $0x28] sm:$0x1f]   ;;  %v404_v21 = vsel %vm57_vm0, %v1445_v17, 0  ;;  %v461_v22 = vsel %vm57_vm0, %v1446_v18, 0 }
   0x7   :  { %v1447_v23 = vld [vmem:[%s1931_s0 + $0x30] sm:$0x1f]   ;;  %v1448_v24 = vld [vmem:[%s1931_s0 + $0x38] sm:$0x1f]   ;;  %vm508_vm3 = vcmask 65536   ;;  %vm682_vm4 = vcmask 1043456  }
   0x8   :  { %vm683_vm5 = vcmask 1044480   ;;  %v1717_v17 = vld [vmem:[%s1932_s2 + $0x10] sm:$0x1f]   ;;  %vm1190_vm6 = vcmask 125952   ;;  %vm1192_vm7 = vcmask 122880  }
   0x9   :  { %vm1193_vm8 = vsmask.f32 256 }
   0xa   :  { %1337 = vmatmul.mubr.msk.bf16.vlgmr.msra.gmra.mxu0 %vm57_vm0, %v1435_v5  ;;  %1343 = vmatmul.mubr.msk.bf16.vlgmr.msra.gmra.mxu1 %vm57_vm0, %v1436_v8  ;;  %vm1838_vm9 = vmand %vm1192_vm7, %vm1193_vm8 }
   0xb   :  { %1347 = vmatpush3.bf16.xpose.msra.mxu0 %v176_v9  ;;  %1353 = vmatpush3.bf16.xpose.msra.mxu1 %v233_v10  ;;  %v1449_v9 = vld [vmem:[%s1932_s2] sm:$0x1f]   ;;  %v1523_v10 = vmov 65535  }
   0xc   :  { %1348 = vmatprep.mubr.msk.bf16.mxu0 %vm1522_vm1, %v1521_v0  ;;  %1354 = vmatprep.mubr.msk.bf16.mxu1 %vm1522_vm1, %v1521_v0  ;;  %v684_v11 = vsel %vm682_vm4, 4294967295, %v1523_v10 }
   0xd   :  { %1358 = vmatprep.subr.bf16.mxu0 %v1521_v0  ;;  %1364 = vmatprep.subr.bf16.mxu1 %v1521_v0 }
  0x12   :  { %1349 = vmatmul.mubr.msk.bf16.vlgmr.msra.gmra.mxu0 %vm57_vm0, %v1439_v13  ;;  %1355 = vmatmul.mubr.msk.bf16.vlgmr.msra.gmra.mxu1 %vm57_vm0, %v1440_v14  ;;  %v1705_v13 = vsel %vm683_vm5, %v684_v11, 0  ;;  %v1450_v14 = vld [vmem:[%s1932_s2 + $0x8] sm:$0x1f]  }
  0x13   :  { %1359 = vmatpush3.bf16.xpose.msra.mxu0 %v290_v15  ;;  %1365 = vmatpush3.bf16.xpose.msra.mxu1 %v347_v16  ;;  %v687_v15 = vand.u32 %v1449_v9, %v1705_v13  ;;  %v739_v16 = vand.u32 %v1450_v14, %v1705_v13  ;;  %v791_v18 = vand.u32 %v1717_v17, %v1705_v13 }
  0x14   :  { %1360 = vmatprep.mubr.msk.bf16.mxu0 %vm1522_vm1, %v1521_v0  ;;  %1366 = vmatprep.mubr.msk.bf16.mxu1 %vm1522_vm1, %v1521_v0 }
  0x15   :  { %1370 = vmatprep.subr.bf16.mxu0 %v1521_v0  ;;  %1376 = vmatprep.subr.bf16.mxu1 %v1521_v0 }
  0x1a   :  { %1361 = vmatmul.mubr.msk.bf16.vlgmr.msra.gmra.mxu0 %vm57_vm0, %v1443_v19  ;;  %1367 = vmatmul.mubr.msk.bf16.vlgmr.msra.gmra.mxu1 %vm57_vm0, %v1444_v20  ;;  %v1724_v19 = vld [vmem:[%s1932_s2 + $0x18] sm:$0x1f]  }
  0x1b   :  { %1371 = vmatpush3.bf16.xpose.msra.mxu0 %v404_v21  ;;  %1377 = vmatpush3.bf16.xpose.msra.mxu1 %v461_v22  ;;  %v843_v20 = vand.u32 %v1724_v19, %v1705_v13  ;;  %v1731_v21 = vld [vmem:[%s1932_s2 + $0x20] sm:$0x1f]  }
  0x1c   :  { %1372 = vmatprep.mubr.msk.bf16.mxu0 %vm1522_vm1, %v1521_v0  ;;  %1378 = vmatprep.mubr.msk.bf16.mxu1 %vm1522_vm1, %v1521_v0  ;;  %v895_v22 = vand.u32 %v1731_v21, %v1705_v13 }
  0x1d   :  { %1382 = vmatprep.subr.bf16.mxu0 %v1521_v0  ;;  %1388 = vmatprep.subr.bf16.mxu1 %v1521_v0 }
  0x22   :  { %1373 = vmatmul.mubr.msk.bf16.vlgmr.msra.gmra.mxu0 %vm57_vm0, %v1447_v23  ;;  %1379 = vmatmul.mubr.msk.bf16.vlgmr.msra.gmra.mxu1 %vm57_vm0, %v1448_v24  ;;  %v1738_v23 = vld [vmem:[%s1932_s2 + $0x28] sm:$0x1f]  }
  0x23   :  { %1384 = vmatprep.mubr.msk.bf16.mxu0 %vm1522_vm1, %v1521_v0  ;;  %1390 = vmatprep.mubr.msk.bf16.mxu1 %vm1522_vm1, %v1521_v0  ;;  %v947_v24 = vand.u32 %v1738_v23, %v1705_v13 }
  0x24   :  { %1383 = vmatpush3.bf16.msra.mxu0 %v687_v15  ;;  %1389 = vmatpush3.bf16.msra.mxu1 %v739_v16 }
  0x25   :  { %1394 = vmatprep.subr.bf16.mxu0 %v1521_v0  ;;  %1400 = vmatprep.subr.bf16.mxu1 %v1521_v0 }
  0xca   :  { %v1638_v25 = vpop.f32.mrf.mxu0  ;;  %v1640_v26 = vpop.f32.mrf.mxu1 }
  0xcb   :  { %v505_v27 = vsel %vm504_vm2, %v1638_v25, -inf  ;;  %v512_v28 = vsel %vm504_vm2, %v1640_v26, -inf }
  0xcc   :  { %506 = vmax.xlane.f32.xlu0 %v505_v27  ;;  %v1338_v29 = vpop.f32.mrf.mxu0  ;;  %513 = vmax.xlane.f32.xlu1 %v512_v28  ;;  %v1344_v30 = vpop.f32.mrf.mxu1  ;;  %v1745_v27 = vld [vmem:[%s1932_s2 + $0x30] sm:$0x1f]  }
  0xcd   :  { %v999_v28 = vand.u32 %v1745_v27, %v1705_v13  ;;  %v1752_v29 = vld [vmem:[%s1932_s2 + $0x38] sm:$0x1f]  }
  0xce   :  { %v1646_v31 = vpop.f32.mrf.mxu0  ;;  %v1648_v32 = vpop.f32.mrf.mxu1  ;;  %v1051_v30 = vand.u32 %v1752_v29, %v1705_v13 }
  0xcf   :  { %v509_v33 = vsel %vm508_vm3, %v1646_v31, -inf  ;;  %v515_v34 = vsel %vm508_vm3, %v1648_v32, -inf }
  0xd0   :  { %510 = vmax.xlane.f32.xlu0 %v509_v33  ;;  %v1339_v35 = vpop.f32.mrf.mxu0  ;;  %516 = vmax.xlane.f32.xlu1 %v515_v34  ;;  %v1345_v36 = vpop.f32.mrf.mxu1 }
  0xd2   :  { %v1654_v37 = vpop.f32.mrf.mxu0  ;;  %v1656_v38 = vpop.f32.mrf.mxu1 }
  0xd3   :  { %v518_v39 = vsel %vm504_vm2, %v1654_v37, -inf  ;;  %v524_v42 = vsel %vm504_vm2, %v1656_v38, -inf }
  0xd4   :  { %519 = vmax.xlane.f32.xlu0 %v518_v39  ;;  %v1350_v40 = vpop.f32.mrf.mxu0  ;;  %v1356_v41 = vpop.f32.mrf.mxu1 }
  0xd6   :  { %v1662_v43 = vpop.f32.mrf.mxu0  ;;  %v1664_v44 = vpop.f32.mrf.mxu1 }
  0xd7   :  { %v521_v45 = vsel %vm508_vm3, %v1662_v43, -inf  ;;  %v527_v50 = vsel %vm508_vm3, %v1664_v44, -inf }
  0xd8   :  { %525 = vmax.xlane.f32.xlu0 %v524_v42  ;;  %522 = vmax.xlane.f32.xlu1 %v521_v45  ;;  %v1351_v46 = vpop.f32.mrf.mxu0  ;;  %v1357_v47 = vpop.f32.mrf.mxu1 }
  0xda   :  { %v1668_v48 = vpop.f32.mrf.mxu0  ;;  %v1670_v49 = vpop.f32.mrf.mxu1 }
  0xdb   :  { %v530_v51 = vsel %vm504_vm2, %v1668_v48, -inf  ;;  %v536_v54 = vsel %vm504_vm2, %v1670_v49, -inf }
  0xdc   :  { %528 = vmax.xlane.f32.xlu1 %v527_v50  ;;  %531 = vmax.xlane.f32.xlu0 %v530_v51  ;;  %v1362_v52 = vpop.f32.mrf.mxu0  ;;  %v1368_v53 = vpop.f32.mrf.mxu1 }
  0xde   :  { %v1678_v55 = vpop.f32.mrf.mxu0  ;;  %v1680_v56 = vpop.f32.mrf.mxu1 }
  0xdf   :  { %v533_v57 = vsel %vm508_vm3, %v1678_v55, -inf  ;;  %v539_v62 = vsel %vm508_vm3, %v1680_v56, -inf }
  0xe0   :  { %537 = vmax.xlane.f32.xlu0 %v536_v54  ;;  %534 = vmax.xlane.f32.xlu1 %v533_v57  ;;  %v1363_v58 = vpop.f32.mrf.mxu0  ;;  %v1369_v59 = vpop.f32.mrf.mxu1 }
  0xe2   :  { %v1684_v60 = vpop.f32.mrf.mxu0  ;;  %v1686_v61 = vpop.f32.mrf.mxu1 }
  0xe3   :  { %v542_v63 = vsel %vm504_vm2, %v1684_v60, -inf  ;;  %v548_v3 = vsel %vm504_vm2, %v1686_v61, -inf }
  0xe4   :  { %540 = vmax.xlane.f32.xlu1 %v539_v62  ;;  %543 = vmax.xlane.f32.xlu0 %v542_v63  ;;  %v1374_v1 = vpop.f32.mrf.mxu0  ;;  %v1380_v2 = vpop.f32.mrf.mxu1 }
  0xe6   :  { %v1694_v4 = vpop.f32.mrf.mxu0  ;;  %v1696_v5 = vpop.f32.mrf.mxu1 }
  0xe7   :  { %v545_v6 = vsel %vm508_vm3, %v1694_v4, -inf  ;;  %v551_v12 = vsel %vm508_vm3, %v1696_v5, -inf }
  0xe8   :  { %549 = vmax.xlane.f32.xlu0 %v548_v3  ;;  %546 = vmax.xlane.f32.xlu1 %v545_v6  ;;  %v1375_v7 = vpop.f32.mrf.mxu0  ;;  %v1381_v8 = vpop.f32.mrf.mxu1 }
  0xec   :  { %552 = vmax.xlane.f32.xlu1 %v551_v12 }
 0x155   :  { %v507_v33 = vpop.xlane.xlu0 %506  ;;  %v514_v34 = vpop.xlane.xlu1 %513 }
 0x156   :  { %v554_v35 = vsub.f32 %v1638_v25, %v507_v33  ;;  %v556_v36 = vsub.f32 %v1640_v26, %v514_v34 }
 0x158   :  { %v570_v39 = vmul.f32 1.442695, %v554_v35  ;;  %v574_v40 = vmul.f32 1.442695, %v556_v36 }
 0x159   :  { %v511_v41 = vpop.xlane.xlu0 %510  ;;  %v517_v42 = vpop.xlane.xlu1 %516 }
 0x15a   :  { %1457 = vpow2.f32 %v570_v39  ;;  %v555_v45 = vsub.f32 %v1646_v31, %v511_v41  ;;  %v557_v46 = vsub.f32 %v1648_v32, %v517_v42 }
 0x15b   :  { %1459 = vpow2.f32 %v574_v40 }
 0x15c   :  { %v572_v47 = vmul.f32 1.442695, %v555_v45  ;;  %v576_v50 = vmul.f32 1.442695, %v557_v46 }
 0x15d   :  { %v520_v51 = vpop.xlane.xlu0 %519 }
 0x15e   :  { %1461 = vpow2.f32 %v572_v47  ;;  %v558_v52 = vsub.f32 %v1654_v37, %v520_v51 }
 0x15f   :  { %1463 = vpow2.f32 %v576_v50 }
 0x160   :  { %v578_v25 = vmul.f32 1.442695, %v558_v52 }
 0x161   :  { %v526_v53 = vpop.xlane.xlu0 %525  ;;  %v523_v26 = vpop.xlane.xlu1 %522 }
 0x162   :  { %1465 = vpow2.f32 %v578_v25  ;;  %v560_v54 = vsub.f32 %v1656_v38, %v526_v53  ;;  %v559_v57 = vsub.f32 %v1662_v43, %v523_v26 }
 0x164   :  { %v582_v58 = vmul.f32 1.442695, %v560_v54  ;;  %v580_v31 = vmul.f32 1.442695, %v559_v57 }
 0x165   :  { %v529_v59 = vpop.xlane.xlu1 %528  ;;  %v532_v62 = vpop.xlane.xlu0 %531 }
 0x166   :  { %1467 = vpow2.f32 %v582_v58  ;;  %v561_v32 = vsub.f32 %v1664_v44, %v529_v59  ;;  %v562_v63 = vsub.f32 %v1668_v48, %v532_v62 }
 0x167   :  { %v1458_v1 = vpop.eup %1457  ;;  %1469 = vpow2.f32 %v580_v31 }
 0x168   :  { %v1460_v37 = vpop.eup %1459  ;;  %v584_v2 = vmul.f32 1.442695, %v561_v32  ;;  %v586_v3 = vmul.f32 1.442695, %v562_v63  ;;  %v602_v6 = vsel %vm504_vm2, %v1458_v1, 0.0 }
 0x169   :  { %v538_v7 = vpop.xlane.xlu0 %537  ;;  %v535_v38 = vpop.xlane.xlu1 %534  ;;  %603 = vadd.xlane.f32.xlu0 %v602_v6  ;;  %v608_v43 = vsel %vm504_vm2, %v1460_v37, 0.0 }
 0x16a   :  { %1471 = vpow2.f32 %v584_v2  ;;  %v564_v8 = vsub.f32 %v1670_v49, %v538_v7  ;;  %v563_v9 = vsub.f32 %v1678_v55, %v535_v38  ;;  %609 = vadd.xlane.f32.xlu1 %v608_v43 }
 0x16b   :  { %v1462_v44 = vpop.eup %1461  ;;  %1473 = vpow2.f32 %v586_v3 }
 0x16c   :  { %v1464_v48 = vpop.eup %1463  ;;  %v590_v10 = vmul.f32 1.442695, %v564_v8  ;;  %v588_v11 = vmul.f32 1.442695, %v563_v9  ;;  %v605_v12 = vsel %vm508_vm3, %v1462_v44, 0.0  ;;  %v650_v14 = vpack.c.bf16 %v1462_v44, %v1458_v1 }
 0x16d   :  { %v541_v15 = vpop.xlane.xlu1 %540  ;;  %606 = vadd.xlane.f32.xlu0 %v605_v12  ;;  %v544_v16 = vpop.xlane.xlu0 %543  ;;  %v611_v33 = vsel %vm508_vm3, %v1464_v48, 0.0  ;;  %v651_v34 = vpack.c.bf16 %v1464_v48, %v1460_v37 }
 0x16e   :  { %1475 = vpow2.f32 %v590_v10  ;;  %v565_v49 = vsub.f32 %v1680_v56, %v541_v15  ;;  %v566_v55 = vsub.f32 %v1684_v60, %v544_v16  ;;  %612 = vadd.xlane.f32.xlu1 %v611_v33  ;;  %1385 = vmatmul.mubr.msk.bf16.vlgmr.msra.gmra.mxu0 %vm504_vm2, %v650_v14 }
 0x16f   :  { %v1466_v35 = vpop.eup %1465  ;;  %1477 = vpow2.f32 %v588_v11  ;;  %1391 = vmatmul.mubr.msk.bf16.vlgmr.msra.gmra.mxu1 %vm504_vm2, %v651_v34  ;;  %1395 = vmatpush3.bf16.msra.mxu0 %v791_v18 }
 0x170   :  { %v592_v36 = vmul.f32 1.442695, %v565_v49  ;;  %v614_v39 = vsel %vm504_vm2, %v1466_v35, 0.0  ;;  %1401 = vmatpush3.bf16.msra.mxu1 %v843_v20  ;;  %1396 = vmatprep.mubr.msk.bf16.mxu0 %vm1522_vm1, %v1521_v0  ;;  %v594_v40 = vmul.f32 1.442695, %v566_v55 }
 0x171   :  { %615 = vadd.xlane.f32.xlu0 %v614_v39  ;;  %v550_v56 = vpop.xlane.xlu0 %549  ;;  %v547_v60 = vpop.xlane.xlu1 %546  ;;  %1402 = vmatprep.mubr.msk.bf16.mxu1 %vm1522_vm1, %v1521_v0 }
 0x172   :  { %1479 = vpow2.f32 %v592_v36  ;;  %v568_v17 = vsub.f32 %v1686_v61, %v550_v56  ;;  %v567_v18 = vsub.f32 %v1694_v4, %v547_v60  ;;  %1406 = vmatprep.subr.bf16.mxu0 %v1521_v0  ;;  %1412 = vmatprep.subr.bf16.mxu1 %v1521_v0 }
 0x173   :  { %v1468_v19 = vpop.eup %1467  ;;  %1481 = vpow2.f32 %v594_v40 }
 0x174   :  { %v1470_v20 = vpop.eup %1469  ;;  %v596_v41 = vmul.f32 1.442695, %v567_v18  ;;  %v620_v42 = vsel %vm504_vm2, %v1468_v19, 0.0  ;;  %v598_v45 = vmul.f32 1.442695, %v568_v17 }
 0x175   :  { %v617_v46 = vsel %vm508_vm3, %v1470_v20, 0.0  ;;  %621 = vadd.xlane.f32.xlu1 %v620_v42  ;;  %v553_v47 = vpop.xlane.xlu1 %552  ;;  %v652_v50 = vpack.c.bf16 %v1470_v20, %v1466_v35  ;;  %v1195_v18 = vld [vmem:[%s1933_s3 + $0x4] sm:$0x1]  ;;  %v1199_v42 = vld [vmem:[%s1933_s3 + $0xc] sm:$0x1] }
 0x176   :  { %618 = vadd.xlane.f32.xlu0 %v617_v46  ;;  %v569_v61 = vsub.f32 %v1696_v5, %v553_v47  ;;  %1483 = vpow2.f32 %v596_v41 }
 0x177   :  { %v1472_v4 = vpop.eup %1471  ;;  %1397 = vmatmul.mubr.msk.bf16.vlgmr.msra.gmra.mxu0 %vm504_vm2, %v652_v50  ;;  %1485 = vpow2.f32 %v598_v45 }
 0x178   :  { %v1474_v51 = vpop.eup %1473  ;;  %v600_v52 = vmul.f32 1.442695, %v569_v61  ;;  %v623_v25 = vsel %vm508_vm3, %v1472_v4, 0.0  ;;  %v653_v53 = vpack.c.bf16 %v1472_v4, %v1468_v19  ;;  %1407 = vmatpush3.bf16.msra.mxu0 %v895_v22  ;;  %1408 = vmatprep.mubr.msk.bf16.mxu0 %vm1522_vm1, %v1521_v0 }
 0x179   :  { %v626_v26 = vsel %vm504_vm2, %v1474_v51, 0.0  ;;  %624 = vadd.xlane.f32.xlu1 %v623_v25  ;;  %1418 = vmatprep.subr.bf16.mxu0 %v1521_v0 }
 0x17a   :  { %1487 = vpow2.f32 %v600_v52  ;;  %627 = vadd.xlane.f32.xlu0 %v626_v26  ;;  %1403 = vmatmul.mubr.msk.bf16.vlgmr.msra.gmra.mxu1 %vm504_vm2, %v653_v53 }
 0x17b   :  { %v1476_v5 = vpop.eup %1475  ;;  %1413 = vmatpush3.bf16.msra.mxu1 %v947_v24  ;;  %1414 = vmatprep.mubr.msk.bf16.mxu1 %vm1522_vm1, %v1521_v0 }
 0x17c   :  { %v1478_v21 = vpop.eup %1477  ;;  %v632_v22 = vsel %vm504_vm2, %v1476_v5, 0.0  ;;  %1424 = vmatprep.subr.bf16.mxu1 %v1521_v0 }
 0x17d   :  { %v629_v54 = vsel %vm508_vm3, %v1478_v21, 0.0  ;;  %633 = vadd.xlane.f32.xlu1 %v632_v22  ;;  %v654_v57 = vpack.c.bf16 %v1478_v21, %v1474_v51 }
 0x17e   :  { %630 = vadd.xlane.f32.xlu0 %v629_v54 }
 0x17f   :  { %v1480_v58 = vpop.eup %1479  ;;  %1409 = vmatmul.mubr.msk.bf16.vlgmr.msra.gmra.mxu0 %vm504_vm2, %v654_v57 }
 0x180   :  { %v635_v31 = vsel %vm508_vm3, %v1480_v58, 0.0  ;;  %v655_v23 = vpack.c.bf16 %v1480_v58, %v1476_v5  ;;  %1419 = vmatpush3.bf16.msra.mxu0 %v999_v28  ;;  %1420 = vmatprep.mubr.msk.bf16.mxu0 %vm1522_vm1, %v1521_v0  ;;  %v1482_v24 = vpop.eup %1481 }
 0x181   :  { %636 = vadd.xlane.f32.xlu1 %v635_v31  ;;  %v638_v37 = vsel %vm504_vm2, %v1482_v24, 0.0 }
 0x182   :  { %1415 = vmatmul.mubr.msk.bf16.vlgmr.msra.gmra.mxu1 %vm504_vm2, %v655_v23  ;;  %v1203_v23 = vld [vmem:[%s1933_s3 + $0x14] sm:$0x1] }
 0x183   :  { %1425 = vmatpush3.bf16.msra.mxu1 %v1051_v30  ;;  %1426 = vmatprep.mubr.msk.bf16.mxu1 %vm1522_vm1, %v1521_v0  ;;  %v1484_v59 = vpop.eup %1483 }
 0x184   :  { %v641_v62 = vsel %vm508_vm3, %v1484_v59, 0.0  ;;  %v656_v32 = vpack.c.bf16 %v1484_v59, %v1482_v24  ;;  %v1486_v27 = vpop.eup %1485 }
 0x185   :  { %642 = vadd.xlane.f32.xlu0 %v641_v62  ;;  %v644_v0 = vsel %vm504_vm2, %v1486_v27, 0.0 }
 0x187   :  { %v1488_v28 = vpop.eup %1487  ;;  %1421 = vmatmul.mubr.msk.bf16.vlgmr.msra.gmra.mxu0 %vm504_vm2, %v656_v32 }
 0x188   :  { %v647_v63 = vsel %vm508_vm3, %v1488_v28, 0.0  ;;  %v657_v1 = vpack.c.bf16 %v1488_v28, %v1486_v27 }
 0x189   :  { %648 = vadd.xlane.f32.xlu1 %v647_v63  ;;  %639 = vadd.xlane.f32.xlu0 %v638_v37 }
 0x18a   :  { %1427 = vmatmul.mubr.msk.bf16.vlgmr.msra.gmra.mxu1 %vm504_vm2, %v657_v1 }
 0x18d   :  { %645 = vadd.xlane.f32.xlu1 %v644_v0  ;;  %v1207_v0 = vld [vmem:[%s1933_s3 + $0x1c] sm:$0x1] }
 0x1f2   :  { %v604_v13 = vpop.xlane.xlu0 %603 }
 0x1f3   :  { %v610_v29 = vpop.xlane.xlu1 %609  ;;  %1489 = vrcp.f32 %v604_v13 }
 0x1f4   :  { %1491 = vrcp.f32 %v610_v29 }
 0x1f6   :  { %v607_v30 = vpop.xlane.xlu0 %606 }
 0x1f7   :  { %v613_v2 = vpop.xlane.xlu1 %612  ;;  %1493 = vrcp.f32 %v607_v30 }
 0x1f8   :  { %1495 = vrcp.f32 %v613_v2 }
 0x1fa   :  { %v616_v3 = vpop.xlane.xlu0 %615 }
 0x1fb   :  { %1497 = vrcp.f32 %v616_v3 }
 0x1fe   :  { %v622_v6 = vpop.xlane.xlu1 %621 }
 0x1ff   :  { %v619_v7 = vpop.xlane.xlu0 %618  ;;  %1499 = vrcp.f32 %v622_v6 }
 0x200   :  { %v1490_v44 = vpop.eup %1489  ;;  %1501 = vrcp.f32 %v619_v7 }
 0x201   :  { %v1492_v10 = vpop.eup %1491 }
 0x202   :  { %v625_v38 = vpop.xlane.xlu1 %624 }
 0x203   :  { %v628_v43 = vpop.xlane.xlu0 %627  ;;  %1503 = vrcp.f32 %v625_v38 }
 0x204   :  { %v1494_v55 = vpop.eup %1493  ;;  %1505 = vrcp.f32 %v628_v43 }
 0x205   :  { %v1496_v39 = vpop.eup %1495 }
 0x206   :  { %v634_v8 = vpop.xlane.xlu1 %633 }
 0x207   :  { %v631_v9 = vpop.xlane.xlu0 %630  ;;  %1507 = vrcp.f32 %v634_v8 }
 0x208   :  { %1509 = vrcp.f32 %v631_v9  ;;  %v1498_v47 = vpop.eup %1497 }
 0x20a   :  { %v637_v14 = vpop.xlane.xlu1 %636 }
 0x20b   :  { %1511 = vrcp.f32 %v637_v14 }
 0x20c   :  { %v1500_v53 = vpop.eup %1499 }
 0x20d   :  { %v1502_v22 = vpop.eup %1501 }
 0x20e   :  { %v643_v33 = vpop.xlane.xlu0 %642 }
 0x210   :  { %v1504_v62 = vpop.eup %1503 }
 0x211   :  { %v1506_v28 = vpop.eup %1505 }
 0x212   :  { %v649_v40 = vpop.xlane.xlu1 %648  ;;  %v640_v50 = vpop.xlane.xlu0 %639 }
 0x213   :  { %1513 = vrcp.f32 %v640_v50  ;;  %v1219_v50 = vld [vmem:[%s1933_s3 + $0x34] sm:$0x1] }
 0x214   :  { %v1508_v3 = vpop.eup %1507 }
 0x215   :  { %v1510_v38 = vpop.eup %1509 }
 0x216   :  { %v646_v26 = vpop.xlane.xlu1 %645 }
 0x217   :  { %1515 = vrcp.f32 %v646_v26 }
 0x218   :  { %1517 = vrcp.f32 %v643_v33  ;;  %v1512_v14 = vpop.eup %1511 }
 0x219   :  { %1519 = vrcp.f32 %v649_v40 }
 0x220   :  { %v1514_v33 = vpop.eup %1513 }
 0x224   :  { %v1516_v40 = vpop.eup %1515 }
 0x22e   :  { %v723_v48 = vpop.f32.mrf.mxu0 }
 0x22f   :  { %v1110_v11 = vmul.f32 %v1490_v44, %v723_v48  ;;  %v775_v12 = vpop.f32.mrf.mxu1 }
 0x230   :  { %v1112_v15 = vmul.f32 %v1492_v10, %v775_v12  ;;  %v1386_v16 = vpop.f32.mrf.mxu0  ;;  %v1211_v10 = vld [vmem:[%s1933_s3 + $0x24] sm:$0x1] }
 0x231   :  { %v1286_v34 = vpack.c.bf16 %v1110_v11, %v1110_v11  ;;  %v1392_v49 = vpop.f32.mrf.mxu1 }
 0x232   :  { %v1288_v35 = vpack.c.bf16 %v1112_v15, %v1112_v15  ;;  %v726_v36 = vpop.f32.mrf.mxu0 }
 0x233   :  { %1191 = vst.msk [vmem:[%s1933_s3] sm:$0xf] %vm1190_vm6, %v1286_v34  ;;  %v1111_v56 = vmul.f32 %v1494_v55, %v726_v36  ;;  %v778_v60 = vpop.f32.mrf.mxu1 }
 0x234   :  { %1198 = vst.msk [vmem:[%s1933_s3 + $0x8] sm:$0xf] %vm1190_vm6, %v1288_v35  ;;  %v1113_v19 = vmul.f32 %v1496_v39, %v778_v60  ;;  %v1387_v20 = vpop.f32.mrf.mxu0  ;;  %v1215_v35 = vld [vmem:[%s1933_s3 + $0x2c] sm:$0x1] }
 0x235   :  { %v1287_v41 = vpack.c.bf16 %v1111_v56, %v1111_v56  ;;  %v1393_v45 = vpop.f32.mrf.mxu1  ;;  %v1518_v20 = vpop.eup %1517 }
 0x236   :  { %v1289_v46 = vpack.c.bf16 %v1113_v19, %v1113_v19 }
 0x237   :  { %v1196_v61 = vsel %vm1838_vm9, %v1287_v41, %v1195_v18  ;;  %v827_v4 = vpop.f32.mrf.mxu0 }
 0x238   :  { %1197 = vst [vmem:[%s1933_s3 + $0x4] sm:$0x1] %v1196_v61  ;;  %v1200_v51 = vsel %vm1838_vm9, %v1289_v46, %v1199_v42  ;;  %v1114_v52 = vmul.f32 %v1498_v47, %v827_v4 }
 0x239   :  { %1201 = vst [vmem:[%s1933_s3 + $0xc] sm:$0x1] %v1200_v51  ;;  %v1398_v25 = vpop.f32.mrf.mxu0  ;;  %v1520_v51 = vpop.eup %1519 }
 0x23a   :  { %v1290_v5 = vpack.c.bf16 %v1114_v52, %v1114_v52  ;;  %v879_v21 = vpop.f32.mrf.mxu1 }
 0x23b   :  { %v830_v54 = vpop.f32.mrf.mxu0  ;;  %v1116_v57 = vmul.f32 %v1500_v53, %v879_v21 }
 0x23c   :  { %1202 = vst.msk [vmem:[%s1933_s3 + $0x10] sm:$0xf] %vm1190_vm6, %v1290_v5  ;;  %v1115_v58 = vmul.f32 %v1502_v22, %v830_v54  ;;  %v1404_v31 = vpop.f32.mrf.mxu1  ;;  %v1223_v5 = vld [vmem:[%s1933_s3 + $0x3c] sm:$0x1] }
 0x23d   :  { %v1292_v24 = vpack.c.bf16 %v1116_v57, %v1116_v57  ;;  %v1399_v59 = vpop.f32.mrf.mxu0 }
 0x23e   :  { %v1291_v32 = vpack.c.bf16 %v1115_v58, %v1115_v58  ;;  %v882_v27 = vpop.f32.mrf.mxu1 }
 0x23f   :  { %1206 = vst.msk [vmem:[%s1933_s3 + $0x18] sm:$0xf] %vm1190_vm6, %v1292_v24  ;;  %v1117_v63 = vmul.f32 %v1504_v62, %v882_v27  ;;  %v931_v1 = vpop.f32.mrf.mxu0 }
 0x240   :  { %v1204_v37 = vsel %vm1838_vm9, %v1291_v32, %v1203_v23  ;;  %v1118_v13 = vmul.f32 %v1506_v28, %v931_v1  ;;  %v1405_v29 = vpop.f32.mrf.mxu1 }
 0x241   :  { %1205 = vst [vmem:[%s1933_s3 + $0x14] sm:$0x1] %v1204_v37  ;;  %v1293_v30 = vpack.c.bf16 %v1117_v63, %v1117_v63  ;;  %v1410_v2 = vpop.f32.mrf.mxu0 }
 0x242   :  { %v1294_v6 = vpack.c.bf16 %v1118_v13, %v1118_v13  ;;  %v983_v7 = vpop.f32.mrf.mxu1 }
 0x243   :  { %v1208_v43 = vsel %vm1838_vm9, %v1293_v30, %v1207_v0  ;;  %v934_v8 = vpop.f32.mrf.mxu0  ;;  %v1120_v9 = vmul.f32 %v1508_v3, %v983_v7 }
 0x244   :  { %1209 = vst [vmem:[%s1933_s3 + $0x1c] sm:$0x1] %v1208_v43  ;;  %1210 = vst.msk [vmem:[%s1933_s3 + $0x20] sm:$0xf] %vm1190_vm6, %v1294_v6  ;;  %v1119_v44 = vmul.f32 %v1510_v38, %v934_v8  ;;  %v1416_v48 = vpop.f32.mrf.mxu1 }
 0x245   :  { %v1296_v11 = vpack.c.bf16 %v1120_v9, %v1120_v9  ;;  %v1411_v12 = vpop.f32.mrf.mxu0 }
 0x246   :  { %v1295_v15 = vpack.c.bf16 %v1119_v44, %v1119_v44  ;;  %v986_v16 = vpop.f32.mrf.mxu1 }
 0x247   :  { %1214 = vst.msk [vmem:[%s1933_s3 + $0x28] sm:$0xf] %vm1190_vm6, %v1296_v11  ;;  %v1121_v34 = vmul.f32 %v1512_v14, %v986_v16  ;;  %v1035_v49 = vpop.f32.mrf.mxu0 }
 0x248   :  { %v1212_v55 = vsel %vm1838_vm9, %v1295_v15, %v1211_v10  ;;  %v1122_v36 = vmul.f32 %v1514_v33, %v1035_v49  ;;  %v1417_v39 = vpop.f32.mrf.mxu1 }
 0x249   :  { %1213 = vst [vmem:[%s1933_s3 + $0x24] sm:$0x1] %v1212_v55  ;;  %v1297_v56 = vpack.c.bf16 %v1121_v34, %v1121_v34  ;;  %v1422_v60 = vpop.f32.mrf.mxu0 }
 0x24a   :  { %v1298_v18 = vpack.c.bf16 %v1122_v36, %v1122_v36  ;;  %v1087_v19 = vpop.f32.mrf.mxu1 }
 0x24b   :  { %v1216_v41 = vsel %vm1838_vm9, %v1297_v56, %v1215_v35  ;;  %v1038_v42 = vpop.f32.mrf.mxu0  ;;  %v1124_v45 = vmul.f32 %v1516_v40, %v1087_v19 }
 0x24c   :  { %1217 = vst [vmem:[%s1933_s3 + $0x2c] sm:$0x1] %v1216_v41  ;;  %1218 = vst.msk [vmem:[%s1933_s3 + $0x30] sm:$0xf] %vm1190_vm6, %v1298_v18  ;;  %v1123_v46 = vmul.f32 %v1518_v20, %v1038_v42  ;;  %v1428_v47 = vpop.f32.mrf.mxu1 }
 0x24d   :  { %v1300_v61 = vpack.c.bf16 %v1124_v45, %v1124_v45  ;;  %v1423_v4 = vpop.f32.mrf.mxu0 }
 0x24e   :  { %v1299_v52 = vpack.c.bf16 %v1123_v46, %v1123_v46  ;;  %v1090_v25 = vpop.f32.mrf.mxu1 }
 0x24f   :  { %1222 = vst.msk [vmem:[%s1933_s3 + $0x38] sm:$0xf] %vm1190_vm6, %v1300_v61  ;;  %v1125_v53 = vmul.f32 %v1520_v51, %v1090_v25 }
 0x250   :  { %v1220_v26 = vsel %vm1838_vm9, %v1299_v52, %v1219_v50  ;;  %v1429_v21 = vpop.f32.mrf.mxu1 }
 0x251   :  { %1221 = vst [vmem:[%s1933_s3 + $0x34] sm:$0x1] %v1220_v26  ;;  %v1301_v22 = vpack.c.bf16 %v1125_v53, %v1125_v53 }
 0x253   :  { %v1224_v54 = vsel %vm1838_vm9, %v1301_v22, %v1223_v5 }
 0x254   :  { %1225 = vst [vmem:[%s1933_s3 + $0x3c] sm:$0x1] %v1224_v54 }

// kernel: gridnet_block_forward.29
= control target key start
LH: loop header
LB: loop body
LE: loop exit
PB: predicated region body
PF: predicated region fallthrough
CT: control target
= control target key end

     0   :  { %vm38_vm0 = vcmask 523264   ;;  %vm45_vm1 = vcmask 517120   ;;  %s197_s0 = inlined_call_operand.<no memory space> [shape: f32[1], index: 0, kind: input, shape index: {}]   ;;  %s198_s1 = inlined_call_operand.vmem [shape: bf16[1,18,64], index: 1, kind: input, shape index: {}]   ;;  %s199_s3 = inlined_call_operand.vmem [shape: f32[1,1,64], index: 3, kind: input, shape index: {}]   ;;  %s200_s4 = inlined_call_operand.vmem [shape: f32[1,1,64], index: 4, kind: input, shape index: {}]   ;;  %s201_s2 = inlined_call_operand.vmem [shape: f32[1,18,64], index: 2, kind: input, shape index: {}]   ;;  %s202_s5 = inlined_call_operand.vmem [shape: f32[1,18,64], index: 5, kind: output, shape index: {}]  }
   0x1   :  { %v116_v0 = vld [vmem:[%s198_s1] sm:$0xff]   ;;  %v31_v1 = vstv %s197_s0  ;;  %v24_v2 = vld [vmem:[%s198_s1 + $0x8] sm:$0x1]  ;;  %v102_v52 = vld [vmem:[%s201_s2 + $0x10] sm:$0x3] }
   0x2   :  { %v117_v3 = vunpack.c.l.bf16 %v116_v0  ;;  %v27_v4 = vunpack.c.l.bf16 %v24_v2  ;;  %v118_v5 = vunpack.c.h.bf16 %v116_v0  ;;  %v113_v40 = vld [vmem:[%s199_s3] ss:$0 sm:$0xff]  ;;  %v101_v55 = vld [vmem:[%s201_s2 + $0x8] sm:$0xff] }
   0x3   :  { %v114_v42 = vld [vmem:[%s200_s4] ss:$0 sm:$0xff] }
   0x4   :  { %vm28_vm2 = vcmp.ge.f32.partialorder %v117_v3, 0.0  ;;  %v32_v6 = vmul.f32 %v117_v3, %v31_v1  ;;  %vm30_vm3 = vcmp.ge.f32.partialorder %v27_v4, 0.0  ;;  %v34_v7 = vmul.f32 %v31_v1, %v27_v4  ;;  %v100_v45 = vld [vmem:[%s201_s2] sm:$0xff] }
   0x5   :  { %vm29_vm4 = vcmp.ge.f32.partialorder %v118_v5, 0.0  ;;  %v33_v8 = vmul.f32 %v118_v5, %v31_v1 }
   0x6   :  { %v35_v9 = vsel %vm28_vm2, %v117_v3, %v32_v6  ;;  %v37_v10 = vsel %vm30_vm3, %v27_v4, %v34_v7 }
   0x7   :  { %v39_v11 = vsel %vm38_vm0, %v35_v9, 0.0  ;;  %v46_v12 = vsel %vm45_vm1, %v37_v10, 0.0  ;;  %v36_v13 = vsel %vm29_vm4, %v118_v5, %v33_v8 }
   0x8   :  { %40 = vadd.xlane.f32.xlu0 %v39_v11  ;;  %47 = vadd.xlane.f32.xlu1 %v46_v12  ;;  %v42_v14 = vsel %vm38_vm0, %v36_v13, 0.0 }
   0xc   :  { %43 = vadd.xlane.f32.xlu0 %v42_v14 }
  0x91   :  { %v41_v15 = vpop.xlane.xlu0 %40  ;;  %v48_v16 = vpop.xlane.xlu1 %47 }
  0x92   :  { %v50_v17 = vmul.f32 0.015625, %v41_v15  ;;  %v52_v18 = vmul.f32 0.015625, %v48_v16 }
  0x94   :  { %v53_v19 = vsub.f32 %v35_v9, %v50_v17  ;;  %v55_v20 = vsub.f32 %v37_v10, %v52_v18 }
  0x95   :  { %v44_v21 = vpop.xlane.xlu0 %43 }
  0x96   :  { %v51_v22 = vmul.f32 0.015625, %v44_v21  ;;  %v56_v23 = vmul.f32 %v53_v19, %v53_v19  ;;  %v58_v24 = vmul.f32 %v55_v20, %v55_v20 }
  0x98   :  { %v54_v25 = vsub.f32 %v36_v13, %v51_v22  ;;  %v59_v26 = vsel %vm38_vm0, %v56_v23, 0.0  ;;  %v65_v27 = vsel %vm45_vm1, %v58_v24, 0.0 }
  0x99   :  { %60 = vadd.xlane.f32.xlu1 %v59_v26 }
  0x9a   :  { %v57_v28 = vmul.f32 %v54_v25, %v54_v25 }
  0x9c   :  { %v62_v29 = vsel %vm38_vm0, %v57_v28, 0.0 }
  0x9d   :  { %66 = vadd.xlane.f32.xlu1 %v65_v27  ;;  %63 = vadd.xlane.f32.xlu0 %v62_v29 }
 0x122   :  { %v61_v30 = vpop.xlane.xlu1 %60 }
 0x123   :  { %v68_v31 = vmul.f32 0.015625, %v61_v30 }
 0x125   :  { %v71_v32 = vadd.f32 1e-05, %v68_v31 }
 0x126   :  { %v67_v33 = vpop.xlane.xlu1 %66  ;;  %v64_v34 = vpop.xlane.xlu0 %63 }
 0x127   :  { %119 = vrsqrt.f32 %v71_v32  ;;  %v70_v35 = vmul.f32 0.015625, %v67_v33  ;;  %v69_v36 = vmul.f32 0.015625, %v64_v34 }
 0x129   :  { %v73_v37 = vadd.f32 1e-05, %v70_v35  ;;  %v72_v38 = vadd.f32 1e-05, %v69_v36 }
 0x12b   :  { %121 = vrsqrt.f32 %v73_v37 }
 0x12c   :  { %123 = vrsqrt.f32 %v72_v38 }
 0x134   :  { %v120_v39 = vpop.eup %119 }
 0x135   :  { %v77_v41 = vmul.f32 %v120_v39, %v53_v19 }
 0x137   :  { %v87_v43 = vmul.f32 %v113_v40, %v77_v41 }
 0x138   :  { %v122_v44 = vpop.eup %121 }
 0x139   :  { %v124_v46 = vpop.eup %123  ;;  %v97_v47 = vadd.f32 %v114_v42, %v87_v43  ;;  %v79_v48 = vmul.f32 %v122_v44, %v55_v20 }
 0x13a   :  { %v78_v49 = vmul.f32 %v124_v46, %v54_v25 }
 0x13b   :  { %v103_v50 = vadd.f32 %v100_v45, %v97_v47  ;;  %v89_v51 = vmul.f32 %v113_v40, %v79_v48 }
 0x13c   :  { %v88_v53 = vmul.f32 %v113_v40, %v78_v49 }
 0x13d   :  { %106 = vst.msk [vmem:[%s202_s5] sm:$0xff] %vm38_vm0, %v103_v50  ;;  %v99_v54 = vadd.f32 %v114_v42, %v89_v51 }
 0x13e   :  { %v98_v56 = vadd.f32 %v114_v42, %v88_v53 }
 0x13f   :  { %v105_v57 = vadd.f32 %v102_v52, %v99_v54 }
 0x140   :  { %v104_v58 = vadd.f32 %v101_v55, %v98_v56 }
 0x141   :  { %108 = vst.msk [vmem:[%s202_s5 + $0x10] sm:$0x3] %vm45_vm1, %v105_v57 }
 0x142   :  { %107 = vst.msk [vmem:[%s202_s5 + $0x8] sm:$0xff] %vm38_vm0, %v104_v58 }

</bundles_post_ra>
